<compile_context>
chip_gen: v5e
topology: v5e:2x2
jax: 0.10.0
libtpu: 0.0.40
codegen_flags: <defaults>
</compile_context>

<pallas_src>
import math

import jax
import jax.numpy as jnp
from jax import lax
from jax.experimental import pallas as pl
from jax.experimental.pallas import tpu as pltpu  # noqa: F401  (kept for TPU-specific tuning hooks)

# ----------------------------- small, module-consistent sizes -----------------------------
B = 2            # batch
L = 8            # sequence length
D_MODEL = 32     # encoder_d_model
N_HEADS = 4      # encoder_attention_heads
D_K = D_MODEL // N_HEADS           # 8
D_HALF = D_K // 2                  # 4
D_FF = D_MODEL * 3                 # encoder_d_ff = 96
D_STATE = 8                        # lrnn_state
D_EXPAND = D_MODEL                 # lrnn_expand == encoder_d_model
K_SSM = 4 * D_STATE + 1
LN_EPS = 1e-5
BL = B * L                         # 16
BD = B * D_EXPAND                  # 64

# ------------------------------ packed-slab layout constants ------------------------------
# w_in slab (D_MODEL rows): every weight whose input dim is D_MODEL, at 128-aligned offsets.
QKV_OFF, QKV_W = 0, 96         # [wq1|wq2|wk1|wk2|wv]  (q pre-scaled by 1/sqrt(d_k))
FFN_OFF, FFN_W = 128, 224      # w1 at +0..96, w3 at +128..224
LRN_OFF, LRN_W = 384, 160      # wing at +0..32, winx at +128..160
WO_OFF = 640
WOUT_OFF = 768
WIN_W = 896

# bias / vector slab rows (each row holds one (1, n) vector)
(R_LN1W, R_LN1B, R_LN2W, R_LN2B, R_LN3W, R_LN3B,
 R_BQKV, R_BO, R_BFFN, R_B2, R_BLRN, R_BOUT, R_DPAR) = range(13)
VEC_R, VEC_W = 16, 224

# attention-constant slab (N_HEADS*BL, AC_W)
AC_HMQ, AC_HMV, AC_BIAS, AC_ROPE, AC_W = 0, 32, 64, 80, 96

# SSM-constant slab (SSM_R, BD): 12 blocks of D_STATE rows + delta weight/bias rows.
(S_ARE, S_AIM, S_IRE, S_IIM, S_WBR, S_BBR, S_WBI, S_BBI,
 S_WCR, S_BCR, S_WCI, S_BCI) = [i * D_STATE for i in range(12)]
S_WDLT = 12 * D_STATE            # 96  (8-aligned single rows)
S_BDLT = 13 * D_STATE            # 104
SSM_R = 14 * D_STATE             # 112


# ------------------------------------ fused kernel ---------------------------------------
def encoder_layer_kernel(x_ref, w_ref, w2_ref, vec_ref, ac_ref, ssm_ref, o_ref):
    f32 = jnp.float32
    vecs = vec_ref[...]                                        # (VEC_R, VEC_W)
    ac = ac_ref[...]                                           # (4*BL, AC_W)

    def vec(row, width=D_MODEL):
        return vecs[row:row + 1, 0:width]

    def layernorm(v, w_row, b_row):
        mu = jnp.mean(v, axis=-1, keepdims=True)
        var = jnp.mean((v - mu) ** 2, axis=-1, keepdims=True)
        return (v - mu) * lax.rsqrt(var + LN_EPS) * w_row + b_row

    def silu(v):
        return v * pl.reciprocal(1.0 + jnp.exp(-v), approx=True)

    x = x_ref[...]                                             # (BL, D_MODEL), batch-major rows

    # ------------------------------ attention block ------------------------------
    x2 = layernorm(x, vec(R_LN1W), vec(R_LN1B))
    qkv = (jnp.dot(x2, w_ref[:, QKV_OFF:QKV_OFF + QKV_W], preferred_element_type=f32)
           + vec(R_BQKV, QKV_W))                               # (BL, 96)
    q1, q2 = qkv[:, 0:16], qkv[:, 16:32]
    k1, k2 = qkv[:, 32:48], qkv[:, 48:64]
    v = qkv[:, 64:96]
    cos = ac[0:BL, AC_ROPE:AC_ROPE + 16]
    sin = ac[BL:2 * BL, AC_ROPE:AC_ROPE + 16]
    # RoPE in half-split layout: pure elementwise complex rotation.
    qr = jnp.concatenate([q1 * cos - q2 * sin, q2 * cos + q1 * sin], axis=-1)   # (BL, 32)
    kr = jnp.concatenate([k1 * cos - k2 * sin, k2 * cos + k1 * sin], axis=-1)   # (BL, 32)

    hmq = ac[:, AC_HMQ:AC_HMQ + D_MODEL]                       # (4*BL, 32)  head mask (q layout)
    hmv = ac[:, AC_HMV:AC_HMV + D_MODEL]                       # (4*BL, 32)  head mask (v layout)
    bias = ac[:, AC_BIAS:AC_BIAS + BL]                         # (4*BL, BL)  causal+batch, tiled x4
    # Stacked-head scores: one matmul for all heads (scale folded into Q weights).
    q_stack = jnp.concatenate([qr, qr, qr, qr], axis=0) * hmq  # (4*BL, 32)
    sc = lax.dot_general(q_stack, kr, (((1,), (1,)), ((), ())),
                         preferred_element_type=f32) + bias    # (4*BL, BL)
    # One batched softmax for all 4 heads.
    sc = sc - jnp.max(sc, axis=-1, keepdims=True)
    p = jnp.exp(sc)
    p = p * pl.reciprocal(jnp.sum(p, axis=-1, keepdims=True), approx=True)
    # One P@V, then 4-block sublane-group sum to place each head's lanes.
    ctx4 = jnp.dot(p, v, preferred_element_type=f32) * hmv     # (4*BL, 32)
    ctx = ctx4[0:BL] + ctx4[BL:2 * BL] + ctx4[2 * BL:3 * BL] + ctx4[3 * BL:4 * BL]
    x = x + (jnp.dot(ctx, w_ref[:, WO_OFF:WO_OFF + D_MODEL], preferred_element_type=f32)
             + vec(R_BO))

    # ------------------------------ SwiGLU FFN block ------------------------------
    x2 = layernorm(x, vec(R_LN2W), vec(R_LN2B))
    hh = (jnp.dot(x2, w_ref[:, FFN_OFF:FFN_OFF + FFN_W], preferred_element_type=f32)
          + vec(R_BFFN, FFN_W))                                # (BL, 224) = [h1 | pad | h3]
    ff = silu(hh[:, 0:D_FF]) * hh[:, 128:128 + D_FF]
    x = x + jnp.dot(ff, w2_ref[...], preferred_element_type=f32) + vec(R_B2)

    # ------------------------------ LRNN (complex SSM) block ------------------------------
    x2 = layernorm(x, vec(R_LN3W), vec(R_LN3B))
    gu = (jnp.dot(x2, w_ref[:, LRN_OFF:LRN_OFF + LRN_W], preferred_element_type=f32)
          + vec(R_BLRN, LRN_W))                                # (BL, 160) = [gate | pad | u]
    gate = silu(gu[:, 0:D_EXPAND])                             # (BL, D)
    u = gu[:, 128:128 + D_EXPAND]                              # (BL, D)

    # Re-layout to (L, B*D): both batch elements side by side along lanes.
    u_p = jnp.concatenate([u[0:L, :], u[L:2 * L, :]], axis=1)  # (L, BD)
    raw = u_p * ssm_ref[S_WDLT:S_WDLT + 1, :] + ssm_ref[S_BDLT:S_BDLT + 1, :]
    # stable softplus, then clamp (matches reference discretize()).
    delta = jnp.clip(jnp.maximum(raw, 0.0) + jnp.log(1.0 + jnp.exp(-jnp.abs(raw))), 1e-4, 1.0)

    def blk(off):
        return ssm_ref[off:off + D_STATE, :][None]             # (1, S, BD)

    # ---- hoisted, batched precompute of everything non-recurrent: (L, S, BD) ----
    d3, u3 = delta[:, None, :], u_p[:, None, :]                # (L, 1, BD)
    z_re, z_im = d3 * blk(S_ARE), d3 * blk(S_AIM)
    ez = jnp.exp(z_re)
    a_re, a_im = ez * jnp.cos(z_im), ez * jnp.sin(z_im)        # A_bar
    n_re, n_im = d3 * (a_re - 1.0), d3 * a_im                  # delta * (exp(z) - 1)
    i_re, i_im = blk(S_IRE), blk(S_IIM)                        # 1 / A_safe
    bb_re = n_re * i_re - n_im * i_im
    bb_im = n_re * i_im + n_im * i_re
    bin_re = u3 * blk(S_WBR) + blk(S_BBR)                      # depthwise B(t)
    bin_im = u3 * blk(S_WBI) + blk(S_BBI)
    c_re = u3 * blk(S_WCR) + blk(S_BCR)                        # depthwise C(t)
    c_im = u3 * blk(S_WCI) + blk(S_BCI)
    bu_re = (bb_re * bin_re - bb_im * bin_im) * u3             # B_bar * u
    bu_im = (bb_re * bin_im + bb_im * bin_re) * u3

    # ---- 8-step serial recurrence (both batches together); body is only h = a*h + b ----
    h_re = jnp.zeros((D_STATE, BD), f32)
    h_im = jnp.zeros((D_STATE, BD), f32)
    y_rows = []
    for t in range(L):
        ar, ai = a_re[t], a_im[t]
        nr = ar * h_re - ai * h_im + bu_re[t]
        ni = ar * h_im + ai * h_re + bu_im[t]
        h_re, h_im = nr, ni
        # C-contraction branches off the chain (does not feed back into h).
        y_rows.append(jnp.sum(h_re * c_re[t] - h_im * c_im[t], axis=0, keepdims=True))
    y_p = jnp.concatenate(y_rows, axis=0)                      # (L, BD)
    y = jnp.concatenate([y_p[:, 0:D_EXPAND], y_p[:, D_EXPAND:BD]], axis=0)   # (BL, D)
    y = y + u * vec(R_DPAR)
    x = x + (jnp.dot(y * gate, w_ref[:, WOUT_OFF:WOUT_OFF + D_MODEL],
                     preferred_element_type=f32) + vec(R_BOUT))

    o_ref[...] = x


# --------------------------------- wrapper / precompute ----------------------------------
def prepare_inputs(p, mask, cos, sin):
    """One-time packing of all parameters/constants into 5 slabs (hoisted out of the fwd jit)."""
    f32 = jnp.float32
    scale = 1.0 / math.sqrt(D_K)

    # --- attention: half-split head column permutation; fold 1/sqrt(d_k) into Q ---
    heads = jnp.arange(N_HEADS)
    first = (heads[:, None] * D_K + jnp.arange(D_HALF)[None, :]).reshape(-1)
    second = first + D_HALF
    w_qkv = jnp.concatenate([p["wq"][:, first] * scale, p["wq"][:, second] * scale,
                             p["wk"][:, first], p["wk"][:, second], p["wv"]], axis=1)
    b_qkv = jnp.concatenate([p["bq"][:, first] * scale, p["bq"][:, second] * scale,
                             p["bk"][:, first], p["bk"][:, second], p["bv"]], axis=1)

    # --- big D_MODEL-row weight slab (128-aligned blocks) ---
    w_in = jnp.zeros((D_MODEL, WIN_W), f32)
    w_in = w_in.at[:, QKV_OFF:QKV_OFF + QKV_W].set(w_qkv)
    w_in = w_in.at[:, FFN_OFF:FFN_OFF + D_FF].set(p["w1"])
    w_in = w_in.at[:, FFN_OFF + 128:FFN_OFF + 128 + D_FF].set(p["w3"])
    w_in = w_in.at[:, LRN_OFF:LRN_OFF + D_EXPAND].set(p["win"][:, :D_EXPAND])
    w_in = w_in.at[:, LRN_OFF + 128:LRN_OFF + 128 + D_EXPAND].set(p["win"][:, D_EXPAND:])
    w_in = w_in.at[:, WO_OFF:WO_OFF + D_MODEL].set(p["wo"])
    w_in = w_in.at[:, WOUT_OFF:WOUT_OFF + D_MODEL].set(p["wout"])

    # --- bias / vector slab ---
    vecs = jnp.zeros((VEC_R, VEC_W), f32)
    vecs = vecs.at[R_LN1W, 0:D_MODEL].set(p["ln1_w"][0])
    vecs = vecs.at[R_LN1B, 0:D_MODEL].set(p["ln1_b"][0])
    vecs = vecs.at[R_LN2W, 0:D_MODEL].set(p["ln2_w"][0])
    vecs = vecs.at[R_LN2B, 0:D_MODEL].set(p["ln2_b"][0])
    vecs = vecs.at[R_LN3W, 0:D_MODEL].set(p["ln3_w"][0])
    vecs = vecs.at[R_LN3B, 0:D_MODEL].set(p["ln3_b"][0])
    vecs = vecs.at[R_BQKV, 0:QKV_W].set(b_qkv[0])
    vecs = vecs.at[R_BO, 0:D_MODEL].set(p["bo"][0])
    vecs = vecs.at[R_BFFN, 0:D_FF].set(p["b1"][0])
    vecs = vecs.at[R_BFFN, 128:128 + D_FF].set(p["b3"][0])
    vecs = vecs.at[R_B2, 0:D_MODEL].set(p["b2"][0])
    vecs = vecs.at[R_BLRN, 0:D_EXPAND].set(p["bin"][0, :D_EXPAND])
    vecs = vecs.at[R_BLRN, 128:128 + D_EXPAND].set(p["bin"][0, D_EXPAND:])
    vecs = vecs.at[R_BOUT, 0:D_MODEL].set(p["bout"][0])
    vecs = vecs.at[R_DPAR, 0:D_EXPAND].set(p["d"][0])

    # --- attention constants: head masks, stacked additive mask, RoPE cos/sin ---
    r = jnp.arange(N_HEADS * BL)[:, None]
    lane = jnp.arange(D_MODEL)[None, :]
    hmq = (((lane % 16) // D_HALF) == (r // BL)).astype(f32)     # half-split q/k layout
    hmv = ((lane // D_K) == (r // BL)).astype(f32)               # original v layout
    row_b = jnp.arange(BL)[:, None] // L
    col_b = jnp.arange(BL)[None, :] // L
    causal = jnp.tile(mask, (B, B)) > 0.5
    abias = jnp.where((row_b == col_b) & causal, 0.0, -1e9).astype(f32)     # (BL, BL)
    rope_c = jnp.tile(jnp.tile(cos[:, :D_HALF], (1, N_HEADS)), (B, 1))      # (BL, 16)
    rope_s = jnp.tile(jnp.tile(sin[:, :D_HALF], (1, N_HEADS)), (B, 1))
    ac = jnp.zeros((N_HEADS * BL, AC_W), f32)
    ac = ac.at[:, AC_HMQ:AC_HMQ + D_MODEL].set(hmq)
    ac = ac.at[:, AC_HMV:AC_HMV + D_MODEL].set(hmv)
    ac = ac.at[:, AC_BIAS:AC_BIAS + BL].set(jnp.tile(abias, (N_HEADS, 1)))
    ac = ac.at[0:BL, AC_ROPE:AC_ROPE + 16].set(rope_c)
    ac = ac.at[BL:2 * BL, AC_ROPE:AC_ROPE + 16].set(rope_s)

    # --- SSM constants: A, 1/A_safe, depthwise B/C/delta tables, pre-tiled to (., B*D) ---
    S = D_STATE
    wdw_t, bdw_t = p["wdw"].T, p["bdw"].T                        # (K_SSM, D_EXPAND)
    A = -jnp.exp(p["alog_re"] + 1j * p["alog_im"])               # (D_EXPAND, S) complex64
    A_safe = jnp.where(jnp.abs(A) < 1e-6, 1e-6 + 0j, A)
    invA = 1.0 / A_safe
    blocks = [jnp.real(A).T, jnp.imag(A).T, jnp.real(invA).T, jnp.imag(invA).T,
              wdw_t[0:S], bdw_t[0:S], wdw_t[S:2 * S], bdw_t[S:2 * S],
              wdw_t[2 * S:3 * S], bdw_t[2 * S:3 * S], wdw_t[3 * S:4 * S], bdw_t[3 * S:4 * S]]
    ssm = jnp.zeros((SSM_R, BD), f32)
    for i, blkv in enumerate(blocks):
        ssm = ssm.at[i * S:(i + 1) * S, :].set(jnp.tile(blkv.astype(f32), (1, B)))
    ssm = ssm.at[S_WDLT, :].set(jnp.tile(wdw_t[4 * S], (B,)))
    ssm = ssm.at[S_BDLT, :].set(jnp.tile(bdw_t[4 * S], (B,)))

    return (w_in, p["w2"], vecs, ac, ssm)


def encoder_layer_pallas(x, packed):
    w_in, w2, vecs, ac, ssm = packed
    # Single fused call, no grid: whole layer runs in one step with everything resident in VMEM.
    out2d = pl.pallas_call(
        encoder_layer_kernel,
        out_shape=jax.ShapeDtypeStruct((BL, D_MODEL), jnp.float32),
    )(x.reshape(BL, D_MODEL), w_in, w2, vecs, ac, ssm)
    return out2d.reshape(B, L, D_MODEL)


# ----------------------------------- parameter setup -------------------------------------
def init_params(key):
    keys = iter(jax.random.split(key, 32))

    def uni(shape, fan_in, fan_out):
        a = math.sqrt(6.0 / (fan_in + fan_out))
        return jax.random.uniform(next(keys), shape, jnp.float32, -a, a)

    def nrm(shape, scale):
        return jax.random.normal(next(keys), shape, jnp.float32) * scale

    p = {}
    for i in (1, 2, 3):
        p[f"ln{i}_w"] = jnp.ones((1, D_MODEL), jnp.float32)
        p[f"ln{i}_b"] = jnp.zeros((1, D_MODEL), jnp.float32)

    # attention: xavier weights (stored (in, out)), normal(0, 0.2) biases (per _init_weights)
    for n in ("q", "k", "v", "o"):
        p[f"w{n}"] = uni((D_MODEL, D_MODEL), D_MODEL, D_MODEL)
        p[f"b{n}"] = nrm((1, D_MODEL), 0.2)

    # SwiGLU feed-forward: xavier weights, zero biases
    p["w1"] = uni((D_MODEL, D_FF), D_MODEL, D_FF); p["b1"] = jnp.zeros((1, D_FF), jnp.float32)
    p["w2"] = uni((D_FF, D_MODEL), D_FF, D_MODEL); p["b2"] = jnp.zeros((1, D_MODEL), jnp.float32)
    p["w3"] = uni((D_MODEL, D_FF), D_MODEL, D_FF); p["b3"] = jnp.zeros((1, D_FF), jnp.float32)

    # LRNN_StatefulFFN
    p["win"] = uni((D_MODEL, 2 * D_EXPAND), D_MODEL, 2 * D_EXPAND)
    p["bin"] = jnp.zeros((1, 2 * D_EXPAND), jnp.float32)
    p["wout"] = uni((D_EXPAND, D_MODEL), D_EXPAND, D_MODEL)
    p["bout"] = jnp.zeros((1, D_MODEL), jnp.float32)

    wdw = uni((D_EXPAND, K_SSM), 1, K_SSM)
    bdw = jnp.zeros((D_EXPAND, K_SSM), jnp.float32)
    delta_bias = math.log(math.exp(0.1) - 1.0)
    wdw = wdw.at[:, 4 * D_STATE].set(1e-6)          # delta column init as in the module
    bdw = bdw.at[:, 4 * D_STATE].set(delta_bias)
    p["wdw"], p["bdw"] = wdw, bdw

    p["alog_re"] = jnp.log(jax.random.uniform(next(keys), (D_EXPAND, D_STATE), jnp.float32) * 0.5 + 0.5)
    p["alog_im"] = (jax.random.uniform(next(keys), (D_EXPAND, D_STATE), jnp.float32) * 2.0 - 1.0) * math.pi
    p["d"] = nrm((1, D_EXPAND), 1.0)
    return p


def rotary_cos_sin(seq_len, dim, base=10000.0):
    inv_freq = 1.0 / (base ** (jnp.arange(0, dim, 2, dtype=jnp.float32) / dim))
    t = jnp.arange(seq_len, dtype=jnp.float32)
    freqs = jnp.outer(t, inv_freq)
    emb = jnp.concatenate([freqs, freqs], axis=-1)
    return jnp.cos(emb), jnp.sin(emb)                 # each (L, D_K)


# ------------------------------ pure-JAX reference (check) -------------------------------
def reference_forward(x, mask, p, cos, sin):
    def ln(h, w, b):
        mu = h.mean(-1, keepdims=True)
        var = ((h - mu) ** 2).mean(-1, keepdims=True)
        return (h - mu) / jnp.sqrt(var + LN_EPS) * w + b

    def silu(h):
        return h * jax.nn.sigmoid(h)

    # attention
    x2 = ln(x, p["ln1_w"], p["ln1_b"])

    def heads(z, w, b):
        z = z @ w + b
        return z.reshape(B, L, N_HEADS, D_K).transpose(0, 2, 1, 3)

    q, k, v = heads(x2, p["wq"], p["bq"]), heads(x2, p["wk"], p["bk"]), heads(x2, p["wv"], p["bv"])

    def rope(z):
        z1, z2 = z[..., : D_K // 2], z[..., D_K // 2:]
        rot = jnp.concatenate([-z2, z1], axis=-1)
        return z * cos[None, None] + rot * sin[None, None]

    q, k = rope(q), rope(k)
    scores = jnp.einsum("bhqd,bhkd->bhqk", q, k) / math.sqrt(D_K)
    scores = jnp.where(mask[None, None] == 0.0, -1e9, scores)
    ctx = jnp.einsum("bhqk,bhkd->bhqd", jax.nn.softmax(scores, axis=-1), v)
    ctx = ctx.transpose(0, 2, 1, 3).reshape(B, L, D_MODEL)
    x = x + ctx @ p["wo"] + p["bo"]

    # feed-forward
    x2 = ln(x, p["ln2_w"], p["ln2_b"])
    ff = (silu(x2 @ p["w1"] + p["b1"]) * (x2 @ p["w3"] + p["b3"])) @ p["w2"] + p["b2"]
    x = x + ff

    # LRNN (complex reference)
    x2 = ln(x, p["ln3_w"], p["ln3_b"])
    proj = x2 @ p["win"] + p["bin"]
    gate, u = silu(proj[..., :D_EXPAND]), proj[..., D_EXPAND:]
    params = u[..., None] * p["wdw"] + p["bdw"]
    S = D_STATE
    Bc = params[..., :S] + 1j * params[..., S:2 * S]
    Cc = params[..., 2 * S:3 * S] + 1j * params[..., 3 * S:4 * S]
    delta = jnp.clip(jax.nn.softplus(params[..., 4 * S:4 * S + 1]), 1e-4, 1.0)
    A = -jnp.exp(p["alog_re"] + 1j * p["alog_im"])
    z = delta.astype(jnp.complex64) * A
    A_bar = jnp.exp(z)
    A_safe = jnp.where(jnp.abs(A) < 1e-6, 1e-6 + 0j, A)
    B_bar = delta.astype(jnp.complex64) * (jnp.exp(z) - 1.0) / A_safe * Bc
    b = B_bar * u.astype(jnp.complex64)[..., None]
    h = jnp.zeros((B, D_EXPAND, D_STATE), jnp.complex64)
    ys = []
    for t in range(L):
        h = A_bar[:, t] * h + b[:, t]
        ys.append(jnp.real(jnp.sum(h * Cc[:, t], axis=-1)))
    y = jnp.stack(ys, axis=1) + u * p["d"]
    x = x + (y * gate) @ p["wout"] + p["bout"]
    return x


# --------------------------------------- main --------------------------------------------
if __name__ == "__main__":
    key = jax.random.PRNGKey(0)
    k_x, k_p = jax.random.split(key)
    x = jax.random.normal(k_x, (B, L, D_MODEL), jnp.float32)
    params = init_params(k_p)
    cos, sin = rotary_cos_sin(L, D_K)
    mask = jnp.tril(jnp.ones((L, L), jnp.float32))     # causal mask, 0 => masked out

    # one-time packing, hoisted out of the per-forward jit (the jitted fn is just the kernel)
    packed = jax.tree_util.tree_map(jax.block_until_ready, prepare_inputs(params, mask, cos, sin))

    fwd = jax.jit(encoder_layer_pallas)
    out = jax.block_until_ready(fwd(x, packed))

    ref = jax.block_until_ready(reference_forward(x, mask, params, cos, sin))
    assert out.shape == (B, L, D_MODEL) and out.dtype == jnp.float32
    # tolerance allows for the approx-reciprocal (EUP) softmax/SiLU paths
    assert jnp.allclose(out, ref, rtol=5e-3, atol=5e-3), (
        f"max abs err {float(jnp.max(jnp.abs(out - ref)))}")
    print("KERNEL_OK")
</pallas_src>

<mosaic_0001>
module attributes {stable_mosaic.version = 11 : i64} {
  func.func @encoder_layer_kernel(%arg0: memref<16x32xf32, #tpu.memory_space<vmem>>, %arg1: memref<32x896xf32, #tpu.memory_space<vmem>>, %arg2: memref<96x32xf32, #tpu.memory_space<vmem>>, %arg3: memref<16x224xf32, #tpu.memory_space<vmem>>, %arg4: memref<64x96xf32, #tpu.memory_space<vmem>>, %arg5: memref<112x64xf32, #tpu.memory_space<vmem>>, %arg6: memref<16x32xf32, #tpu.memory_space<vmem>>) attributes {dimension_semantics = [], scalar_prefetch = 0 : i64, scratch_operands = 0 : i64, tpu.core_type = #tpu.core_type<tc>} {
    %c0 = arith.constant 0 : index
    %c0_0 = arith.constant 0 : index
    %0 = vector.load %arg3[%c0, %c0_0] : memref<16x224xf32, #tpu.memory_space<vmem>>, vector<16x224xf32>
    %c0_1 = arith.constant 0 : index
    %c0_2 = arith.constant 0 : index
    %1 = vector.load %arg4[%c0_1, %c0_2] : memref<64x96xf32, #tpu.memory_space<vmem>>, vector<64x96xf32>
    %c0_3 = arith.constant 0 : index
    %c0_4 = arith.constant 0 : index
    %2 = vector.load %arg0[%c0_3, %c0_4] : memref<16x32xf32, #tpu.memory_space<vmem>>, vector<16x32xf32>
    %3 = vector.extract_strided_slice %0 {offsets = [0, 0], sizes = [1, 32], strides = [1, 1]} : vector<16x224xf32> to vector<1x32xf32>
    %4 = vector.extract_strided_slice %0 {offsets = [1, 0], sizes = [1, 32], strides = [1, 1]} : vector<16x224xf32> to vector<1x32xf32>
    %cst = arith.constant dense<0.000000e+00> : vector<16xf32>
    %5 = vector.multi_reduction <add>, %2, %cst [1] : vector<16x32xf32> to vector<16xf32>
    %6 = vector.shape_cast %5 : vector<16xf32> to vector<16x1xf32>
    %cst_5 = arith.constant 3.200000e+01 : f32
    %7 = vector.broadcast %cst_5 : f32 to vector<16x1xf32>
    %8 = arith.divf %6, %7 : vector<16x1xf32>
    %9 = vector.broadcast %8 : vector<16x1xf32> to vector<16x32xf32>
    %10 = arith.subf %2, %9 : vector<16x32xf32>
    %11 = arith.mulf %10, %10 : vector<16x32xf32>
    %cst_6 = arith.constant dense<0.000000e+00> : vector<16xf32>
    %12 = vector.multi_reduction <add>, %11, %cst_6 [1] : vector<16x32xf32> to vector<16xf32>
    %13 = vector.shape_cast %12 : vector<16xf32> to vector<16x1xf32>
    %cst_7 = arith.constant 3.200000e+01 : f32
    %14 = vector.broadcast %cst_7 : f32 to vector<16x1xf32>
    %15 = arith.divf %13, %14 : vector<16x1xf32>
    %16 = vector.broadcast %8 : vector<16x1xf32> to vector<16x32xf32>
    %17 = arith.subf %2, %16 : vector<16x32xf32>
    %cst_8 = arith.constant 9.99999974E-6 : f32
    %18 = vector.broadcast %cst_8 : f32 to vector<16x1xf32>
    %19 = arith.addf %15, %18 : vector<16x1xf32>
    %20 = math.rsqrt %19 : vector<16x1xf32>
    %21 = vector.broadcast %20 : vector<16x1xf32> to vector<16x32xf32>
    %22 = arith.mulf %17, %21 : vector<16x32xf32>
    %23 = vector.broadcast %3 : vector<1x32xf32> to vector<16x32xf32>
    %24 = arith.mulf %22, %23 : vector<16x32xf32>
    %25 = vector.broadcast %4 : vector<1x32xf32> to vector<16x32xf32>
    %26 = arith.addf %24, %25 : vector<16x32xf32>
    %c0_9 = arith.constant 0 : index
    %c0_10 = arith.constant 0 : index
    %27 = vector.load %arg1[%c0_9, %c0_10] : memref<32x896xf32, #tpu.memory_space<vmem>>, vector<32x96xf32>
    %cst_11 = arith.constant dense<0.000000e+00> : vector<16x96xf32>
    %28 = tpu.matmul %26, %27, %cst_11 {dimension_numbers = #tpu.dot_dimension_numbers<[1], [0], [0], [1], [0, 0, 1, 1], [], []>} : vector<16x32xf32>, vector<32x96xf32>, vector<16x96xf32> -> vector<16x96xf32>
    %29 = vector.extract_strided_slice %0 {offsets = [6, 0], sizes = [1, 96], strides = [1, 1]} : vector<16x224xf32> to vector<1x96xf32>
    %30 = vector.broadcast %29 : vector<1x96xf32> to vector<16x96xf32>
    %31 = arith.addf %28, %30 : vector<16x96xf32>
    %32 = vector.extract_strided_slice %31 {offsets = [0, 0], sizes = [16, 16], strides = [1, 1]} : vector<16x96xf32> to vector<16x16xf32>
    %33 = vector.extract_strided_slice %31 {offsets = [0, 16], sizes = [16, 16], strides = [1, 1]} : vector<16x96xf32> to vector<16x16xf32>
    %34 = vector.extract_strided_slice %31 {offsets = [0, 32], sizes = [16, 16], strides = [1, 1]} : vector<16x96xf32> to vector<16x16xf32>
    %35 = vector.extract_strided_slice %31 {offsets = [0, 48], sizes = [16, 16], strides = [1, 1]} : vector<16x96xf32> to vector<16x16xf32>
    %36 = vector.extract_strided_slice %31 {offsets = [0, 64], sizes = [16, 32], strides = [1, 1]} : vector<16x96xf32> to vector<16x32xf32>
    %37 = vector.extract_strided_slice %1 {offsets = [0, 80], sizes = [16, 16], strides = [1, 1]} : vector<64x96xf32> to vector<16x16xf32>
    %38 = vector.extract_strided_slice %1 {offsets = [16, 80], sizes = [16, 16], strides = [1, 1]} : vector<64x96xf32> to vector<16x16xf32>
    %39 = arith.mulf %32, %37 : vector<16x16xf32>
    %40 = arith.mulf %33, %38 : vector<16x16xf32>
    %41 = arith.subf %39, %40 : vector<16x16xf32>
    %42 = arith.mulf %33, %37 : vector<16x16xf32>
    %43 = arith.mulf %32, %38 : vector<16x16xf32>
    %44 = arith.addf %42, %43 : vector<16x16xf32>
    %45 = tpu.concatenate %41, %44 in 1 : vector<16x16xf32>, vector<16x16xf32> -> vector<16x32xf32>
    %46 = arith.mulf %34, %37 : vector<16x16xf32>
    %47 = arith.mulf %35, %38 : vector<16x16xf32>
    %48 = arith.subf %46, %47 : vector<16x16xf32>
    %49 = arith.mulf %35, %37 : vector<16x16xf32>
    %50 = arith.mulf %34, %38 : vector<16x16xf32>
    %51 = arith.addf %49, %50 : vector<16x16xf32>
    %52 = tpu.concatenate %48, %51 in 1 : vector<16x16xf32>, vector<16x16xf32> -> vector<16x32xf32>
    %53 = vector.extract_strided_slice %1 {offsets = [0, 0], sizes = [64, 32], strides = [1, 1]} : vector<64x96xf32> to vector<64x32xf32>
    %54 = vector.extract_strided_slice %1 {offsets = [0, 32], sizes = [64, 32], strides = [1, 1]} : vector<64x96xf32> to vector<64x32xf32>
    %55 = vector.extract_strided_slice %1 {offsets = [0, 64], sizes = [64, 16], strides = [1, 1]} : vector<64x96xf32> to vector<64x16xf32>
    %56 = tpu.concatenate %45, %45, %45, %45 in 0 : vector<16x32xf32>, vector<16x32xf32>, vector<16x32xf32>, vector<16x32xf32> -> vector<64x32xf32>
    %57 = arith.mulf %56, %53 : vector<64x32xf32>
    %cst_12 = arith.constant dense<0.000000e+00> : vector<64x16xf32>
    %58 = tpu.matmul %57, %52, %cst_12 {dimension_numbers = #tpu.dot_dimension_numbers<[1], [1], [0], [0], [0, 0, 1, 0], [], []>} : vector<64x32xf32>, vector<16x32xf32>, vector<64x16xf32> -> vector<64x16xf32>
    %59 = arith.addf %58, %55 : vector<64x16xf32>
    %cst_13 = arith.constant dense<0xFF800000> : vector<64xf32>
    %60 = vector.multi_reduction <maximumf>, %59, %cst_13 [1] : vector<64x16xf32> to vector<64xf32>
    %61 = vector.shape_cast %60 : vector<64xf32> to vector<64x1xf32>
    %62 = vector.broadcast %61 : vector<64x1xf32> to vector<64x16xf32>
    %63 = arith.subf %59, %62 : vector<64x16xf32>
    %64 = math.exp %63 : vector<64x16xf32>
    %cst_14 = arith.constant dense<0.000000e+00> : vector<64xf32>
    %65 = vector.multi_reduction <add>, %64, %cst_14 [1] : vector<64x16xf32> to vector<64xf32>
    %66 = vector.shape_cast %65 : vector<64xf32> to vector<64x1xf32>
    %67 = tpu.reciprocal %66 {approx = true} : vector<64x1xf32> -> vector<64x1xf32>
    %68 = vector.broadcast %67 : vector<64x1xf32> to vector<64x16xf32>
    %69 = arith.mulf %64, %68 : vector<64x16xf32>
    %cst_15 = arith.constant dense<0.000000e+00> : vector<64x32xf32>
    %70 = tpu.matmul %69, %36, %cst_15 {dimension_numbers = #tpu.dot_dimension_numbers<[1], [0], [0], [1], [0, 0, 1, 1], [], []>} : vector<64x16xf32>, vector<16x32xf32>, vector<64x32xf32> -> vector<64x32xf32>
    %71 = arith.mulf %70, %54 : vector<64x32xf32>
    %72 = vector.extract_strided_slice %71 {offsets = [0, 0], sizes = [16, 32], strides = [1, 1]} : vector<64x32xf32> to vector<16x32xf32>
    %73 = vector.extract_strided_slice %71 {offsets = [16, 0], sizes = [16, 32], strides = [1, 1]} : vector<64x32xf32> to vector<16x32xf32>
    %74 = arith.addf %72, %73 : vector<16x32xf32>
    %75 = vector.extract_strided_slice %71 {offsets = [32, 0], sizes = [16, 32], strides = [1, 1]} : vector<64x32xf32> to vector<16x32xf32>
    %76 = arith.addf %74, %75 : vector<16x32xf32>
    %77 = vector.extract_strided_slice %71 {offsets = [48, 0], sizes = [16, 32], strides = [1, 1]} : vector<64x32xf32> to vector<16x32xf32>
    %78 = arith.addf %76, %77 : vector<16x32xf32>
    %c0_16 = arith.constant 0 : index
    %c640 = arith.constant 640 : index
    %79 = vector.load %arg1[%c0_16, %c640] : memref<32x896xf32, #tpu.memory_space<vmem>>, vector<32x32xf32>
    %cst_17 = arith.constant dense<0.000000e+00> : vector<16x32xf32>
    %80 = tpu.matmul %78, %79, %cst_17 {dimension_numbers = #tpu.dot_dimension_numbers<[1], [0], [0], [1], [0, 0, 1, 1], [], []>} : vector<16x32xf32>, vector<32x32xf32>, vector<16x32xf32> -> vector<16x32xf32>
    %81 = vector.extract_strided_slice %0 {offsets = [7, 0], sizes = [1, 32], strides = [1, 1]} : vector<16x224xf32> to vector<1x32xf32>
    %82 = vector.broadcast %81 : vector<1x32xf32> to vector<16x32xf32>
    %83 = arith.addf %80, %82 : vector<16x32xf32>
    %84 = arith.addf %2, %83 : vector<16x32xf32>
    %85 = vector.extract_strided_slice %0 {offsets = [2, 0], sizes = [1, 32], strides = [1, 1]} : vector<16x224xf32> to vector<1x32xf32>
    %86 = vector.extract_strided_slice %0 {offsets = [3, 0], sizes = [1, 32], strides = [1, 1]} : vector<16x224xf32> to vector<1x32xf32>
    %cst_18 = arith.constant dense<0.000000e+00> : vector<16xf32>
    %87 = vector.multi_reduction <add>, %84, %cst_18 [1] : vector<16x32xf32> to vector<16xf32>
    %88 = vector.shape_cast %87 : vector<16xf32> to vector<16x1xf32>
    %cst_19 = arith.constant 3.200000e+01 : f32
    %89 = vector.broadcast %cst_19 : f32 to vector<16x1xf32>
    %90 = arith.divf %88, %89 : vector<16x1xf32>
    %91 = vector.broadcast %90 : vector<16x1xf32> to vector<16x32xf32>
    %92 = arith.subf %84, %91 : vector<16x32xf32>
    %93 = arith.mulf %92, %92 : vector<16x32xf32>
    %cst_20 = arith.constant dense<0.000000e+00> : vector<16xf32>
    %94 = vector.multi_reduction <add>, %93, %cst_20 [1] : vector<16x32xf32> to vector<16xf32>
    %95 = vector.shape_cast %94 : vector<16xf32> to vector<16x1xf32>
    %cst_21 = arith.constant 3.200000e+01 : f32
    %96 = vector.broadcast %cst_21 : f32 to vector<16x1xf32>
    %97 = arith.divf %95, %96 : vector<16x1xf32>
    %98 = vector.broadcast %90 : vector<16x1xf32> to vector<16x32xf32>
    %99 = arith.subf %84, %98 : vector<16x32xf32>
    %cst_22 = arith.constant 9.99999974E-6 : f32
    %100 = vector.broadcast %cst_22 : f32 to vector<16x1xf32>
    %101 = arith.addf %97, %100 : vector<16x1xf32>
    %102 = math.rsqrt %101 : vector<16x1xf32>
    %103 = vector.broadcast %102 : vector<16x1xf32> to vector<16x32xf32>
    %104 = arith.mulf %99, %103 : vector<16x32xf32>
    %105 = vector.broadcast %85 : vector<1x32xf32> to vector<16x32xf32>
    %106 = arith.mulf %104, %105 : vector<16x32xf32>
    %107 = vector.broadcast %86 : vector<1x32xf32> to vector<16x32xf32>
    %108 = arith.addf %106, %107 : vector<16x32xf32>
    %c0_23 = arith.constant 0 : index
    %c128 = arith.constant 128 : index
    %109 = vector.load %arg1[%c0_23, %c128] : memref<32x896xf32, #tpu.memory_space<vmem>>, vector<32x224xf32>
    %cst_24 = arith.constant dense<0.000000e+00> : vector<16x224xf32>
    %110 = tpu.matmul %108, %109, %cst_24 {dimension_numbers = #tpu.dot_dimension_numbers<[1], [0], [0], [1], [0, 0, 1, 1], [], []>} : vector<16x32xf32>, vector<32x224xf32>, vector<16x224xf32> -> vector<16x224xf32>
    %111 = vector.extract_strided_slice %0 {offsets = [8, 0], sizes = [1, 224], strides = [1, 1]} : vector<16x224xf32> to vector<1x224xf32>
    %112 = vector.broadcast %111 : vector<1x224xf32> to vector<16x224xf32>
    %113 = arith.addf %110, %112 : vector<16x224xf32>
    %114 = vector.extract_strided_slice %113 {offsets = [0, 0], sizes = [16, 96], strides = [1, 1]} : vector<16x224xf32> to vector<16x96xf32>
    %cst_25 = arith.constant 0.000000e+00 : f32
    %115 = vector.broadcast %cst_25 : f32 to vector<16x96xf32>
    %116 = arith.subf %115, %114 : vector<16x96xf32>
    %117 = math.exp %116 : vector<16x96xf32>
    %cst_26 = arith.constant 1.000000e+00 : f32
    %118 = vector.broadcast %cst_26 : f32 to vector<16x96xf32>
    %119 = arith.addf %118, %117 : vector<16x96xf32>
    %120 = tpu.reciprocal %119 {approx = true} : vector<16x96xf32> -> vector<16x96xf32>
    %121 = arith.mulf %114, %120 : vector<16x96xf32>
    %122 = vector.extract_strided_slice %113 {offsets = [0, 128], sizes = [16, 96], strides = [1, 1]} : vector<16x224xf32> to vector<16x96xf32>
    %123 = arith.mulf %121, %122 : vector<16x96xf32>
    %c0_27 = arith.constant 0 : index
    %c0_28 = arith.constant 0 : index
    %124 = vector.load %arg2[%c0_27, %c0_28] : memref<96x32xf32, #tpu.memory_space<vmem>>, vector<96x32xf32>
    %cst_29 = arith.constant dense<0.000000e+00> : vector<16x32xf32>
    %125 = tpu.matmul %123, %124, %cst_29 {dimension_numbers = #tpu.dot_dimension_numbers<[1], [0], [0], [1], [0, 0, 1, 1], [], []>} : vector<16x96xf32>, vector<96x32xf32>, vector<16x32xf32> -> vector<16x32xf32>
    %126 = arith.addf %84, %125 : vector<16x32xf32>
    %127 = vector.extract_strided_slice %0 {offsets = [9, 0], sizes = [1, 32], strides = [1, 1]} : vector<16x224xf32> to vector<1x32xf32>
    %128 = vector.broadcast %127 : vector<1x32xf32> to vector<16x32xf32>
    %129 = arith.addf %126, %128 : vector<16x32xf32>
    %130 = vector.extract_strided_slice %0 {offsets = [4, 0], sizes = [1, 32], strides = [1, 1]} : vector<16x224xf32> to vector<1x32xf32>
    %131 = vector.extract_strided_slice %0 {offsets = [5, 0], sizes = [1, 32], strides = [1, 1]} : vector<16x224xf32> to vector<1x32xf32>
    %cst_30 = arith.constant dense<0.000000e+00> : vector<16xf32>
    %132 = vector.multi_reduction <add>, %129, %cst_30 [1] : vector<16x32xf32> to vector<16xf32>
    %133 = vector.shape_cast %132 : vector<16xf32> to vector<16x1xf32>
    %cst_31 = arith.constant 3.200000e+01 : f32
    %134 = vector.broadcast %cst_31 : f32 to vector<16x1xf32>
    %135 = arith.divf %133, %134 : vector<16x1xf32>
    %136 = vector.broadcast %135 : vector<16x1xf32> to vector<16x32xf32>
    %137 = arith.subf %129, %136 : vector<16x32xf32>
    %138 = arith.mulf %137, %137 : vector<16x32xf32>
    %cst_32 = arith.constant dense<0.000000e+00> : vector<16xf32>
    %139 = vector.multi_reduction <add>, %138, %cst_32 [1] : vector<16x32xf32> to vector<16xf32>
    %140 = vector.shape_cast %139 : vector<16xf32> to vector<16x1xf32>
    %cst_33 = arith.constant 3.200000e+01 : f32
    %141 = vector.broadcast %cst_33 : f32 to vector<16x1xf32>
    %142 = arith.divf %140, %141 : vector<16x1xf32>
    %143 = vector.broadcast %135 : vector<16x1xf32> to vector<16x32xf32>
    %144 = arith.subf %129, %143 : vector<16x32xf32>
    %cst_34 = arith.constant 9.99999974E-6 : f32
    %145 = vector.broadcast %cst_34 : f32 to vector<16x1xf32>
    %146 = arith.addf %142, %145 : vector<16x1xf32>
    %147 = math.rsqrt %146 : vector<16x1xf32>
    %148 = vector.broadcast %147 : vector<16x1xf32> to vector<16x32xf32>
    %149 = arith.mulf %144, %148 : vector<16x32xf32>
    %150 = vector.broadcast %130 : vector<1x32xf32> to vector<16x32xf32>
    %151 = arith.mulf %149, %150 : vector<16x32xf32>
    %152 = vector.broadcast %131 : vector<1x32xf32> to vector<16x32xf32>
    %153 = arith.addf %151, %152 : vector<16x32xf32>
    %c0_35 = arith.constant 0 : index
    %c384 = arith.constant 384 : index
    %154 = vector.load %arg1[%c0_35, %c384] : memref<32x896xf32, #tpu.memory_space<vmem>>, vector<32x160xf32>
    %cst_36 = arith.constant dense<0.000000e+00> : vector<16x160xf32>
    %155 = tpu.matmul %153, %154, %cst_36 {dimension_numbers = #tpu.dot_dimension_numbers<[1], [0], [0], [1], [0, 0, 1, 1], [], []>} : vector<16x32xf32>, vector<32x160xf32>, vector<16x160xf32> -> vector<16x160xf32>
    %156 = vector.extract_strided_slice %0 {offsets = [10, 0], sizes = [1, 160], strides = [1, 1]} : vector<16x224xf32> to vector<1x160xf32>
    %157 = vector.broadcast %156 : vector<1x160xf32> to vector<16x160xf32>
    %158 = arith.addf %155, %157 : vector<16x160xf32>
    %159 = vector.extract_strided_slice %158 {offsets = [0, 0], sizes = [16, 32], strides = [1, 1]} : vector<16x160xf32> to vector<16x32xf32>
    %cst_37 = arith.constant 0.000000e+00 : f32
    %160 = vector.broadcast %cst_37 : f32 to vector<16x32xf32>
    %161 = arith.subf %160, %159 : vector<16x32xf32>
    %162 = math.exp %161 : vector<16x32xf32>
    %cst_38 = arith.constant 1.000000e+00 : f32
    %163 = vector.broadcast %cst_38 : f32 to vector<16x32xf32>
    %164 = arith.addf %163, %162 : vector<16x32xf32>
    %165 = tpu.reciprocal %164 {approx = true} : vector<16x32xf32> -> vector<16x32xf32>
    %166 = arith.mulf %159, %165 : vector<16x32xf32>
    %167 = vector.extract_strided_slice %158 {offsets = [0, 128], sizes = [16, 32], strides = [1, 1]} : vector<16x160xf32> to vector<16x32xf32>
    %168 = vector.extract_strided_slice %167 {offsets = [0, 0], sizes = [8, 32], strides = [1, 1]} : vector<16x32xf32> to vector<8x32xf32>
    %169 = vector.extract_strided_slice %167 {offsets = [8, 0], sizes = [8, 32], strides = [1, 1]} : vector<16x32xf32> to vector<8x32xf32>
    %170 = tpu.concatenate %168, %169 in 1 : vector<8x32xf32>, vector<8x32xf32> -> vector<8x64xf32>
    %c96 = arith.constant 96 : index
    %c0_39 = arith.constant 0 : index
    %171 = vector.load %arg5[%c96, %c0_39] : memref<112x64xf32, #tpu.memory_space<vmem>>, vector<1x64xf32>
    %172 = vector.broadcast %171 : vector<1x64xf32> to vector<8x64xf32>
    %173 = arith.mulf %170, %172 : vector<8x64xf32>
    %c104 = arith.constant 104 : index
    %c0_40 = arith.constant 0 : index
    %174 = vector.load %arg5[%c104, %c0_40] : memref<112x64xf32, #tpu.memory_space<vmem>>, vector<1x64xf32>
    %175 = vector.broadcast %174 : vector<1x64xf32> to vector<8x64xf32>
    %176 = arith.addf %173, %175 : vector<8x64xf32>
    %cst_41 = arith.constant 0.000000e+00 : f32
    %177 = vector.broadcast %cst_41 : f32 to vector<8x64xf32>
    %178 = arith.maximumf %176, %177 : vector<8x64xf32>
    %179 = math.absf %176 : vector<8x64xf32>
    %cst_42 = arith.constant 0.000000e+00 : f32
    %180 = vector.broadcast %cst_42 : f32 to vector<8x64xf32>
    %181 = arith.subf %180, %179 : vector<8x64xf32>
    %182 = math.exp %181 : vector<8x64xf32>
    %cst_43 = arith.constant 1.000000e+00 : f32
    %183 = vector.broadcast %cst_43 : f32 to vector<8x64xf32>
    %184 = arith.addf %183, %182 : vector<8x64xf32>
    %185 = math.log %184 : vector<8x64xf32>
    %186 = arith.addf %178, %185 : vector<8x64xf32>
    %cst_44 = arith.constant 9.99999974E-5 : f32
    %cst_45 = arith.constant 1.000000e+00 : f32
    %187 = vector.broadcast %cst_44 : f32 to vector<8x64xf32>
    %188 = arith.maximumf %187, %186 : vector<8x64xf32>
    %189 = vector.broadcast %cst_45 : f32 to vector<8x64xf32>
    %190 = arith.minimumf %189, %188 : vector<8x64xf32>
    %191 = vector.shape_cast %190 : vector<8x64xf32> to vector<8x1x64xf32>
    %192 = vector.shape_cast %170 : vector<8x64xf32> to vector<8x1x64xf32>
    %c0_46 = arith.constant 0 : index
    %c0_47 = arith.constant 0 : index
    %193 = vector.load %arg5[%c0_46, %c0_47] : memref<112x64xf32, #tpu.memory_space<vmem>>, vector<8x64xf32>
    %194 = vector.shape_cast %193 : vector<8x64xf32> to vector<1x8x64xf32>
    %195 = vector.broadcast %191 : vector<8x1x64xf32> to vector<8x8x64xf32>
    %196 = vector.broadcast %194 : vector<1x8x64xf32> to vector<8x8x64xf32>
    %197 = arith.mulf %195, %196 : vector<8x8x64xf32>
    %c8 = arith.constant 8 : index
    %c0_48 = arith.constant 0 : index
    %198 = vector.load %arg5[%c8, %c0_48] : memref<112x64xf32, #tpu.memory_space<vmem>>, vector<8x64xf32>
    %199 = vector.shape_cast %198 : vector<8x64xf32> to vector<1x8x64xf32>
    %200 = vector.broadcast %191 : vector<8x1x64xf32> to vector<8x8x64xf32>
    %201 = vector.broadcast %199 : vector<1x8x64xf32> to vector<8x8x64xf32>
    %202 = arith.mulf %200, %201 : vector<8x8x64xf32>
    %203 = math.exp %197 : vector<8x8x64xf32>
    %204 = math.cos %202 : vector<8x8x64xf32>
    %205 = arith.mulf %203, %204 : vector<8x8x64xf32>
    %206 = math.sin %202 : vector<8x8x64xf32>
    %207 = arith.mulf %203, %206 : vector<8x8x64xf32>
    %cst_49 = arith.constant 1.000000e+00 : f32
    %208 = vector.broadcast %cst_49 : f32 to vector<8x8x64xf32>
    %209 = arith.subf %205, %208 : vector<8x8x64xf32>
    %210 = vector.broadcast %191 : vector<8x1x64xf32> to vector<8x8x64xf32>
    %211 = arith.mulf %210, %209 : vector<8x8x64xf32>
    %212 = vector.broadcast %191 : vector<8x1x64xf32> to vector<8x8x64xf32>
    %213 = arith.mulf %212, %207 : vector<8x8x64xf32>
    %c16 = arith.constant 16 : index
    %c0_50 = arith.constant 0 : index
    %214 = vector.load %arg5[%c16, %c0_50] : memref<112x64xf32, #tpu.memory_space<vmem>>, vector<8x64xf32>
    %215 = vector.shape_cast %214 : vector<8x64xf32> to vector<1x8x64xf32>
    %c24 = arith.constant 24 : index
    %c0_51 = arith.constant 0 : index
    %216 = vector.load %arg5[%c24, %c0_51] : memref<112x64xf32, #tpu.memory_space<vmem>>, vector<8x64xf32>
    %217 = vector.shape_cast %216 : vector<8x64xf32> to vector<1x8x64xf32>
    %218 = vector.broadcast %215 : vector<1x8x64xf32> to vector<8x8x64xf32>
    %219 = arith.mulf %211, %218 : vector<8x8x64xf32>
    %220 = vector.broadcast %217 : vector<1x8x64xf32> to vector<8x8x64xf32>
    %221 = arith.mulf %213, %220 : vector<8x8x64xf32>
    %222 = arith.subf %219, %221 : vector<8x8x64xf32>
    %223 = vector.broadcast %217 : vector<1x8x64xf32> to vector<8x8x64xf32>
    %224 = arith.mulf %211, %223 : vector<8x8x64xf32>
    %225 = vector.broadcast %215 : vector<1x8x64xf32> to vector<8x8x64xf32>
    %226 = arith.mulf %213, %225 : vector<8x8x64xf32>
    %227 = arith.addf %224, %226 : vector<8x8x64xf32>
    %c32 = arith.constant 32 : index
    %c0_52 = arith.constant 0 : index
    %228 = vector.load %arg5[%c32, %c0_52] : memref<112x64xf32, #tpu.memory_space<vmem>>, vector<8x64xf32>
    %229 = vector.shape_cast %228 : vector<8x64xf32> to vector<1x8x64xf32>
    %230 = vector.broadcast %192 : vector<8x1x64xf32> to vector<8x8x64xf32>
    %231 = vector.broadcast %229 : vector<1x8x64xf32> to vector<8x8x64xf32>
    %232 = arith.mulf %230, %231 : vector<8x8x64xf32>
    %c40 = arith.constant 40 : index
    %c0_53 = arith.constant 0 : index
    %233 = vector.load %arg5[%c40, %c0_53] : memref<112x64xf32, #tpu.memory_space<vmem>>, vector<8x64xf32>
    %234 = vector.shape_cast %233 : vector<8x64xf32> to vector<1x8x64xf32>
    %235 = vector.broadcast %234 : vector<1x8x64xf32> to vector<8x8x64xf32>
    %236 = arith.addf %232, %235 : vector<8x8x64xf32>
    %c48 = arith.constant 48 : index
    %c0_54 = arith.constant 0 : index
    %237 = vector.load %arg5[%c48, %c0_54] : memref<112x64xf32, #tpu.memory_space<vmem>>, vector<8x64xf32>
    %238 = vector.shape_cast %237 : vector<8x64xf32> to vector<1x8x64xf32>
    %239 = vector.broadcast %192 : vector<8x1x64xf32> to vector<8x8x64xf32>
    %240 = vector.broadcast %238 : vector<1x8x64xf32> to vector<8x8x64xf32>
    %241 = arith.mulf %239, %240 : vector<8x8x64xf32>
    %c56 = arith.constant 56 : index
    %c0_55 = arith.constant 0 : index
    %242 = vector.load %arg5[%c56, %c0_55] : memref<112x64xf32, #tpu.memory_space<vmem>>, vector<8x64xf32>
    %243 = vector.shape_cast %242 : vector<8x64xf32> to vector<1x8x64xf32>
    %244 = vector.broadcast %243 : vector<1x8x64xf32> to vector<8x8x64xf32>
    %245 = arith.addf %241, %244 : vector<8x8x64xf32>
    %c64 = arith.constant 64 : index
    %c0_56 = arith.constant 0 : index
    %246 = vector.load %arg5[%c64, %c0_56] : memref<112x64xf32, #tpu.memory_space<vmem>>, vector<8x64xf32>
    %247 = vector.shape_cast %246 : vector<8x64xf32> to vector<1x8x64xf32>
    %248 = vector.broadcast %192 : vector<8x1x64xf32> to vector<8x8x64xf32>
    %249 = vector.broadcast %247 : vector<1x8x64xf32> to vector<8x8x64xf32>
    %250 = arith.mulf %248, %249 : vector<8x8x64xf32>
    %c72 = arith.constant 72 : index
    %c0_57 = arith.constant 0 : index
    %251 = vector.load %arg5[%c72, %c0_57] : memref<112x64xf32, #tpu.memory_space<vmem>>, vector<8x64xf32>
    %252 = vector.shape_cast %251 : vector<8x64xf32> to vector<1x8x64xf32>
    %253 = vector.broadcast %252 : vector<1x8x64xf32> to vector<8x8x64xf32>
    %254 = arith.addf %250, %253 : vector<8x8x64xf32>
    %c80 = arith.constant 80 : index
    %c0_58 = arith.constant 0 : index
    %255 = vector.load %arg5[%c80, %c0_58] : memref<112x64xf32, #tpu.memory_space<vmem>>, vector<8x64xf32>
    %256 = vector.shape_cast %255 : vector<8x64xf32> to vector<1x8x64xf32>
    %257 = vector.broadcast %192 : vector<8x1x64xf32> to vector<8x8x64xf32>
    %258 = vector.broadcast %256 : vector<1x8x64xf32> to vector<8x8x64xf32>
    %259 = arith.mulf %257, %258 : vector<8x8x64xf32>
    %c88 = arith.constant 88 : index
    %c0_59 = arith.constant 0 : index
    %260 = vector.load %arg5[%c88, %c0_59] : memref<112x64xf32, #tpu.memory_space<vmem>>, vector<8x64xf32>
    %261 = vector.shape_cast %260 : vector<8x64xf32> to vector<1x8x64xf32>
    %262 = vector.broadcast %261 : vector<1x8x64xf32> to vector<8x8x64xf32>
    %263 = arith.addf %259, %262 : vector<8x8x64xf32>
    %264 = arith.mulf %222, %236 : vector<8x8x64xf32>
    %265 = arith.mulf %227, %245 : vector<8x8x64xf32>
    %266 = arith.subf %264, %265 : vector<8x8x64xf32>
    %267 = vector.broadcast %192 : vector<8x1x64xf32> to vector<8x8x64xf32>
    %268 = arith.mulf %266, %267 : vector<8x8x64xf32>
    %269 = arith.mulf %222, %245 : vector<8x8x64xf32>
    %270 = arith.mulf %227, %236 : vector<8x8x64xf32>
    %271 = arith.addf %269, %270 : vector<8x8x64xf32>
    %272 = vector.broadcast %192 : vector<8x1x64xf32> to vector<8x8x64xf32>
    %273 = arith.mulf %271, %272 : vector<8x8x64xf32>
    %cst_60 = arith.constant 0.000000e+00 : f32
    %274 = vector.broadcast %cst_60 : f32 to vector<8x64xf32>
    %cst_61 = arith.constant 0.000000e+00 : f32
    %275 = vector.broadcast %cst_61 : f32 to vector<8x64xf32>
    %276 = vector.extract_strided_slice %205 {offsets = [0, 0, 0], sizes = [1, 8, 64], strides = [1, 1, 1]} : vector<8x8x64xf32> to vector<1x8x64xf32>
    %277 = vector.shape_cast %276 : vector<1x8x64xf32> to vector<8x64xf32>
    %278 = vector.extract_strided_slice %207 {offsets = [0, 0, 0], sizes = [1, 8, 64], strides = [1, 1, 1]} : vector<8x8x64xf32> to vector<1x8x64xf32>
    %279 = vector.shape_cast %278 : vector<1x8x64xf32> to vector<8x64xf32>
    %280 = arith.mulf %277, %274 : vector<8x64xf32>
    %281 = arith.mulf %279, %275 : vector<8x64xf32>
    %282 = arith.subf %280, %281 : vector<8x64xf32>
    %283 = vector.extract_strided_slice %268 {offsets = [0, 0, 0], sizes = [1, 8, 64], strides = [1, 1, 1]} : vector<8x8x64xf32> to vector<1x8x64xf32>
    %284 = vector.shape_cast %283 : vector<1x8x64xf32> to vector<8x64xf32>
    %285 = arith.addf %282, %284 : vector<8x64xf32>
    %286 = arith.mulf %277, %275 : vector<8x64xf32>
    %287 = arith.mulf %279, %274 : vector<8x64xf32>
    %288 = arith.addf %286, %287 : vector<8x64xf32>
    %289 = vector.extract_strided_slice %273 {offsets = [0, 0, 0], sizes = [1, 8, 64], strides = [1, 1, 1]} : vector<8x8x64xf32> to vector<1x8x64xf32>
    %290 = vector.shape_cast %289 : vector<1x8x64xf32> to vector<8x64xf32>
    %291 = arith.addf %288, %290 : vector<8x64xf32>
    %292 = vector.extract_strided_slice %254 {offsets = [0, 0, 0], sizes = [1, 8, 64], strides = [1, 1, 1]} : vector<8x8x64xf32> to vector<1x8x64xf32>
    %293 = vector.shape_cast %292 : vector<1x8x64xf32> to vector<8x64xf32>
    %294 = arith.mulf %285, %293 : vector<8x64xf32>
    %295 = vector.extract_strided_slice %263 {offsets = [0, 0, 0], sizes = [1, 8, 64], strides = [1, 1, 1]} : vector<8x8x64xf32> to vector<1x8x64xf32>
    %296 = vector.shape_cast %295 : vector<1x8x64xf32> to vector<8x64xf32>
    %297 = arith.mulf %291, %296 : vector<8x64xf32>
    %298 = arith.subf %294, %297 : vector<8x64xf32>
    %cst_62 = arith.constant dense<0.000000e+00> : vector<64xf32>
    %299 = vector.multi_reduction <add>, %298, %cst_62 [0] : vector<8x64xf32> to vector<64xf32>
    %300 = vector.shape_cast %299 : vector<64xf32> to vector<1x64xf32>
    %301 = vector.extract_strided_slice %205 {offsets = [1, 0, 0], sizes = [1, 8, 64], strides = [1, 1, 1]} : vector<8x8x64xf32> to vector<1x8x64xf32>
    %302 = vector.shape_cast %301 : vector<1x8x64xf32> to vector<8x64xf32>
    %303 = vector.extract_strided_slice %207 {offsets = [1, 0, 0], sizes = [1, 8, 64], strides = [1, 1, 1]} : vector<8x8x64xf32> to vector<1x8x64xf32>
    %304 = vector.shape_cast %303 : vector<1x8x64xf32> to vector<8x64xf32>
    %305 = arith.mulf %302, %285 : vector<8x64xf32>
    %306 = arith.mulf %304, %291 : vector<8x64xf32>
    %307 = arith.subf %305, %306 : vector<8x64xf32>
    %308 = vector.extract_strided_slice %268 {offsets = [1, 0, 0], sizes = [1, 8, 64], strides = [1, 1, 1]} : vector<8x8x64xf32> to vector<1x8x64xf32>
    %309 = vector.shape_cast %308 : vector<1x8x64xf32> to vector<8x64xf32>
    %310 = arith.addf %307, %309 : vector<8x64xf32>
    %311 = arith.mulf %302, %291 : vector<8x64xf32>
    %312 = arith.mulf %304, %285 : vector<8x64xf32>
    %313 = arith.addf %311, %312 : vector<8x64xf32>
    %314 = vector.extract_strided_slice %273 {offsets = [1, 0, 0], sizes = [1, 8, 64], strides = [1, 1, 1]} : vector<8x8x64xf32> to vector<1x8x64xf32>
    %315 = vector.shape_cast %314 : vector<1x8x64xf32> to vector<8x64xf32>
    %316 = arith.addf %313, %315 : vector<8x64xf32>
    %317 = vector.extract_strided_slice %254 {offsets = [1, 0, 0], sizes = [1, 8, 64], strides = [1, 1, 1]} : vector<8x8x64xf32> to vector<1x8x64xf32>
    %318 = vector.shape_cast %317 : vector<1x8x64xf32> to vector<8x64xf32>
    %319 = arith.mulf %310, %318 : vector<8x64xf32>
    %320 = vector.extract_strided_slice %263 {offsets = [1, 0, 0], sizes = [1, 8, 64], strides = [1, 1, 1]} : vector<8x8x64xf32> to vector<1x8x64xf32>
    %321 = vector.shape_cast %320 : vector<1x8x64xf32> to vector<8x64xf32>
    %322 = arith.mulf %316, %321 : vector<8x64xf32>
    %323 = arith.subf %319, %322 : vector<8x64xf32>
    %cst_63 = arith.constant dense<0.000000e+00> : vector<64xf32>
    %324 = vector.multi_reduction <add>, %323, %cst_63 [0] : vector<8x64xf32> to vector<64xf32>
    %325 = vector.shape_cast %324 : vector<64xf32> to vector<1x64xf32>
    %326 = vector.extract_strided_slice %205 {offsets = [2, 0, 0], sizes = [1, 8, 64], strides = [1, 1, 1]} : vector<8x8x64xf32> to vector<1x8x64xf32>
    %327 = vector.shape_cast %326 : vector<1x8x64xf32> to vector<8x64xf32>
    %328 = vector.extract_strided_slice %207 {offsets = [2, 0, 0], sizes = [1, 8, 64], strides = [1, 1, 1]} : vector<8x8x64xf32> to vector<1x8x64xf32>
    %329 = vector.shape_cast %328 : vector<1x8x64xf32> to vector<8x64xf32>
    %330 = arith.mulf %327, %310 : vector<8x64xf32>
    %331 = arith.mulf %329, %316 : vector<8x64xf32>
    %332 = arith.subf %330, %331 : vector<8x64xf32>
    %333 = vector.extract_strided_slice %268 {offsets = [2, 0, 0], sizes = [1, 8, 64], strides = [1, 1, 1]} : vector<8x8x64xf32> to vector<1x8x64xf32>
    %334 = vector.shape_cast %333 : vector<1x8x64xf32> to vector<8x64xf32>
    %335 = arith.addf %332, %334 : vector<8x64xf32>
    %336 = arith.mulf %327, %316 : vector<8x64xf32>
    %337 = arith.mulf %329, %310 : vector<8x64xf32>
    %338 = arith.addf %336, %337 : vector<8x64xf32>
    %339 = vector.extract_strided_slice %273 {offsets = [2, 0, 0], sizes = [1, 8, 64], strides = [1, 1, 1]} : vector<8x8x64xf32> to vector<1x8x64xf32>
    %340 = vector.shape_cast %339 : vector<1x8x64xf32> to vector<8x64xf32>
    %341 = arith.addf %338, %340 : vector<8x64xf32>
    %342 = vector.extract_strided_slice %254 {offsets = [2, 0, 0], sizes = [1, 8, 64], strides = [1, 1, 1]} : vector<8x8x64xf32> to vector<1x8x64xf32>
    %343 = vector.shape_cast %342 : vector<1x8x64xf32> to vector<8x64xf32>
    %344 = arith.mulf %335, %343 : vector<8x64xf32>
    %345 = vector.extract_strided_slice %263 {offsets = [2, 0, 0], sizes = [1, 8, 64], strides = [1, 1, 1]} : vector<8x8x64xf32> to vector<1x8x64xf32>
    %346 = vector.shape_cast %345 : vector<1x8x64xf32> to vector<8x64xf32>
    %347 = arith.mulf %341, %346 : vector<8x64xf32>
    %348 = arith.subf %344, %347 : vector<8x64xf32>
    %cst_64 = arith.constant dense<0.000000e+00> : vector<64xf32>
    %349 = vector.multi_reduction <add>, %348, %cst_64 [0] : vector<8x64xf32> to vector<64xf32>
    %350 = vector.shape_cast %349 : vector<64xf32> to vector<1x64xf32>
    %351 = vector.extract_strided_slice %205 {offsets = [3, 0, 0], sizes = [1, 8, 64], strides = [1, 1, 1]} : vector<8x8x64xf32> to vector<1x8x64xf32>
    %352 = vector.shape_cast %351 : vector<1x8x64xf32> to vector<8x64xf32>
    %353 = vector.extract_strided_slice %207 {offsets = [3, 0, 0], sizes = [1, 8, 64], strides = [1, 1, 1]} : vector<8x8x64xf32> to vector<1x8x64xf32>
    %354 = vector.shape_cast %353 : vector<1x8x64xf32> to vector<8x64xf32>
    %355 = arith.mulf %352, %335 : vector<8x64xf32>
    %356 = arith.mulf %354, %341 : vector<8x64xf32>
    %357 = arith.subf %355, %356 : vector<8x64xf32>
    %358 = vector.extract_strided_slice %268 {offsets = [3, 0, 0], sizes = [1, 8, 64], strides = [1, 1, 1]} : vector<8x8x64xf32> to vector<1x8x64xf32>
    %359 = vector.shape_cast %358 : vector<1x8x64xf32> to vector<8x64xf32>
    %360 = arith.addf %357, %359 : vector<8x64xf32>
    %361 = arith.mulf %352, %341 : vector<8x64xf32>
    %362 = arith.mulf %354, %335 : vector<8x64xf32>
    %363 = arith.addf %361, %362 : vector<8x64xf32>
    %364 = vector.extract_strided_slice %273 {offsets = [3, 0, 0], sizes = [1, 8, 64], strides = [1, 1, 1]} : vector<8x8x64xf32> to vector<1x8x64xf32>
    %365 = vector.shape_cast %364 : vector<1x8x64xf32> to vector<8x64xf32>
    %366 = arith.addf %363, %365 : vector<8x64xf32>
    %367 = vector.extract_strided_slice %254 {offsets = [3, 0, 0], sizes = [1, 8, 64], strides = [1, 1, 1]} : vector<8x8x64xf32> to vector<1x8x64xf32>
    %368 = vector.shape_cast %367 : vector<1x8x64xf32> to vector<8x64xf32>
    %369 = arith.mulf %360, %368 : vector<8x64xf32>
    %370 = vector.extract_strided_slice %263 {offsets = [3, 0, 0], sizes = [1, 8, 64], strides = [1, 1, 1]} : vector<8x8x64xf32> to vector<1x8x64xf32>
    %371 = vector.shape_cast %370 : vector<1x8x64xf32> to vector<8x64xf32>
    %372 = arith.mulf %366, %371 : vector<8x64xf32>
    %373 = arith.subf %369, %372 : vector<8x64xf32>
    %cst_65 = arith.constant dense<0.000000e+00> : vector<64xf32>
    %374 = vector.multi_reduction <add>, %373, %cst_65 [0] : vector<8x64xf32> to vector<64xf32>
    %375 = vector.shape_cast %374 : vector<64xf32> to vector<1x64xf32>
    %376 = vector.extract_strided_slice %205 {offsets = [4, 0, 0], sizes = [1, 8, 64], strides = [1, 1, 1]} : vector<8x8x64xf32> to vector<1x8x64xf32>
    %377 = vector.shape_cast %376 : vector<1x8x64xf32> to vector<8x64xf32>
    %378 = vector.extract_strided_slice %207 {offsets = [4, 0, 0], sizes = [1, 8, 64], strides = [1, 1, 1]} : vector<8x8x64xf32> to vector<1x8x64xf32>
    %379 = vector.shape_cast %378 : vector<1x8x64xf32> to vector<8x64xf32>
    %380 = arith.mulf %377, %360 : vector<8x64xf32>
    %381 = arith.mulf %379, %366 : vector<8x64xf32>
    %382 = arith.subf %380, %381 : vector<8x64xf32>
    %383 = vector.extract_strided_slice %268 {offsets = [4, 0, 0], sizes = [1, 8, 64], strides = [1, 1, 1]} : vector<8x8x64xf32> to vector<1x8x64xf32>
    %384 = vector.shape_cast %383 : vector<1x8x64xf32> to vector<8x64xf32>
    %385 = arith.addf %382, %384 : vector<8x64xf32>
    %386 = arith.mulf %377, %366 : vector<8x64xf32>
    %387 = arith.mulf %379, %360 : vector<8x64xf32>
    %388 = arith.addf %386, %387 : vector<8x64xf32>
    %389 = vector.extract_strided_slice %273 {offsets = [4, 0, 0], sizes = [1, 8, 64], strides = [1, 1, 1]} : vector<8x8x64xf32> to vector<1x8x64xf32>
    %390 = vector.shape_cast %389 : vector<1x8x64xf32> to vector<8x64xf32>
    %391 = arith.addf %388, %390 : vector<8x64xf32>
    %392 = vector.extract_strided_slice %254 {offsets = [4, 0, 0], sizes = [1, 8, 64], strides = [1, 1, 1]} : vector<8x8x64xf32> to vector<1x8x64xf32>
    %393 = vector.shape_cast %392 : vector<1x8x64xf32> to vector<8x64xf32>
    %394 = arith.mulf %385, %393 : vector<8x64xf32>
    %395 = vector.extract_strided_slice %263 {offsets = [4, 0, 0], sizes = [1, 8, 64], strides = [1, 1, 1]} : vector<8x8x64xf32> to vector<1x8x64xf32>
    %396 = vector.shape_cast %395 : vector<1x8x64xf32> to vector<8x64xf32>
    %397 = arith.mulf %391, %396 : vector<8x64xf32>
    %398 = arith.subf %394, %397 : vector<8x64xf32>
    %cst_66 = arith.constant dense<0.000000e+00> : vector<64xf32>
    %399 = vector.multi_reduction <add>, %398, %cst_66 [0] : vector<8x64xf32> to vector<64xf32>
    %400 = vector.shape_cast %399 : vector<64xf32> to vector<1x64xf32>
    %401 = vector.extract_strided_slice %205 {offsets = [5, 0, 0], sizes = [1, 8, 64], strides = [1, 1, 1]} : vector<8x8x64xf32> to vector<1x8x64xf32>
    %402 = vector.shape_cast %401 : vector<1x8x64xf32> to vector<8x64xf32>
    %403 = vector.extract_strided_slice %207 {offsets = [5, 0, 0], sizes = [1, 8, 64], strides = [1, 1, 1]} : vector<8x8x64xf32> to vector<1x8x64xf32>
    %404 = vector.shape_cast %403 : vector<1x8x64xf32> to vector<8x64xf32>
    %405 = arith.mulf %402, %385 : vector<8x64xf32>
    %406 = arith.mulf %404, %391 : vector<8x64xf32>
    %407 = arith.subf %405, %406 : vector<8x64xf32>
    %408 = vector.extract_strided_slice %268 {offsets = [5, 0, 0], sizes = [1, 8, 64], strides = [1, 1, 1]} : vector<8x8x64xf32> to vector<1x8x64xf32>
    %409 = vector.shape_cast %408 : vector<1x8x64xf32> to vector<8x64xf32>
    %410 = arith.addf %407, %409 : vector<8x64xf32>
    %411 = arith.mulf %402, %391 : vector<8x64xf32>
    %412 = arith.mulf %404, %385 : vector<8x64xf32>
    %413 = arith.addf %411, %412 : vector<8x64xf32>
    %414 = vector.extract_strided_slice %273 {offsets = [5, 0, 0], sizes = [1, 8, 64], strides = [1, 1, 1]} : vector<8x8x64xf32> to vector<1x8x64xf32>
    %415 = vector.shape_cast %414 : vector<1x8x64xf32> to vector<8x64xf32>
    %416 = arith.addf %413, %415 : vector<8x64xf32>
    %417 = vector.extract_strided_slice %254 {offsets = [5, 0, 0], sizes = [1, 8, 64], strides = [1, 1, 1]} : vector<8x8x64xf32> to vector<1x8x64xf32>
    %418 = vector.shape_cast %417 : vector<1x8x64xf32> to vector<8x64xf32>
    %419 = arith.mulf %410, %418 : vector<8x64xf32>
    %420 = vector.extract_strided_slice %263 {offsets = [5, 0, 0], sizes = [1, 8, 64], strides = [1, 1, 1]} : vector<8x8x64xf32> to vector<1x8x64xf32>
    %421 = vector.shape_cast %420 : vector<1x8x64xf32> to vector<8x64xf32>
    %422 = arith.mulf %416, %421 : vector<8x64xf32>
    %423 = arith.subf %419, %422 : vector<8x64xf32>
    %cst_67 = arith.constant dense<0.000000e+00> : vector<64xf32>
    %424 = vector.multi_reduction <add>, %423, %cst_67 [0] : vector<8x64xf32> to vector<64xf32>
    %425 = vector.shape_cast %424 : vector<64xf32> to vector<1x64xf32>
    %426 = vector.extract_strided_slice %205 {offsets = [6, 0, 0], sizes = [1, 8, 64], strides = [1, 1, 1]} : vector<8x8x64xf32> to vector<1x8x64xf32>
    %427 = vector.shape_cast %426 : vector<1x8x64xf32> to vector<8x64xf32>
    %428 = vector.extract_strided_slice %207 {offsets = [6, 0, 0], sizes = [1, 8, 64], strides = [1, 1, 1]} : vector<8x8x64xf32> to vector<1x8x64xf32>
    %429 = vector.shape_cast %428 : vector<1x8x64xf32> to vector<8x64xf32>
    %430 = arith.mulf %427, %410 : vector<8x64xf32>
    %431 = arith.mulf %429, %416 : vector<8x64xf32>
    %432 = arith.subf %430, %431 : vector<8x64xf32>
    %433 = vector.extract_strided_slice %268 {offsets = [6, 0, 0], sizes = [1, 8, 64], strides = [1, 1, 1]} : vector<8x8x64xf32> to vector<1x8x64xf32>
    %434 = vector.shape_cast %433 : vector<1x8x64xf32> to vector<8x64xf32>
    %435 = arith.addf %432, %434 : vector<8x64xf32>
    %436 = arith.mulf %427, %416 : vector<8x64xf32>
    %437 = arith.mulf %429, %410 : vector<8x64xf32>
    %438 = arith.addf %436, %437 : vector<8x64xf32>
    %439 = vector.extract_strided_slice %273 {offsets = [6, 0, 0], sizes = [1, 8, 64], strides = [1, 1, 1]} : vector<8x8x64xf32> to vector<1x8x64xf32>
    %440 = vector.shape_cast %439 : vector<1x8x64xf32> to vector<8x64xf32>
    %441 = arith.addf %438, %440 : vector<8x64xf32>
    %442 = vector.extract_strided_slice %254 {offsets = [6, 0, 0], sizes = [1, 8, 64], strides = [1, 1, 1]} : vector<8x8x64xf32> to vector<1x8x64xf32>
    %443 = vector.shape_cast %442 : vector<1x8x64xf32> to vector<8x64xf32>
    %444 = arith.mulf %435, %443 : vector<8x64xf32>
    %445 = vector.extract_strided_slice %263 {offsets = [6, 0, 0], sizes = [1, 8, 64], strides = [1, 1, 1]} : vector<8x8x64xf32> to vector<1x8x64xf32>
    %446 = vector.shape_cast %445 : vector<1x8x64xf32> to vector<8x64xf32>
    %447 = arith.mulf %441, %446 : vector<8x64xf32>
    %448 = arith.subf %444, %447 : vector<8x64xf32>
    %cst_68 = arith.constant dense<0.000000e+00> : vector<64xf32>
    %449 = vector.multi_reduction <add>, %448, %cst_68 [0] : vector<8x64xf32> to vector<64xf32>
    %450 = vector.shape_cast %449 : vector<64xf32> to vector<1x64xf32>
    %451 = vector.extract_strided_slice %205 {offsets = [7, 0, 0], sizes = [1, 8, 64], strides = [1, 1, 1]} : vector<8x8x64xf32> to vector<1x8x64xf32>
    %452 = vector.shape_cast %451 : vector<1x8x64xf32> to vector<8x64xf32>
    %453 = vector.extract_strided_slice %207 {offsets = [7, 0, 0], sizes = [1, 8, 64], strides = [1, 1, 1]} : vector<8x8x64xf32> to vector<1x8x64xf32>
    %454 = vector.shape_cast %453 : vector<1x8x64xf32> to vector<8x64xf32>
    %455 = arith.mulf %452, %435 : vector<8x64xf32>
    %456 = arith.mulf %454, %441 : vector<8x64xf32>
    %457 = arith.subf %455, %456 : vector<8x64xf32>
    %458 = vector.extract_strided_slice %268 {offsets = [7, 0, 0], sizes = [1, 8, 64], strides = [1, 1, 1]} : vector<8x8x64xf32> to vector<1x8x64xf32>
    %459 = vector.shape_cast %458 : vector<1x8x64xf32> to vector<8x64xf32>
    %460 = arith.addf %457, %459 : vector<8x64xf32>
    %461 = arith.mulf %452, %441 : vector<8x64xf32>
    %462 = arith.mulf %454, %435 : vector<8x64xf32>
    %463 = arith.addf %461, %462 : vector<8x64xf32>
    %464 = vector.extract_strided_slice %273 {offsets = [7, 0, 0], sizes = [1, 8, 64], strides = [1, 1, 1]} : vector<8x8x64xf32> to vector<1x8x64xf32>
    %465 = vector.shape_cast %464 : vector<1x8x64xf32> to vector<8x64xf32>
    %466 = arith.addf %463, %465 : vector<8x64xf32>
    %467 = vector.extract_strided_slice %254 {offsets = [7, 0, 0], sizes = [1, 8, 64], strides = [1, 1, 1]} : vector<8x8x64xf32> to vector<1x8x64xf32>
    %468 = vector.shape_cast %467 : vector<1x8x64xf32> to vector<8x64xf32>
    %469 = arith.mulf %460, %468 : vector<8x64xf32>
    %470 = vector.extract_strided_slice %263 {offsets = [7, 0, 0], sizes = [1, 8, 64], strides = [1, 1, 1]} : vector<8x8x64xf32> to vector<1x8x64xf32>
    %471 = vector.shape_cast %470 : vector<1x8x64xf32> to vector<8x64xf32>
    %472 = arith.mulf %466, %471 : vector<8x64xf32>
    %473 = arith.subf %469, %472 : vector<8x64xf32>
    %cst_69 = arith.constant dense<0.000000e+00> : vector<64xf32>
    %474 = vector.multi_reduction <add>, %473, %cst_69 [0] : vector<8x64xf32> to vector<64xf32>
    %475 = vector.shape_cast %474 : vector<64xf32> to vector<1x64xf32>
    %476 = tpu.concatenate %300, %325, %350, %375, %400, %425, %450, %475 in 0 : vector<1x64xf32>, vector<1x64xf32>, vector<1x64xf32>, vector<1x64xf32>, vector<1x64xf32>, vector<1x64xf32>, vector<1x64xf32>, vector<1x64xf32> -> vector<8x64xf32>
    %477 = vector.extract_strided_slice %476 {offsets = [0, 0], sizes = [8, 32], strides = [1, 1]} : vector<8x64xf32> to vector<8x32xf32>
    %478 = vector.extract_strided_slice %476 {offsets = [0, 32], sizes = [8, 32], strides = [1, 1]} : vector<8x64xf32> to vector<8x32xf32>
    %479 = tpu.concatenate %477, %478 in 0 : vector<8x32xf32>, vector<8x32xf32> -> vector<16x32xf32>
    %480 = vector.extract_strided_slice %0 {offsets = [12, 0], sizes = [1, 32], strides = [1, 1]} : vector<16x224xf32> to vector<1x32xf32>
    %481 = vector.broadcast %480 : vector<1x32xf32> to vector<16x32xf32>
    %482 = arith.mulf %167, %481 : vector<16x32xf32>
    %483 = arith.addf %479, %482 : vector<16x32xf32>
    %484 = arith.mulf %483, %166 : vector<16x32xf32>
    %c0_70 = arith.constant 0 : index
    %c768 = arith.constant 768 : index
    %485 = vector.load %arg1[%c0_70, %c768] : memref<32x896xf32, #tpu.memory_space<vmem>>, vector<32x32xf32>
    %cst_71 = arith.constant dense<0.000000e+00> : vector<16x32xf32>
    %486 = tpu.matmul %484, %485, %cst_71 {dimension_numbers = #tpu.dot_dimension_numbers<[1], [0], [0], [1], [0, 0, 1, 1], [], []>} : vector<16x32xf32>, vector<32x32xf32>, vector<16x32xf32> -> vector<16x32xf32>
    %487 = vector.extract_strided_slice %0 {offsets = [11, 0], sizes = [1, 32], strides = [1, 1]} : vector<16x224xf32> to vector<1x32xf32>
    %488 = vector.broadcast %487 : vector<1x32xf32> to vector<16x32xf32>
    %489 = arith.addf %486, %488 : vector<16x32xf32>
    %490 = arith.addf %129, %489 : vector<16x32xf32>
    %c0_72 = arith.constant 0 : index
    %c0_73 = arith.constant 0 : index
    %491 = vector.load %arg6[%c0_72, %c0_73] : memref<16x32xf32, #tpu.memory_space<vmem>>, vector<16x32xf32>
    tpu.vector_store %arg6[%c0_72, %c0_73], %490 {strides = array<i32>} : memref<16x32xf32, #tpu.memory_space<vmem>>, vector<16x32xf32>,
    return
  }
}

</mosaic_0001>

<bundles_post_ra>
// kernel: encoder_layer_pallas.1
= control target key start
LH: loop header
LB: loop body
LE: loop exit
PB: predicated region body
PF: predicated region fallthrough
CT: control target
= control target key end

     0   :  { %11 = vsyncpa [#allocation3], 0  ;;  %s6876_s0 = inlined_call_operand.vmem [shape: f32[16,32], index: 0, kind: input, shape index: {}]   ;;  %s6877_s1 = inlined_call_operand.vmem [shape: f32[32,896], index: 1, kind: input, shape index: {}]   ;;  %s6878_s2 = inlined_call_operand.vmem [shape: f32[96,32], index: 2, kind: input, shape index: {}]   ;;  %s6879_s3 = inlined_call_operand.hbm [shape: f32[16,224], index: 3, kind: input, shape index: {}]   ;;  %s6880_s4 = inlined_call_operand.hbm [shape: f32[64,96], index: 4, kind: input, shape index: {}]   ;;  %s6881_s5 = inlined_call_operand.vmem [shape: f32[112,64], index: 5, kind: input, shape index: {}]   ;;  %s6882_s6 = inlined_call_operand.hbm [shape: f32[16,32], index: 6, kind: output, shape index: {}]  }
   0x1   :  { %12 = vsyncpa [#allocation6], 0 }
   0x2   :  { %13 = vsyncpa [#allocation4], 0  ;;  %s24_s23 = sshll.u32 %s6879_s3, 4  ;;  %s4228_s24 = smov [#allocation2]   ;;  %s25_s23 = int_to_ptr.hbm [resolvable:$true] %s24_s23 }
   0x3   :  { %s26_s25 = sshll.u32 %s4228_s24, 4  ;;  %s37_s28 = sshll.u32 %s6880_s4, 4  ;;  %s27_s25 = int_to_ptr.vmem [resolvable:$true] %s26_s25  ;;  %s38_s28 = int_to_ptr.hbm [resolvable:$true] %s37_s28 }
   0x4   :  { %s4229_s29 = smov 256   ;;  %s4230_s30 = smov 16  }
   0x5   :  { %32 = dma.hbm_to_vmem [thread:$0]  %s25_s23, 512, %s27_s25, [#allocation3], %s4229_s29, %s4229_s29, %s4230_s30  }
   0x6   :  { %s4231_s7 = smov [#allocation5]   ;;  %s4232_s9 = smov 128  }
   0x7   :  { %s39_s8 = sshll.u32 %s4231_s7, 4  ;;  %s4233_s10 = smov 8   ;;  %s40_s8 = int_to_ptr.vmem [resolvable:$true] %s39_s8 }
   0x8   :  { %45 = dma.hbm_to_vmem [thread:$0]  %s38_s28, 1024, %s40_s8, [#allocation6], %s4232_s9, %s4232_s9, %s4233_s10  }
   0x9   :  { %4222 = dma.done.wait [#allocation3], 512  }
   0xa   :  { %4223 = vsyncadd [#allocation3], 4294966784 }
   0xb   :  { %4224 = dma.done.wait [#allocation6], 1024  }
   0xc   :  { %4225 = vsyncadd [#allocation6], 4294966272  ;;  %vm6999_vm0 = vcmask 261120   ;;  %v4297_v0 = vld [vmem:[%s6876_s0] sm:$0xff]  ;;  %v4304_v2 = vld [vmem:[%s6876_s0 + $0x8] sm:$0xff]  ;;  %v4234_v4 = vmov 32.0  }
   0xd   :  { %v70_v1 = vsel %vm6999_vm0, %v4297_v0, 0.0  ;;  %v73_v3 = vsel %vm6999_vm0, %v4304_v2, 0.0  ;;  %4063 = vrcp.f32 %v4234_v4  ;;  %v130_v21 = vld [vmem:[%s6877_s1 + $0xa8] sm:$0xff]  ;;  %v129_v22 = vld [vmem:[%s6877_s1 + $0x70] sm:$0xff]  ;;  %v128_v23 = vld [vmem:[%s6877_s1 + $0x38] sm:$0xff]  ;;  %s4235_s20 = smov 96  }
   0xe   :  { %71 = vadd.xlane.f32.xlu0 %v70_v1  ;;  %150 = vmatpush.msra.mxu0 %v130_v21  ;;  %v127_v24 = vld [vmem:[%s6877_s1] sm:$0xff]  ;;  %v4332_v25 = vld [vmem:[#allocation5 + $0x18] sm:$0xff]  ;;  %v4334_v26 = vld [vmem:[#allocation5 + $0x10] sm:$0xff]  ;;  %s4236_s21 = smov 80   ;;  %s4237_s22 = smov 64   ;;  %vm217_vm8 = vcmask 130048  }
   0xf   :  { %230 = vrot.lane.b32.xlu2 %v4332_v25, %s4235_s20  ;;  %v4343_v30 = vld [vmem:[#allocation5] sm:$0xff]  ;;  %v4352_v36 = vld [vmem:[#allocation5 + $0x8] sm:$0xff]  ;;  %s4238_s23 = smov 112   ;;  %s4239_s24 = smov 48   ;;  %vm746_vm15 = vcmask 785408  }
  0x10   :  { %151 = vmatpush.msra.mxu0 %v129_v22  ;;  %v4356_v40 = vld [vmem:[#allocation2] sm:$0xff]  ;;  %s4240_s15 = smov 32   ;;  %s3919_s4 = sshll.u32 %s6882_s6, 4  ;;  %s3920_s4 = int_to_ptr.hbm [resolvable:$true] %s3919_s4 }
  0x11   :  { %v121_v44 = vperm.slane %v4356_v40, 0  ;;  %v124_v48 = vperm.slane %v4356_v40, 1  ;;  %v131_v58 = vperm.slane %v4356_v40, 6 }
  0x12   :  { %152 = vmatpush.msra.mxu0 %v128_v23 }
  0x13   :  { %v4064_v5 = vpop.eup %4063 }
  0x14   :  { %v77_v6 = vmul.f32 32.0, %v4064_v5  ;;  %vm81_vm1 = vweird.f32 %v4064_v5  ;;  %153 = vmatpush.msra.mxu0 %v127_v24 }
  0x16   :  { %74 = vadd.xlane.f32.xlu0 %v73_v3  ;;  %v78_v7 = vsub.f32 1.0, %v77_v6 }
  0x17   :  { %256 = vrot.lane.b32.xlu2 %v4332_v25, %s4236_s21 }
  0x18   :  { %v79_v8 = vmul.f32 %v4064_v5, %v78_v7 }
  0x1a   :  { %v80_v9 = vadd.f32 %v4064_v5, %v79_v8 }
  0x1c   :  { %v4308_v10 = vsel %vm81_vm1, %v4064_v5, %v80_v9 }
  0x1f   :  { %222 = vrot.lane.b32.xlu2 %v4352_v36, %s4236_s21 }
  0x27   :  { %248 = vrot.lane.b32.xlu2 %v4352_v36, %s4235_s20 }
  0x2a   :  { %228 = vrot.lane.b32.xlu0 %v4334_v26, %s4235_s20 }
  0x2f   :  { %220 = vrot.lane.b32.xlu2 %v4343_v30, %s4236_s21 }
  0x32   :  { %173 = vrot.lane.b32.xlu0 %v4334_v26, %s4237_s22 }
  0x69   :  { %v4368_v59 = vpop.permute.xlu2 %230 }
  0x71   :  { %v257_v4 = vpop.permute.xlu2 %256 }
  0x81   :  { %v72_v11 = vpop.xlane.xlu0 %71 }
  0x82   :  { %v83_v12 = vmul.f32 %v4308_v10, %v72_v11 }
  0x84   :  { %v85_v13 = vsub.f32 %v4297_v0, %v83_v12  ;;  %v223_v12 = vpop.permute.xlu2 %222 }
  0x86   :  { %v87_v14 = vmul.f32 %v85_v13, %v85_v13 }
  0x88   :  { %v89_v15 = vsel %vm6999_vm0, %v87_v14, 0.0 }
  0x89   :  { %90 = vadd.xlane.f32.xlu1 %v89_v15  ;;  %v75_v16 = vpop.xlane.xlu0 %74 }
  0x8a   :  { %v84_v17 = vmul.f32 %v4308_v10, %v75_v16 }
  0x8c   :  { %v4315_v18 = vsub.f32 %v4304_v2, %v84_v17 }
  0x8e   :  { %v88_v19 = vmul.f32 %v4315_v18, %v4315_v18 }
  0x90   :  { %v92_v20 = vsel %vm6999_vm0, %v88_v19, 0.0 }
  0x91   :  { %93 = vadd.xlane.f32.xlu1 %v92_v20 }
  0x9c   :  { %v4372_v62 = vpop.permute.xlu0 %228 }
  0xa4   :  { %v4393_v9 = vpop.permute.xlu0 %173 }
  0xaa   :  { %254 = vrot.lane.b32.xlu1 %v4334_v26, %s4236_s21 }
  0xb2   :  { %246 = vrot.lane.b32.xlu1 %v4343_v30, %s4235_s20 }
  0xfc   :  { %v91_v27 = vpop.xlane.xlu1 %90 }
  0xfd   :  { %v95_v28 = vmul.f32 %v91_v27, %v4308_v10 }
  0xff   :  { %v97_v29 = vadd.f32 1e-05, %v95_v28 }
 0x101   :  { %4065 = vrsqrt.f32 %v97_v29  ;;  %vm105_vm3 = vweird.f32 %v97_v29 }
 0x104   :  { %v94_v31 = vpop.xlane.xlu1 %93 }
 0x105   :  { %v96_v32 = vmul.f32 %v94_v31, %v4308_v10 }
 0x107   :  { %v4066_v33 = vpop.eup %4065  ;;  %v98_v34 = vadd.f32 1e-05, %v96_v32 }
 0x108   :  { %v100_v35 = vmul.f32 %v4066_v33, %v97_v29  ;;  %vm106_vm2 = vweird.f32 %v4066_v33 }
 0x109   :  { %4067 = vrsqrt.f32 %v98_v34  ;;  %vm107_vm4 = vmor %vm105_vm3, %vm106_vm2  ;;  %vm115_vm6 = vweird.f32 %v98_v34 }
 0x10a   :  { %v101_v37 = vmul.f32 %v4066_v33, %v100_v35 }
 0x10c   :  { %v102_v38 = vmul.f32 0.5, %v101_v37 }
 0x10e   :  { %v103_v39 = vsub.f32 1.5, %v102_v38  ;;  %v4424_v38 = vld [vmem:[#allocation5 + $0x20] sm:$0xff] }
 0x10f   :  { %v4068_v41 = vpop.eup %4067 }
 0x110   :  { %v104_v42 = vmul.f32 %v4066_v33, %v103_v39  ;;  %v110_v43 = vmul.f32 %v4068_v41, %v98_v34  ;;  %vm116_vm5 = vweird.f32 %v4068_v41  ;;  %v4428_v39 = vld [vmem:[#allocation5 + $0x30] sm:$0xff] }
 0x111   :  { %vm117_vm7 = vmor %vm115_vm6, %vm116_vm5 }
 0x112   :  { %v108_v45 = vsel %vm107_vm4, %v4066_v33, %v104_v42  ;;  %v111_v46 = vmul.f32 %v4068_v41, %v110_v43  ;;  %v4432_v43 = vld [vmem:[#allocation5 + $0x28] sm:$0xff] }
 0x113   :  { %v119_v47 = vmul.f32 %v108_v45, %v85_v13  ;;  %v4398_v13 = vpop.permute.xlu2 %248 }
 0x114   :  { %v112_v49 = vmul.f32 0.5, %v111_v46 }
 0x115   :  { %v122_v50 = vmul.f32 %v121_v44, %v119_v47 }
 0x116   :  { %v113_v51 = vsub.f32 1.5, %v112_v49 }
 0x117   :  { %v125_v52 = vadd.f32 %v124_v48, %v122_v50 }
 0x118   :  { %v114_v53 = vmul.f32 %v4068_v41, %v113_v51 }
 0x119   :  { %3933 = vmatmul.msk.f32.vlgmr.msra.gmra.mxu0 %vm6999_vm0, %v125_v52 }
 0x11a   :  { %v118_v54 = vsel %vm117_vm7, %v4068_v41, %v114_v53 }
 0x11b   :  { %v120_v55 = vmul.f32 %v118_v54, %v4315_v18  ;;  %v221_v14 = vpop.permute.xlu2 %220 }
 0x11c   :  { %v255_v7 = vpop.permute.xlu1 %254 }
 0x11d   :  { %v123_v56 = vmul.f32 %v121_v44, %v120_v55  ;;  %v4434_v44 = vld [vmem:[#allocation5 + $0x38] sm:$0xff] }
 0x11f   :  { %v126_v57 = vadd.f32 %v124_v48, %v123_v56 }
 0x121   :  { %3934 = vmatmul.msk.f32.gmra.mxu0 %vm6999_vm0, %v126_v57 }
 0x124   :  { %v4402_v18 = vpop.permute.xlu1 %246 }
 0x196   :  { %v155_v60 = vpop.f32.mrf.mxu0 }
 0x197   :  { %v4370_v61 = vadd.f32 %v155_v60, %v131_v58 }
 0x199   :  { %v234_v63 = vmul.f32 %v4372_v62, %v4370_v61  ;;  %v260_v8 = vmul.f32 %v255_v7, %v4370_v61  ;;  %v179_v11 = vmul.f32 %v4393_v9, %v4370_v61  ;;  %v226_v21 = vmul.f32 %v221_v14, %v4370_v61 }
 0x19a   :  { %v252_v32 = vmul.f32 %v4402_v18, %v4370_v61 }
 0x19b   :  { %238 = vrot.lane.b32.xlu1 %v234_v63, %s4238_s23 }
 0x19e   :  { %v158_v1 = vpop.f32.mrf.mxu0 }
 0x19f   :  { %v4377_v3 = vadd.f32 %v158_v1, %v131_v58 }
 0x1a1   :  { %v261_v5 = vmul.f32 %v257_v4, %v4377_v3  ;;  %v235_v6 = vmul.f32 %v4368_v59, %v4377_v3  ;;  %v227_v15 = vmul.f32 %v223_v12, %v4377_v3  ;;  %v253_v24 = vmul.f32 %v4398_v13, %v4377_v3 }
 0x1a3   :  { %266 = vrot.lane.b32.xlu0 %v261_v5, %s4230_s30  ;;  %240 = vrot.lane.b32.xlu2 %v235_v6, %s4238_s23 }
 0x1a4   :  { %201 = vrot.lane.b32.xlu1 %v4332_v25, %s4239_s24 }
 0x1ab   :  { %199 = vrot.lane.b32.xlu2 %v4334_v26, %s4239_s24  ;;  %264 = vrot.lane.b32.xlu0 %v260_v8, %s4230_s30 }
 0x1ac   :  { %163 = vrot.lane.b32.xlu1 %v4343_v30, %s4239_s24 }
 0x1b3   :  { %175 = vrot.lane.b32.xlu2 %v4332_v25, %s4237_s22  ;;  %191 = vrot.lane.b32.xlu0 %v4343_v30, %s4237_s22 }
 0x1bb   :  { %183 = vrot.lane.b32.xlu2 %v179_v11, %s4238_s23 }
 0x1fd   :  { %v241_v16 = vpop.permute.xlu2 %240 }
 0x1fe   :  { %v245_v17 = vsub.f32 %v227_v15, %v241_v16 }
 0x200   :  { %276 = vrot.lane.b32.xlu0 %v245_v17, %s4235_s20 }
 0x205   :  { %v200_v19 = vpop.permute.xlu2 %199 }
 0x206   :  { %v205_v20 = vmul.f32 %v200_v19, %v4370_v61 }
 0x208   :  { %209 = vrot.lane.b32.xlu1 %v205_v20, %s4230_s30 }
 0x20d   :  { %v239_v22 = vpop.permute.xlu1 %238  ;;  %v4419_v35 = vpop.permute.xlu2 %175 }
 0x20e   :  { %v244_v23 = vsub.f32 %v226_v21, %v239_v22  ;;  %v180_v37 = vmul.f32 %v4419_v35, %v4377_v3 }
 0x210   :  { %274 = vrot.lane.b32.xlu0 %v244_v23, %s4235_s20  ;;  %165 = vrot.lane.b32.xlu1 %v4352_v36, %s4239_s24 }
 0x215   :  { %v267_v27 = vpop.permute.xlu0 %266  ;;  %v184_v41 = vpop.permute.xlu2 %183 }
 0x216   :  { %v271_v28 = vadd.f32 %v267_v27, %v253_v24  ;;  %v202_v29 = vpop.permute.xlu1 %201 }
 0x217   :  { %v206_v31 = vmul.f32 %v202_v29, %v4377_v3 }
 0x218   :  { %193 = vrot.lane.b32.xlu0 %v4352_v36, %s4237_s22  ;;  %284 = vrot.lane.b32.xlu2 %v271_v28, %s4235_s20 }
 0x219   :  { %211 = vrot.lane.b32.xlu1 %v206_v31, %s4230_s30 }
 0x21d   :  { %v265_v33 = vpop.permute.xlu0 %264 }
 0x21e   :  { %v270_v34 = vadd.f32 %v265_v33, %v252_v32  ;;  %v164_v45 = vpop.permute.xlu1 %163 }
 0x21f   :  { %v169_v50 = vmul.f32 %v164_v45, %v4370_v61 }
 0x220   :  { %282 = vrot.lane.b32.xlu2 %v270_v34, %s4235_s20  ;;  %302 = vrot.lane.b32.xlu0 %v4424_v38, %s4237_s22 }
 0x221   :  { %v189_v53 = vsub.f32 %v169_v50, %v184_v41 }
 0x225   :  { %v192_v42 = vpop.permute.xlu0 %191 }
 0x226   :  { %v197_v51 = vmul.f32 %v192_v42, %v4370_v61 }
 0x228   :  { %185 = vrot.lane.b32.xlu2 %v180_v37, %s4238_s23  ;;  %306 = vrot.lane.b32.xlu0 %v4428_v39, %s4237_s22 }
 0x230   :  { %308 = vrot.lane.b32.xlu0 %v4434_v44, %s4237_s22  ;;  %304 = vrot.lane.b32.xlu2 %v4432_v43, %s4237_s22 }
 0x272   :  { %v277_v46 = vpop.permute.xlu0 %276  ;;  %v285_v47 = vpop.permute.xlu2 %284 }
 0x273   :  { %v289_v48 = vsel %vm217_vm8, %v277_v46, %v285_v47 }
 0x274   :  { %3935 = vmatpush.xpose.msk.msra.mxu1 %vm6999_vm0, %v289_v48 }
 0x27a   :  { %v210_v49 = vpop.permute.xlu1 %209  ;;  %v283_v54 = vpop.permute.xlu2 %282 }
 0x27b   :  { %v215_v52 = vadd.f32 %v210_v49, %v197_v51 }
 0x27d   :  { %v218_v55 = vsel %vm217_vm8, %v189_v53, %v215_v52  ;;  %v4056_v53 = vpack.i.bf16 %v4370_v61, %v4377_v3 }
 0x27e   :  { %v290_v60 = vmul.f32 %v218_v55, %v4343_v30  ;;  %v292_v14 = vmul.f32 %v218_v55, %v4334_v26  ;;  %v294_v15 = vmul.f32 %v218_v55, %v4424_v38 }
 0x282   :  { %v275_v56 = vpop.permute.xlu0 %274  ;;  %v166_v57 = vpop.permute.xlu1 %165 }
 0x283   :  { %v288_v58 = vsel %vm217_vm8, %v275_v56, %v283_v54  ;;  %v170_v63 = vmul.f32 %v166_v57, %v4377_v3  ;;  %v186_v5 = vpop.permute.xlu2 %185 }
 0x284   :  { %3936 = vmatpush.xpose.msk.msra.mxu1 %vm6999_vm0, %v288_v58 }
 0x285   :  { %v190_v7 = vsub.f32 %v170_v63, %v186_v5 }
 0x287   :  { %3937 = vmatmul.msk.f32.vlgmr.msra.gmra.mxu1 %vm6999_vm0, %v290_v60 }
 0x28a   :  { %v194_v1 = vpop.permute.xlu0 %193 }
 0x28b   :  { %v198_v4 = vmul.f32 %v194_v1, %v4377_v3  ;;  %v212_v6 = vpop.permute.xlu1 %211  ;;  %v305_v41 = vpop.permute.xlu2 %304 }
 0x28d   :  { %v216_v8 = vadd.f32 %v212_v6, %v198_v4 }
 0x28f   :  { %v219_v11 = vsel %vm217_vm8, %v190_v7, %v216_v8 }
 0x290   :  { %v291_v12 = vmul.f32 %v219_v11, %v4352_v36  ;;  %v293_v30 = vmul.f32 %v219_v11, %v4332_v25  ;;  %v295_v16 = vmul.f32 %v219_v11, %v4432_v43  ;;  %v296_v36 = vmul.f32 %v218_v55, %v4428_v39 }
 0x291   :  { %v297_v26 = vmul.f32 %v219_v11, %v4434_v44 }
 0x292   :  { %3938 = vmatmul.msk.f32.gmra.mxu1 %vm6999_vm0, %v291_v12  ;;  %v303_v32 = vpop.permute.xlu0 %302 }
 0x29a   :  { %3939 = vmatmul.msk.f32.gmra.mxu1 %vm6999_vm0, %v292_v14  ;;  %v307_v46 = vpop.permute.xlu0 %306 }
 0x2a2   :  { %3940 = vmatmul.msk.f32.gmra.mxu1 %vm6999_vm0, %v293_v30  ;;  %v309_v49 = vpop.permute.xlu0 %308 }
 0x2aa   :  { %3941 = vmatmul.msk.f32.gmra.mxu1 %vm6999_vm0, %v294_v15 }
 0x2b2   :  { %3942 = vmatmul.msk.f32.gmra.mxu1 %vm6999_vm0, %v295_v16 }
 0x2ba   :  { %3943 = vmatmul.msk.f32.gmra.mxu1 %vm6999_vm0, %v296_v36 }
 0x2c2   :  { %3944 = vmatmul.msk.f32.gmra.mxu1 %vm6999_vm0, %v297_v26 }
 0x304   :  { %v361_v17 = vpop.f32.mrf.mxu1 }
 0x305   :  { %v362_v25 = vadd.f32 %v361_v17, %v192_v42 }
 0x307   :  { %v385_v19 = vsel %vm217_vm8, %v362_v25, -inf }
 0x308   :  { %386 = vmax.xlane.f32.xlu1 %v385_v19 }
 0x30f   :  { %v364_v20 = vpop.f32.mrf.mxu1 }
 0x310   :  { %v365_v21 = vadd.f32 %v364_v20, %v194_v1 }
 0x312   :  { %v388_v22 = vsel %vm217_vm8, %v365_v21, -inf }
 0x313   :  { %389 = vmax.xlane.f32.xlu2 %v388_v22 }
 0x317   :  { %v367_v23 = vpop.f32.mrf.mxu1 }
 0x318   :  { %v368_v24 = vadd.f32 %v367_v23, %v4393_v9 }
 0x31a   :  { %v391_v27 = vsel %vm217_vm8, %v368_v24, -inf }
 0x31b   :  { %392 = vmax.xlane.f32.xlu0 %v391_v27 }
 0x31f   :  { %v370_v28 = vpop.f32.mrf.mxu1 }
 0x320   :  { %v371_v29 = vadd.f32 %v370_v28, %v4419_v35 }
 0x322   :  { %v394_v31 = vsel %vm217_vm8, %v371_v29, -inf }
 0x323   :  { %395 = vmax.xlane.f32.xlu1 %v394_v31 }
 0x327   :  { %v373_v33 = vpop.f32.mrf.mxu1 }
 0x328   :  { %v374_v34 = vadd.f32 %v373_v33, %v303_v32 }
 0x32a   :  { %v397_v37 = vsel %vm217_vm8, %v374_v34, -inf }
 0x32b   :  { %398 = vmax.xlane.f32.xlu2 %v397_v37 }
 0x32f   :  { %v376_v42 = vpop.f32.mrf.mxu1 }
 0x330   :  { %v377_v45 = vadd.f32 %v376_v42, %v305_v41 }
 0x332   :  { %v400_v9 = vsel %vm217_vm8, %v377_v45, -inf }
 0x333   :  { %401 = vmax.xlane.f32.xlu1 %v400_v9 }
 0x337   :  { %v379_v47 = vpop.f32.mrf.mxu1 }
 0x338   :  { %v380_v48 = vadd.f32 %v379_v47, %v307_v46 }
 0x33a   :  { %v403_v35 = vsel %vm217_vm8, %v380_v48, -inf }
 0x33b   :  { %404 = vmax.xlane.f32.xlu2 %v403_v35 }
 0x33f   :  { %v382_v50 = vpop.f32.mrf.mxu1 }
 0x340   :  { %v383_v51 = vadd.f32 %v382_v50, %v309_v49 }
 0x342   :  { %v406_v52 = vsel %vm217_vm8, %v383_v51, -inf }
 0x343   :  { %407 = vmax.xlane.f32.xlu0 %v406_v52 }
 0x353   :  { %4057 = vrot.lane.b32.xlu2 %v4056_v53, %s4237_s22 }
 0x37b   :  { %v387_v54 = vpop.xlane.xlu1 %386 }
 0x37c   :  { %v409_v55 = vsub.f32 %v362_v25, %v387_v54 }
 0x37e   :  { %v417_v56 = vmul.f32 1.442695, %v409_v55 }
 0x380   :  { %4069 = vpow2.f32 %v417_v56 }
 0x386   :  { %v4479_v57 = vpop.eup %4069  ;;  %v390_v58 = vpop.xlane.xlu2 %389 }
 0x387   :  { %v410_v60 = vsub.f32 %v365_v21, %v390_v58  ;;  %v433_v63 = vsel %vm217_vm8, %v4479_v57, 0.0 }
 0x388   :  { %434 = vadd.xlane.f32.xlu1 %v433_v63 }
 0x389   :  { %v419_v1 = vmul.f32 1.442695, %v410_v60 }
 0x38b   :  { %4071 = vpow2.f32 %v419_v1 }
 0x38e   :  { %v393_v4 = vpop.xlane.xlu0 %392 }
 0x38f   :  { %v411_v5 = vsub.f32 %v368_v24, %v393_v4 }
 0x391   :  { %v4072_v6 = vpop.eup %4071  ;;  %v421_v61 = vmul.f32 1.442695, %v411_v5 }
 0x392   :  { %v436_v3 = vsel %vm217_vm8, %v4072_v6, 0.0 }
 0x393   :  { %4073 = vpow2.f32 %v421_v61  ;;  %437 = vadd.xlane.f32.xlu1 %v436_v3 }
 0x396   :  { %v396_v7 = vpop.xlane.xlu1 %395 }
 0x397   :  { %v412_v8 = vsub.f32 %v371_v29, %v396_v7  ;;  %v575_v7 = vld [vmem:[%s6877_s1 + $0xd0] sm:$0xff] }
 0x398   :  { %595 = vmatpush.msra.mxu3 %v575_v7 }
 0x399   :  { %v4074_v11 = vpop.eup %4073  ;;  %v423_v12 = vmul.f32 1.442695, %v412_v8 }
 0x39a   :  { %v439_v14 = vsel %vm217_vm8, %v4074_v11, 0.0 }
 0x39b   :  { %4075 = vpow2.f32 %v423_v12  ;;  %440 = vadd.xlane.f32.xlu0 %v439_v14  ;;  %v573_v12 = vld [vmem:[%s6877_s1 + $0x60] sm:$0xff]  ;;  %v572_v14 = vld [vmem:[%s6877_s1 + $0x28] sm:$0xff] }
 0x39e   :  { %v399_v30 = vpop.xlane.xlu2 %398 }
 0x39f   :  { %v413_v15 = vsub.f32 %v374_v34, %v399_v30 }
 0x3a1   :  { %v4076_v16 = vpop.eup %4075  ;;  %v425_v36 = vmul.f32 1.442695, %v413_v15 }
 0x3a2   :  { %v442_v26 = vsel %vm217_vm8, %v4076_v16, 0.0 }
 0x3a3   :  { %4077 = vpow2.f32 %v425_v36  ;;  %443 = vadd.xlane.f32.xlu1 %v442_v26 }
 0x3a6   :  { %v402_v17 = vpop.xlane.xlu1 %401 }
 0x3a7   :  { %v414_v25 = vsub.f32 %v377_v45, %v402_v17 }
 0x3a9   :  { %v4078_v19 = vpop.eup %4077  ;;  %v427_v20 = vmul.f32 1.442695, %v414_v25 }
 0x3aa   :  { %v445_v21 = vsel %vm217_vm8, %v4078_v19, 0.0 }
 0x3ab   :  { %4079 = vpow2.f32 %v427_v20  ;;  %446 = vadd.xlane.f32.xlu0 %v445_v21 }
 0x3ae   :  { %v405_v22 = vpop.xlane.xlu2 %404 }
 0x3af   :  { %v415_v23 = vsub.f32 %v380_v48, %v405_v22 }
 0x3b1   :  { %v4080_v24 = vpop.eup %4079  ;;  %v429_v27 = vmul.f32 1.442695, %v415_v23 }
 0x3b2   :  { %v448_v28 = vsel %vm217_vm8, %v4080_v24, 0.0 }
 0x3b3   :  { %4081 = vpow2.f32 %v429_v27  ;;  %449 = vadd.xlane.f32.xlu1 %v448_v28 }
 0x3b6   :  { %v408_v29 = vpop.xlane.xlu0 %407  ;;  %v4058_v31 = vpop.permute.xlu2 %4057 }
 0x3b7   :  { %v416_v32 = vsub.f32 %v383_v51, %v408_v29  ;;  %v4059_v33 = vunpack.i.l.bf16 %v4058_v31  ;;  %v4060_v41 = vunpack.i.h.bf16 %v4058_v31 }
 0x3b9   :  { %v4082_v34 = vpop.eup %4081  ;;  %v431_v37 = vmul.f32 1.442695, %v416_v32  ;;  %519 = vmatpush.msra.mxu2 %v4059_v33 }
 0x3ba   :  { %v451_v42 = vsel %vm217_vm8, %v4082_v34, 0.0 }
 0x3bb   :  { %4083 = vpow2.f32 %v431_v37  ;;  %452 = vadd.xlane.f32.xlu0 %v451_v42  ;;  %520 = vmatpush.msra.mxu2 %v4060_v41  ;;  %v576_v41 = vperm.slane %v4356_v40, 7 }
 0x3c1   :  { %v4084_v45 = vpop.eup %4083 }
 0x3c2   :  { %v454_v9 = vsel %vm217_vm8, %v4084_v45, 0.0 }
 0x3c3   :  { %455 = vadd.xlane.f32.xlu2 %v454_v9 }
 0x3cc   :  { %546 = vrot.lane.b32.xlu1 %v4424_v38, %s4235_s20 }
 0x3cf   :  { %550 = vrot.lane.b32.xlu0 %v4428_v39, %s4235_s20 }
 0x3d4   :  { %552 = vrot.lane.b32.xlu1 %v4434_v44, %s4235_s20 }
 0x3d7   :  { %548 = vrot.lane.b32.xlu0 %v4432_v43, %s4235_s20 }
 0x3fb   :  { %v435_v46 = vpop.xlane.xlu1 %434 }
 0x3fc   :  { %4085 = vrcp.f32 %v435_v46 }
 0x402   :  { %v4086_v47 = vpop.eup %4085 }
 0x403   :  { %v465_v48 = vmul.f32 %v4086_v47, %v4479_v57 }
 0x405   :  { %3945 = vmatmul.msk.f32.vlgmr.msra.gmra.mxu2 %vm217_vm8, %v465_v48 }
 0x406   :  { %v438_v35 = vpop.xlane.xlu1 %437 }
 0x407   :  { %4087 = vrcp.f32 %v438_v35 }
 0x40d   :  { %v4088_v49 = vpop.eup %4087 }
 0x40e   :  { %v441_v38 = vpop.xlane.xlu0 %440  ;;  %v466_v50 = vmul.f32 %v4088_v49, %v4072_v6 }
 0x40f   :  { %4089 = vrcp.f32 %v441_v38 }
 0x410   :  { %3946 = vmatmul.msk.f32.gmra.mxu2 %vm217_vm8, %v466_v50 }
 0x415   :  { %v4090_v39 = vpop.eup %4089 }
 0x416   :  { %v444_v44 = vpop.xlane.xlu1 %443  ;;  %v467_v51 = vmul.f32 %v4090_v39, %v4074_v11  ;;  %v574_v11 = vld [vmem:[%s6877_s1 + $0x98] sm:$0xff] }
 0x417   :  { %4091 = vrcp.f32 %v444_v44  ;;  %596 = vmatpush.msra.mxu3 %v574_v11 }
 0x418   :  { %3947 = vmatmul.msk.f32.gmra.mxu2 %vm217_vm8, %v467_v51 }
 0x419   :  { %597 = vmatpush.msra.mxu3 %v573_v12 }
 0x41b   :  { %598 = vmatpush.msra.mxu3 %v572_v14  ;;  %v741_v14 = vld [vmem:[%s6878_s2 + $0x38] sm:$0xff] }
 0x41d   :  { %v4092_v43 = vpop.eup %4091 }
 0x41e   :  { %v447_v52 = vpop.xlane.xlu0 %446  ;;  %v468_v53 = vmul.f32 %v4092_v43, %v4076_v16 }
 0x41f   :  { %4093 = vrcp.f32 %v447_v52  ;;  %v664_v52 = vld [vmem:[%s6877_s1 + $0xb0] sm:$0xff] }
 0x420   :  { %3948 = vmatmul.msk.f32.gmra.mxu2 %vm217_vm8, %v468_v53  ;;  %v665_v53 = vld [vmem:[%s6877_s1 + $0xb8] sm:$0xff]  ;;  %686 = vmatpush.msrb.mxu0 %v664_v52 }
 0x421   :  { %709 = vmatpush.msrb.mxu3 %v665_v53 }
 0x425   :  { %v4094_v54 = vpop.eup %4093 }
 0x426   :  { %v450_v55 = vpop.xlane.xlu1 %449  ;;  %v469_v56 = vmul.f32 %v4094_v54, %v4078_v19  ;;  %v662_v54 = vld [vmem:[%s6877_s1 + $0x78] sm:$0xff] }
 0x427   :  { %4095 = vrcp.f32 %v450_v55  ;;  %v663_v55 = vld [vmem:[%s6877_s1 + $0x80] sm:$0xff]  ;;  %687 = vmatpush.msrb.mxu0 %v662_v54 }
 0x428   :  { %3949 = vmatmul.msk.f32.gmra.mxu2 %vm217_vm8, %v469_v56  ;;  %710 = vmatpush.msrb.mxu3 %v663_v55  ;;  %v660_v56 = vld [vmem:[%s6877_s1 + $0x40] sm:$0xff] }
 0x429   :  { %688 = vmatpush.msrb.mxu0 %v660_v56 }
 0x42d   :  { %v4096_v57 = vpop.eup %4095 }
 0x42e   :  { %v453_v58 = vpop.xlane.xlu0 %452  ;;  %v470_v60 = vmul.f32 %v4096_v57, %v4080_v24  ;;  %v661_v57 = vld [vmem:[%s6877_s1 + $0x48] sm:$0xff] }
 0x42f   :  { %4097 = vrcp.f32 %v453_v58  ;;  %711 = vmatpush.msrb.mxu3 %v661_v57  ;;  %v658_v58 = vld [vmem:[%s6877_s1 + $0x8] sm:$0xff] }
 0x430   :  { %3950 = vmatmul.msk.f32.gmra.mxu2 %vm217_vm8, %v470_v60  ;;  %v659_v60 = vld [vmem:[%s6877_s1 + $0x10] sm:$0xff]  ;;  %689 = vmatpush.msrb.mxu0 %v658_v58 }
 0x431   :  { %712 = vmatpush.msrb.mxu3 %v659_v60 }
 0x435   :  { %v4098_v63 = vpop.eup %4097 }
 0x436   :  { %v456_v1 = vpop.xlane.xlu2 %455  ;;  %v471_v4 = vmul.f32 %v4098_v63, %v4082_v34 }
 0x437   :  { %4099 = vrcp.f32 %v456_v1 }
 0x438   :  { %3951 = vmatmul.msk.f32.gmra.mxu2 %vm217_vm8, %v471_v4 }
 0x43d   :  { %v4100_v5 = vpop.eup %4099 }
 0x43e   :  { %v472_v6 = vmul.f32 %v4100_v5, %v4084_v45  ;;  %v547_v26 = vpop.permute.xlu1 %546  ;;  %v745_v5 = vld [vmem:[%s6878_s2 + $0x58] sm:$0xff] }
 0x43f   :  { %4023 = vmatpush.msrb.mxu2 %v745_v5  ;;  %757 = vmatpush.msra.mxu0 %v745_v5 }
 0x440   :  { %3952 = vmatmul.msk.f32.gmra.mxu2 %vm217_vm8, %v472_v6  ;;  %v744_v6 = vld [vmem:[%s6878_s2 + $0x50] sm:$0xff] }
 0x441   :  { %v551_v16 = vpop.permute.xlu0 %550  ;;  %4024 = vmatpush.msrb.mxu2 %v744_v6  ;;  %758 = vmatpush.msra.mxu0 %v744_v6 }
 0x446   :  { %v553_v32 = vpop.permute.xlu1 %552 }
 0x449   :  { %v549_v24 = vpop.permute.xlu0 %548 }
 0x488   :  { %v522_v61 = vpop.f32.mrf.mxu2 }
 0x489   :  { %v558_v25 = vmul.f32 %v522_v61, %v4402_v18  ;;  %v743_v61 = vld [vmem:[%s6878_s2 + $0x48] sm:$0xff] }
 0x48a   :  { %4025 = vmatpush.msrb.mxu2 %v743_v61  ;;  %759 = vmatpush.msra.mxu0 %v743_v61 }
 0x493   :  { %v525_v3 = vpop.f32.mrf.mxu2 }
 0x494   :  { %v559_v29 = vmul.f32 %v525_v3, %v4398_v13 }
 0x49b   :  { %v528_v8 = vpop.f32.mrf.mxu2 }
 0x49c   :  { %v560_v17 = vmul.f32 %v528_v8, %v4372_v62  ;;  %v742_v8 = vld [vmem:[%s6878_s2 + $0x40] sm:$0xff] }
 0x49d   :  { %4026 = vmatpush.msrb.mxu2 %v742_v8  ;;  %760 = vmatpush.msra.mxu0 %v742_v8 }
 0x49e   :  { %v566_v20 = vadd.f32 %v560_v17, %v558_v25 }
 0x49f   :  { %4027 = vmatpush.msrb.mxu2 %v741_v14  ;;  %761 = vmatpush.msra.mxu0 %v741_v14 }
 0x4a3   :  { %v531_v30 = vpop.f32.mrf.mxu2 }
 0x4a4   :  { %v561_v27 = vmul.f32 %v531_v30, %v4368_v59 }
 0x4a6   :  { %v567_v33 = vadd.f32 %v561_v27, %v559_v29 }
 0x4ab   :  { %v534_v15 = vpop.f32.mrf.mxu2 }
 0x4ac   :  { %v562_v19 = vmul.f32 %v547_v26, %v534_v15  ;;  %v740_v15 = vld [vmem:[%s6878_s2 + $0x30] sm:$0xff] }
 0x4ad   :  { %4028 = vmatpush.msrb.mxu2 %v740_v15  ;;  %762 = vmatpush.msra.mxu0 %v740_v15 }
 0x4ae   :  { %v568_v22 = vadd.f32 %v566_v20, %v562_v19  ;;  %v652_v20 = vperm.slane %v4356_v40, 2 }
 0x4b3   :  { %v537_v36 = vpop.f32.mrf.mxu2 }
 0x4b4   :  { %v563_v31 = vmul.f32 %v549_v24, %v537_v36  ;;  %v655_v24 = vperm.slane %v4356_v40, 3  ;;  %v739_v40 = vld [vmem:[%s6878_s2 + $0x28] sm:$0xff] }
 0x4b5   :  { %4029 = vmatpush.msrb.mxu2 %v739_v40  ;;  %763 = vmatpush.msra.mxu0 %v739_v40 }
 0x4b6   :  { %v569_v62 = vadd.f32 %v567_v33, %v563_v31 }
 0x4bb   :  { %v540_v21 = vpop.f32.mrf.mxu2 }
 0x4bc   :  { %v564_v23 = vmul.f32 %v551_v16, %v540_v21 }
 0x4be   :  { %v570_v28 = vadd.f32 %v568_v22, %v564_v23 }
 0x4c0   :  { %3953 = vmatmul.msk.f32.vlgmr.msra.gmra.mxu3 %vm6999_vm0, %v570_v28 }
 0x4c3   :  { %v543_v34 = vpop.f32.mrf.mxu2 }
 0x4c4   :  { %v565_v37 = vmul.f32 %v553_v32, %v543_v34 }
 0x4c6   :  { %v571_v18 = vadd.f32 %v569_v62, %v565_v37 }
 0x4c8   :  { %3954 = vmatmul.msk.f32.gmra.mxu3 %vm6999_vm0, %v571_v18  ;;  %v738_v18 = vld [vmem:[%s6878_s2 + $0x20] sm:$0xff] }
 0x4c9   :  { %4030 = vmatpush.msrb.mxu2 %v738_v18  ;;  %764 = vmatpush.msra.mxu0 %v738_v18 }
 0x543   :  { %v600_v42 = vpop.f32.mrf.mxu3 }
 0x544   :  { %v601_v45 = vadd.f32 %v600_v42, %v576_v41  ;;  %v736_v42 = vld [vmem:[%s6878_s2 + $0x10] sm:$0xff] }
 0x546   :  { %v4527_v59 = vadd.f32 %v601_v45, %v4297_v0  ;;  %v735_v45 = vld [vmem:[%s6878_s2 + $0x8] sm:$0xff] }
 0x548   :  { %v608_v13 = vsel %vm6999_vm0, %v4527_v59, 0.0 }
 0x549   :  { %609 = vadd.xlane.f32.xlu0 %v608_v13  ;;  %v4617_v13 = vld [vmem:[#allocation2 + $0x10] sm:$0xff] }
 0x54a   :  { %v778_v61 = vperm.slane %v4617_v13, 1 }
 0x54b   :  { %v603_v9 = vpop.f32.mrf.mxu3 }
 0x54c   :  { %v604_v46 = vadd.f32 %v603_v9, %v576_v41  ;;  %v737_v41 = vld [vmem:[%s6878_s2 + $0x18] sm:$0xff]  ;;  %v734_v9 = vld [vmem:[%s6878_s2] sm:$0xff] }
 0x54d   :  { %4031 = vmatpush.msrb.mxu2 %v737_v41  ;;  %765 = vmatpush.msra.mxu0 %v737_v41 }
 0x54e   :  { %v4532_v47 = vadd.f32 %v604_v46, %v4304_v2  ;;  %v666_v46 = vperm.slane %v4617_v13, 0 }
 0x54f   :  { %4032 = vmatpush.msrb.mxu2 %v736_v42  ;;  %766 = vmatpush.msra.mxu0 %v736_v42 }
 0x550   :  { %v611_v48 = vsel %vm6999_vm0, %v4532_v47, 0.0 }
 0x551   :  { %612 = vadd.xlane.f32.xlu1 %v611_v48  ;;  %767 = vmatpush.msra.mxu0 %v735_v45 }
 0x552   :  { %4033 = vmatpush.msrb.mxu2 %v735_v45 }
 0x553   :  { %768 = vmatpush.msra.mxu0 %v734_v9 }
 0x554   :  { %4034 = vmatpush.msrb.mxu2 %v734_v9 }
 0x5bc   :  { %v610_v35 = vpop.xlane.xlu0 %609 }
 0x5bd   :  { %v614_v49 = vmul.f32 %v610_v35, %v4308_v10 }
 0x5bf   :  { %v4538_v38 = vsub.f32 %v4527_v59, %v614_v49 }
 0x5c1   :  { %v618_v0 = vmul.f32 %v4538_v38, %v4538_v38 }
 0x5c3   :  { %v620_v50 = vsel %vm6999_vm0, %v618_v0, 0.0 }
 0x5c4   :  { %621 = vadd.xlane.f32.xlu2 %v620_v50  ;;  %v613_v39 = vpop.xlane.xlu1 %612 }
 0x5c5   :  { %v615_v2 = vmul.f32 %v613_v39, %v4308_v10 }
 0x5c7   :  { %v4545_v44 = vsub.f32 %v4532_v47, %v615_v2 }
 0x5c9   :  { %v619_v51 = vmul.f32 %v4545_v44, %v4545_v44 }
 0x5cb   :  { %v623_v43 = vsel %vm6999_vm0, %v619_v51, 0.0 }
 0x5cc   :  { %624 = vadd.xlane.f32.xlu2 %v623_v43  ;;  %v4623_v43 = vld [vmem:[#allocation2 + $0x18] sm:$0xff] }
 0x5cd   :  { %v667_v53 = vperm.slane %v4623_v43, 0 }
 0x637   :  { %v622_v63 = vpop.xlane.xlu2 %621 }
 0x638   :  { %v626_v1 = vmul.f32 %v622_v63, %v4308_v10 }
 0x63a   :  { %v628_v4 = vadd.f32 1e-05, %v626_v1 }
 0x63c   :  { %4101 = vrsqrt.f32 %v628_v4  ;;  %vm636_vm10 = vweird.f32 %v628_v4 }
 0x63f   :  { %v625_v3 = vpop.xlane.xlu2 %624 }
 0x640   :  { %v627_v7 = vmul.f32 %v625_v3, %v4308_v10 }
 0x642   :  { %v4102_v11 = vpop.eup %4101  ;;  %v629_v12 = vadd.f32 1e-05, %v627_v7 }
 0x643   :  { %v631_v30 = vmul.f32 %v4102_v11, %v628_v4  ;;  %vm637_vm9 = vweird.f32 %v4102_v11 }
 0x644   :  { %4103 = vrsqrt.f32 %v629_v12  ;;  %vm638_vm11 = vmor %vm636_vm10, %vm637_vm9  ;;  %vm646_vm13 = vweird.f32 %v629_v12 }
 0x645   :  { %v632_v16 = vmul.f32 %v4102_v11, %v631_v30 }
 0x647   :  { %v633_v36 = vmul.f32 0.5, %v632_v16 }
 0x649   :  { %v634_v26 = vsub.f32 1.5, %v633_v36 }
 0x64a   :  { %v4104_v17 = vpop.eup %4103 }
 0x64b   :  { %v635_v25 = vmul.f32 %v4102_v11, %v634_v26  ;;  %v641_v19 = vmul.f32 %v4104_v17, %v629_v12  ;;  %vm647_vm12 = vweird.f32 %v4104_v17 }
 0x64c   :  { %vm648_vm14 = vmor %vm646_vm13, %vm647_vm12 }
 0x64d   :  { %v639_v21 = vsel %vm638_vm11, %v4102_v11, %v635_v25  ;;  %v642_v22 = vmul.f32 %v4104_v17, %v641_v19 }
 0x64e   :  { %v650_v23 = vmul.f32 %v639_v21, %v4538_v38 }
 0x64f   :  { %v643_v27 = vmul.f32 0.5, %v642_v22  ;;  %v837_v22 = vld [vmem:[%s6877_s1 + $0xc0] sm:$0xff] }
 0x650   :  { %v653_v28 = vmul.f32 %v652_v20, %v650_v23  ;;  %859 = vmatpush.msra.mxu3 %v837_v22  ;;  %v835_v23 = vld [vmem:[%s6877_s1 + $0x88] sm:$0xff] }
 0x651   :  { %v644_v29 = vsub.f32 1.5, %v643_v27  ;;  %v831_v27 = vld [vmem:[%s6877_s1 + $0x18] sm:$0xff] }
 0x652   :  { %v656_v31 = vadd.f32 %v655_v24, %v653_v28  ;;  %860 = vmatpush.msra.mxu3 %v835_v23 }
 0x653   :  { %v645_v32 = vmul.f32 %v4104_v17, %v644_v29 }
 0x654   :  { %3955 = vmatmul.msk.f32.vlgmr.msrb.gmra.mxu0 %vm6999_vm0, %v656_v31  ;;  %3957 = vmatmul.msk.f32.vlgmr.msrb.gmra.mxu3 %vm6999_vm0, %v656_v31 }
 0x655   :  { %v649_v33 = vsel %vm648_vm14, %v4104_v17, %v645_v32  ;;  %v838_v32 = vld [vmem:[%s6877_s1 + $0xc8] sm:$0xff] }
 0x656   :  { %v651_v34 = vmul.f32 %v649_v33, %v4545_v44  ;;  %v836_v33 = vld [vmem:[%s6877_s1 + $0x90] sm:$0xff] }
 0x658   :  { %v654_v62 = vmul.f32 %v652_v20, %v651_v34 }
 0x65a   :  { %v657_v37 = vadd.f32 %v655_v24, %v654_v62  ;;  %v833_v24 = vld [vmem:[%s6877_s1 + $0x50] sm:$0xff]  ;;  %v834_v62 = vld [vmem:[%s6877_s1 + $0x58] sm:$0xff] }
 0x65b   :  { %861 = vmatpush.msra.mxu3 %v833_v24 }
 0x65c   :  { %3956 = vmatmul.msk.f32.gmra.mxu0 %vm6999_vm0, %v657_v37  ;;  %3958 = vmatmul.msk.f32.gmra.mxu3 %vm6999_vm0, %v657_v37  ;;  %v832_v37 = vld [vmem:[%s6877_s1 + $0x20] sm:$0xff] }
 0x65d   :  { %862 = vmatpush.msra.mxu3 %v831_v27 }
 0x65f   :  { %882 = vmatpush.msrb.mxu3 %v838_v32 }
 0x661   :  { %883 = vmatpush.msrb.mxu3 %v836_v33 }
 0x663   :  { %884 = vmatpush.msrb.mxu3 %v834_v62 }
 0x665   :  { %885 = vmatpush.msrb.mxu3 %v832_v37 }
 0x6d1   :  { %v691_v48 = vpop.f32.mrf.mxu0 }
 0x6d2   :  { %v692_v35 = vadd.f32 %v691_v48, %v666_v46 }
 0x6d4   :  { %v720_v49 = vsub.f32 0.0, %v692_v35 }
 0x6d6   :  { %v722_v38 = vmul.f32 1.442695, %v720_v49 }
 0x6d7   :  { %v714_v52 = vpop.f32.mrf.mxu3 }
 0x6d8   :  { %4105 = vpow2.f32 %v722_v38  ;;  %v715_v58 = vadd.f32 %v714_v52, %v667_v53 }
 0x6d9   :  { %v694_v0 = vpop.f32.mrf.mxu0 }
 0x6da   :  { %v695_v50 = vadd.f32 %v694_v0, %v666_v46 }
 0x6dc   :  { %v721_v39 = vsub.f32 0.0, %v695_v50 }
 0x6de   :  { %v4106_v2 = vpop.eup %4105  ;;  %v724_v44 = vmul.f32 1.442695, %v721_v39 }
 0x6df   :  { %v726_v51 = vadd.f32 1.0, %v4106_v2  ;;  %v717_v63 = vpop.f32.mrf.mxu3 }
 0x6e0   :  { %4107 = vpow2.f32 %v724_v44  ;;  %v718_v5 = vadd.f32 %v717_v63, %v667_v53  ;;  %v839_v63 = vperm.slane %v4617_v13, 2 }
 0x6e1   :  { %4109 = vrcp.f32 %v726_v51 }
 0x6e6   :  { %v4108_v54 = vpop.eup %4107 }
 0x6e7   :  { %v4110_v55 = vpop.eup %4109  ;;  %v727_v56 = vadd.f32 1.0, %v4108_v54 }
 0x6e8   :  { %v730_v57 = vmul.f32 %v4110_v55, %v692_v35  ;;  %v4145_v35 = vld [vmem:[#allocation2] sm:$0xff] }
 0x6e9   :  { %4111 = vrcp.f32 %v727_v56  ;;  %v825_v49 = vperm.slane %v4145_v35, 4 }
 0x6ea   :  { %v732_v60 = vmul.f32 %v730_v57, %v715_v58 }
 0x6ec   :  { %3959 = vmatmul.msk.f32.vlgmr.msra.gmra.mxu0 %vm746_vm15, %v732_v60 }
 0x6ef   :  { %v4112_v1 = vpop.eup %4111 }
 0x6f0   :  { %v731_v4 = vmul.f32 %v4112_v1, %v695_v50  ;;  %v828_v50 = vperm.slane %v4145_v35, 5 }
 0x6f2   :  { %v733_v6 = vmul.f32 %v731_v4, %v718_v5  ;;  %v840_v5 = vperm.slane %v4623_v43, 2 }
 0x6f4   :  { %3960 = vmatmul.msk.f32.vlgmr.msrb.gmra.mxu2 %vm746_vm15, %v733_v6 }
 0x769   :  { %v770_v3 = vpop.f32.mrf.mxu0 }
 0x76a   :  { %v776_v7 = vadd.f32 %v770_v3, %v4527_v59 }
 0x76c   :  { %v4628_v8 = vadd.f32 %v778_v61, %v776_v7 }
 0x76e   :  { %7028 = vst [vmem:[#allocation11_spill] sm:$0xff] %v4628_v8  ;;  %v781_v11 = vsel %vm6999_vm0, %v4628_v8, 0.0 }
 0x76f   :  { %782 = vadd.xlane.f32.xlu2 %v781_v11  ;;  %v4061_v11 = vld [vmem:[%s6881_s5 + $0x60] ss:$0 sm:$0xff] }
 0x777   :  { %v773_v12 = vpop.f32.mrf.mxu2 }
 0x778   :  { %v777_v14 = vadd.f32 %v773_v12, %v4532_v47  ;;  %v4062_v12 = vld [vmem:[%s6881_s5 + $0x68] ss:$0 sm:$0xff] }
 0x77a   :  { %v4633_v30 = vadd.f32 %v778_v61, %v777_v14 }
 0x77c   :  { %7029 = vst [vmem:[#allocation12_spill] sm:$0xff] %v4633_v30  ;;  %v784_v15 = vsel %vm6999_vm0, %v4633_v30, 0.0 }
 0x77d   :  { %785 = vadd.xlane.f32.xlu2 %v784_v15 }
 0x7e2   :  { %v783_v16 = vpop.xlane.xlu2 %782 }
 0x7e3   :  { %v787_v36 = vmul.f32 %v783_v16, %v4308_v10  ;;  %v3878_v16 = vld [vmem:[%s6877_s1 + $0xd8] sm:$0xff] }
 0x7e4   :  { %3898 = vmatpush.msrb.mxu0 %v3878_v16 }
 0x7e5   :  { %v789_v59 = vsub.f32 %v4628_v8, %v787_v36  ;;  %v3877_v36 = vld [vmem:[%s6877_s1 + $0xa0] sm:$0xff] }
 0x7e6   :  { %3899 = vmatpush.msrb.mxu0 %v3877_v36 }
 0x7e7   :  { %v791_v26 = vmul.f32 %v789_v59, %v789_v59 }
 0x7e9   :  { %v793_v17 = vsel %vm6999_vm0, %v791_v26, 0.0 }
 0x7ea   :  { %794 = vadd.xlane.f32.xlu2 %v793_v17 }
 0x7f0   :  { %v786_v25 = vpop.xlane.xlu2 %785 }
 0x7f1   :  { %v788_v19 = vmul.f32 %v786_v25, %v4308_v10 }
 0x7f3   :  { %v790_v47 = vsub.f32 %v4633_v30, %v788_v19 }
 0x7f5   :  { %v792_v20 = vmul.f32 %v790_v47, %v790_v47 }
 0x7f7   :  { %v796_v21 = vsel %vm6999_vm0, %v792_v20, 0.0 }
 0x7f8   :  { %797 = vadd.xlane.f32.xlu0 %v796_v21 }
 0x85d   :  { %v795_v28 = vpop.xlane.xlu2 %794 }
 0x85e   :  { %v799_v29 = vmul.f32 %v795_v28, %v4308_v10 }
 0x860   :  { %v801_v31 = vadd.f32 1e-05, %v799_v29 }
 0x862   :  { %4113 = vrsqrt.f32 %v801_v31  ;;  %vm809_vm2 = vweird.f32 %v801_v31 }
 0x868   :  { %v4114_v34 = vpop.eup %4113 }
 0x869   :  { %v804_v40 = vmul.f32 %v4114_v34, %v801_v31  ;;  %vm810_vm1 = vweird.f32 %v4114_v34  ;;  %v4712_v31 = vld [vmem:[%s6881_s5 + $0x8] sm:$0xff] }
 0x86a   :  { %vm811_vm3 = vmor %vm809_vm2, %vm810_vm1 }
 0x86b   :  { %v805_v18 = vmul.f32 %v4114_v34, %v804_v40  ;;  %v798_v41 = vpop.xlane.xlu0 %797 }
 0x86c   :  { %v800_v42 = vmul.f32 %v798_v41, %v4308_v10 }
 0x86d   :  { %v806_v45 = vmul.f32 0.5, %v805_v18 }
 0x86e   :  { %v802_v9 = vadd.f32 1e-05, %v800_v42 }
 0x86f   :  { %v807_v46 = vsub.f32 1.5, %v806_v45 }
 0x870   :  { %4115 = vrsqrt.f32 %v802_v9  ;;  %vm819_vm5 = vweird.f32 %v802_v9 }
 0x871   :  { %v808_v48 = vmul.f32 %v4114_v34, %v807_v46 }
 0x873   :  { %v812_v38 = vsel %vm811_vm3, %v4114_v34, %v808_v48 }
 0x874   :  { %v823_v0 = vmul.f32 %v812_v38, %v789_v59 }
 0x876   :  { %v4116_v39 = vpop.eup %4115  ;;  %v826_v2 = vmul.f32 %v825_v49, %v823_v0 }
 0x877   :  { %v814_v44 = vmul.f32 %v4116_v39, %v802_v9  ;;  %vm820_vm4 = vweird.f32 %v4116_v39 }
 0x878   :  { %v829_v51 = vadd.f32 %v828_v50, %v826_v2  ;;  %vm821_vm6 = vmor %vm819_vm5, %vm820_vm4  ;;  %v6896_v2 = vmov 2475754826  }
 0x879   :  { %v815_v52 = vmul.f32 %v4116_v39, %v814_v44 }
 0x87a   :  { %3961 = vmatmul.msk.f32.vlgmr.msra.gmra.mxu3 %vm6999_vm0, %v829_v51 }
 0x87b   :  { %v816_v10 = vmul.f32 0.5, %v815_v52 }
 0x87d   :  { %v817_v53 = vsub.f32 1.5, %v816_v10  ;;  %v6892_v10 = vmov 2131351028  }
 0x87f   :  { %v818_v54 = vmul.f32 %v4116_v39, %v817_v53 }
 0x881   :  { %v822_v55 = vsel %vm821_vm6, %v4116_v39, %v818_v54 }
 0x882   :  { %v824_v56 = vmul.f32 %v822_v55, %v790_v47  ;;  %v6890_v55 = vmov 2102212464  }
 0x884   :  { %v827_v57 = vmul.f32 %v825_v49, %v824_v56 }
 0x886   :  { %v830_v58 = vadd.f32 %v828_v50, %v827_v57  ;;  %v6888_v50 = vmov 683565275  }
 0x888   :  { %3962 = vmatmul.msk.f32.gmra.mxu3 %vm6999_vm0, %v830_v58 }
 0x890   :  { %3963 = vmatmul.msk.f32.vlgmr.msrb.gmra.mxu3 %vm6999_vm0, %v829_v51 }
 0x898   :  { %3964 = vmatmul.msk.f32.gmra.mxu3 %vm6999_vm0, %v830_v58  ;;  %v6894_v58 = vmov 920167782  }
 0x8fd   :  { %v4673_v60 = vpop.f32.mrf.mxu3 }
 0x90b   :  { %v867_v1 = vpop.f32.mrf.mxu3 }
 0x90c   :  { %v4678_v4 = vadd.f32 %v867_v1, %v839_v63 }
 0x90e   :  { %7030 = vst [vmem:[#allocation13_spill] sm:$0xff] %v4678_v4 }
 0x913   :  { %v887_v6 = vpop.f32.mrf.mxu3 }
 0x914   :  { %v4681_v61 = vadd.f32 %v887_v6, %v840_v5  ;;  %v6886_v6 = vmov 1326507024  }
 0x916   :  { %7031 = vst [vmem:[#allocation14_spill] sm:$0xff] %v4681_v61 }
 0x91b   :  { %v890_v3 = vpop.f32.mrf.mxu3 }
 0x91c   :  { %v4683_v7 = vadd.f32 %v890_v3, %v840_v5 }
 0x91e   :  { %7032 = vst [vmem:[#allocation15_spill] sm:$0xff] %v4683_v7  ;;  %906 = vrot.lane.b32.xlu1 %v4683_v7, %s4240_s15 }
 0x990   :  { %v907_v14 = vpop.permute.xlu1 %906 }
 0x991   :  { %v4694_v43 = vsel %vm6999_vm0, %v4681_v61, %v907_v14 }
 0x992   :  { %v912_v15 = vmul.f32 %v4061_v11, %v4694_v43 }
 0x994   :  { %v915_v59 = vadd.f32 %v4062_v12, %v912_v15 }
 0x996   :  { %v917_v26 = vand.u32 2147483647, %v915_v59  ;;  %v916_v21 = vmax.f32 %v915_v59, 0.0 }
 0x998   :  { %v918_v17 = vsub.f32 0.0, %v917_v26 }
 0x99a   :  { %v919_v25 = vmul.f32 1.442695, %v918_v17 }
 0x99c   :  { %4117 = vpow2.f32 %v919_v25 }
 0x9a2   :  { %v4118_v19 = vpop.eup %4117 }
 0x9a3   :  { %v921_v47 = vadd.f32 1.0, %v4118_v19 }
 0x9a5   :  { %4119 = vlog2.f32 %v921_v47 }
 0x9ab   :  { %v4120_v20 = vpop.eup %4119 }
 0x9ac   :  { %v923_v22 = vmul.f32 0.6931472, %v4120_v20 }
 0x9ae   :  { %v924_v23 = vadd.f32 %v923_v22, %v916_v21 }
 0x9b0   :  { %v925_v24 = vmax.f32 %v924_v23, 0.0001 }
 0x9b2   :  { %v4703_v27 = vmin.f32 %v925_v24, 1.0 }
 0x9b4   :  { %v928_v28 = vrot.slane %v4703_v27, 1  ;;  %v4707_v29 = vperm.slane %v4703_v27, 0 }
 0x9b6   :  { %7033 = vst [vmem:[#allocation16_spill] sm:$0xff] %v4707_v29  ;;  %v4714_v32 = vperm.slane %v928_v28, 0  ;;  %v4718_v33 = vmul.f32 %v4712_v31, %v4707_v29 }
 0x9b8   :  { %7034 = vst [vmem:[#allocation17_spill] sm:$0xff] %v4714_v32  ;;  %v4722_v34 = vmul.f32 %v4712_v31, %v4714_v32  ;;  %v996_v62 = vand.u32 2139095040, %v4718_v33  ;;  %v6885_v18 = vand.u32 2147483647, %v4718_v33 }
 0x9b9   :  { %7035 = vst [vmem:[#allocation18_spill] sm:$0xff] %v4718_v33 }
 0x9ba   :  { %7036 = vst [vmem:[#allocation19_spill] sm:$0xff] %v4722_v34  ;;  %v997_v37 = vshrl.u32 %v996_v62, 23  ;;  %v1150_v40 = vand.u32 2139095040, %v4722_v34  ;;  %v1000_v9 = vand.u32 8388607, %v6885_v18 }
 0x9bc   :  { %v3965_v41 = vadd.s32 4294967169, %v997_v37  ;;  %v1151_v42 = vshrl.u32 %v1150_v40, 23  ;;  %v1001_v49 = vor.u32 8388608, %v1000_v9 }
 0x9be   :  { %v1003_v45 = vadd.s32 1, %v3965_v41  ;;  %v3968_v48 = vadd.s32 4294967169, %v1151_v42  ;;  %v4754_v15 = vshll.u32 %v1001_v49, 8  ;;  %v929_v49 = vrot.slane %v4703_v27, 2 }
 0x9c0   :  { %vm1004_vm7 = vcmp.gt.s32.totalorder %v1003_v45, 0  ;;  %v1157_v51 = vadd.s32 1, %v3968_v48  ;;  %v1042_v23 = vand.u32 65535, %v4754_v15  ;;  %v1043_v24 = vshrl.u32 %v4754_v15, 16 }
 0x9c1   :  { %v1005_v46 = vsel %vm1004_vm7, %v1003_v45, 0 }
 0x9c2   :  { %v1007_v35 = vand.u32 31, %v1005_v46  ;;  %v4731_v0 = vshrl.u32 %v1005_v46, 5  ;;  %vm1158_vm9 = vcmp.gt.s32.totalorder %v1157_v51, 0 }
 0x9c3   :  { %v1159_v20 = vsel %vm1158_vm9, %v1157_v51, 0 }
 0x9c4   :  { %v4729_v38 = vsub.s32 32, %v1007_v35  ;;  %v1010_v39 = vshll.u32 %v6888_v50, %v1007_v35  ;;  %v1013_v44 = vshll.u32 %v6896_v2, %v1007_v35  ;;  %v1016_v54 = vshll.u32 %v6892_v10, %v1007_v35 }
 0x9c5   :  { %v1019_v57 = vshll.u32 %v6890_v55, %v1007_v35  ;;  %v1022_v5 = vshll.u32 %v6894_v58, %v1007_v35  ;;  %vm1025_vm8 = vcmp.lt.s32.totalorder %v4731_v0, 1  ;;  %vm1028_vm10 = vcmp.lt.s32.totalorder %v4731_v0, 4 }
 0x9c6   :  { %v1011_v52 = vshrl.u32 %v6896_v2, %v4729_v38  ;;  %v1014_v53 = vshrl.u32 %v6892_v10, %v4729_v38  ;;  %v1017_v56 = vshrl.u32 %v6890_v55, %v4729_v38  ;;  %v1020_v1 = vshrl.u32 %v6894_v58, %v4729_v38 }
 0x9c7   :  { %v1023_v3 = vshrl.u32 %v6886_v6, %v4729_v38  ;;  %vm1027_vm11 = vcmp.lt.s32.totalorder %v4731_v0, 3  ;;  %vm1026_vm12 = vcmp.lt.s32.totalorder %v4731_v0, 2  ;;  %v1161_v41 = vand.u32 31, %v1159_v20 }
 0x9c8   :  { %v4748_v11 = vor.u32 %v1011_v52, %v1010_v39  ;;  %v4750_v12 = vor.u32 %v1014_v53, %v1013_v44  ;;  %v4752_v14 = vor.u32 %v1017_v56, %v1016_v54  ;;  %v1021_v16 = vor.u32 %v1020_v1, %v1019_v57 }
 0x9c9   :  { %v1024_v36 = vor.u32 %v1023_v3, %v1022_v5  ;;  %v4788_v51 = vsub.s32 32, %v1161_v41  ;;  %v6898_v56 = vmov 0  }
 0x9ca   :  { %v1033_v59 = vsel %vm1025_vm8, %v4748_v11, %v4750_v12  ;;  %v1037_v26 = vsel %vm1025_vm8, %v4750_v12, %v4752_v14  ;;  %v1034_v17 = vsel %vm1028_vm10, %v1021_v16, 920167782 }
 0x9cb   :  { %v1038_v25 = vsel %vm1028_vm10, %v1024_v36, 1326507024  ;;  %v1035_v19 = vsel %vm1027_vm11, %v4752_v14, %v1034_v17  ;;  %v4794_v36 = vperm.slane %v929_v49, 0 }
 0x9cc   :  { %v1039_v47 = vsel %vm1027_vm11, %v1021_v16, %v1038_v25  ;;  %v1036_v21 = vsel %vm1026_vm12, %v1033_v59, %v1035_v19  ;;  %v1174_v25 = vshrl.u32 %v6894_v58, %v4788_v51 }
 0x9cd   :  { %v1040_v22 = vsel %vm1026_vm12, %v1037_v26, %v1039_v47  ;;  %v1066_v37 = vand.u32 65535, %v1036_v21  ;;  %v1067_v40 = vshrl.u32 %v1036_v21, 16  ;;  %7037 = vst [vmem:[#allocation20_spill] sm:$0xff] %v4794_v36  ;;  %v6884_v47 = vand.u32 2147483647, %v4722_v34 }
 0x9ce   :  { %v1044_v28 = vand.u32 65535, %v1040_v22  ;;  %v1045_v62 = vshrl.u32 %v1040_v22, 16  ;;  %v1173_v21 = vshll.u32 %v6890_v55, %v1161_v41  ;;  %v1177_v22 = vshrl.u32 %v6886_v6, %v4788_v51 }
 0x9cf   :  { %v1069_v9 = vmul.u32 %v1067_v40, %v1042_v23  ;;  %v4785_v46 = vmul.u32 %v1066_v37, %v1043_v24  ;;  %v1068_v39 = vmul.u32 %v1066_v37, %v1042_v23  ;;  %v1071_v54 = vmul.u32 %v1067_v40, %v1043_v24 }
 0x9d0   :  { %v1047_v42 = vmul.u32 %v1045_v62, %v1042_v23  ;;  %v4783_v45 = vmul.u32 %v1044_v28, %v1043_v24  ;;  %v1046_v48 = vmul.u32 %v1044_v28, %v1042_v23  ;;  %v1049_v3 = vmul.u32 %v1045_v62, %v1043_v24 }
 0x9d1   :  { %v1072_v44 = vshll.u32 %v1069_v9, 16  ;;  %v1074_v1 = vshll.u32 %v4785_v46, 16  ;;  %v4804_v23 = vshrl.u32 %v1159_v20, 5  ;;  %v1165_v24 = vshrl.u32 %v6896_v2, %v4788_v51 }
 0x9d2   :  { %v1050_v35 = vshll.u32 %v1047_v42, 16  ;;  %v1052_v52 = vshll.u32 %v4783_v45, 16  ;;  %v1168_v28 = vshrl.u32 %v6892_v10, %v4788_v51  ;;  %v1171_v62 = vshrl.u32 %v6890_v55, %v4788_v51 }
 0x9d3   :  { %vm1076_vm14 = vc.u32 %v1068_v39, %v1072_v44  ;;  %v1078_v5 = vadd.s32 %v1072_v44, %v1068_v39  ;;  %v4814_v37 = vmul.f32 %v4712_v31, %v4794_v36  ;;  %v1164_v20 = vshll.u32 %v6888_v50, %v1161_v41 }
 0x9d4   :  { %vm1054_vm13 = vc.u32 %v1046_v48, %v1050_v35  ;;  %v1056_v53 = vadd.s32 %v1050_v35, %v1046_v48  ;;  %v1077_v16 = vsel %vm1076_vm14, 1, %v6898_v56  ;;  %v1175_v48 = vor.u32 %v1174_v25, %v1173_v21 }
 0x9d5   :  { %v1055_v57 = vsel %vm1054_vm13, 1, %v6898_v56  ;;  %v1079_v59 = vadd.s32 %v1077_v16, %v1071_v54  ;;  %vm1080_vm1 = vc.u32 %v1078_v5, %v1074_v1  ;;  %7038 = vst [vmem:[#allocation21_spill] sm:$0xff] %v4814_v37  ;;  %v1176_v35 = vshll.u32 %v6894_v58, %v1161_v41 }
 0x9d6   :  { %vm1058_vm15 = vc.u32 %v1056_v53, %v1052_v52  ;;  %v1057_v26 = vadd.s32 %v1055_v57, %v1049_v3  ;;  %v1081_v17 = vsel %vm1080_vm1, 1, %v6898_v56  ;;  %v1167_v39 = vshll.u32 %v6896_v2, %v1161_v41 }
 0x9d7   :  { %v1059_v19 = vsel %vm1058_vm15, 1, %v6898_v56  ;;  %v1083_v40 = vadd.s32 %v1081_v17, %v1079_v59  ;;  %v1170_v44 = vshll.u32 %v6892_v10, %v1161_v41  ;;  %v1051_v52 = vshrl.u32 %v1047_v42, 16 }
 0x9d8   :  { %v1061_v49 = vadd.s32 %v1059_v19, %v1057_v26  ;;  %v1073_v53 = vshrl.u32 %v1069_v9, 16  ;;  %v1154_v54 = vand.u32 8388607, %v6884_v47  ;;  %v1178_v57 = vor.u32 %v1177_v22, %v1176_v35 }
 0x9d9   :  { %v4822_v3 = vor.u32 %v1165_v24, %v1164_v20  ;;  %v4824_v16 = vor.u32 %v1168_v28, %v1167_v39  ;;  %v4826_v59 = vor.u32 %v1171_v62, %v1170_v44  ;;  %vm1182_vm2 = vcmp.lt.s32.totalorder %v4804_v23, 4 }
 0x9da   :  { %v1084_v26 = vadd.s32 %v1083_v40, %v1073_v53  ;;  %v1188_v17 = vsel %vm1182_vm2, %v1175_v48, 920167782  ;;  %v1062_v25 = vadd.s32 %v1061_v49, %v1051_v52  ;;  %v1304_v41 = vand.u32 2139095040, %v4814_v37 }
 0x9db   :  { %v1075_v42 = vshrl.u32 %v4785_v46, 16  ;;  %vm1179_vm3 = vcmp.lt.s32.totalorder %v4804_v23, 1  ;;  %vm1181_vm4 = vcmp.lt.s32.totalorder %v4804_v23, 3  ;;  %v1192_v9 = vsel %vm1182_vm2, %v1178_v57, 1326507024 }
 0x9dc   :  { %v1053_v19 = vshrl.u32 %v4783_v45, 16  ;;  %v1155_v21 = vor.u32 8388608, %v1154_v54  ;;  %v1187_v22 = vsel %vm1179_vm3, %v4822_v3, %v4824_v16  ;;  %v1189_v24 = vsel %vm1181_vm4, %v4826_v59, %v1188_v17 }
 0x9dd   :  { %v1009_v46 = vshrl.u32 %v6888_v50, %v4729_v38  ;;  %v1030_v28 = vsel %vm1028_vm10, %v4752_v14, 2102212464  ;;  %v1085_v62 = vadd.s32 %v1084_v26, %v1075_v42  ;;  %vm1180_vm5 = vcmp.lt.s32.totalorder %v4804_v23, 2 }
 0x9de   :  { %v4850_v40 = vadd.s32 %v1062_v25, %v1053_v19  ;;  %v1191_v45 = vsel %vm1179_vm3, %v4824_v16, %v4826_v59  ;;  %v1193_v35 = vsel %vm1181_vm4, %v1175_v48, %v1192_v9  ;;  %v1190_v38 = vsel %vm1180_vm5, %v1187_v22, %v1189_v24 }
 0x9df   :  { %v1305_v49 = vshrl.u32 %v1304_v41, 23  ;;  %v1029_v14 = vsel %vm1025_vm8, %v1009_v46, %v4748_v11  ;;  %v1031_v20 = vsel %vm1027_vm11, %v4750_v12, %v1030_v28  ;;  %v4867_v39 = vadd.s32 %v1078_v5, %v1074_v1 }
 0x9e0   :  { %v4869_v44 = vshll.u32 %v1155_v21, 8  ;;  %v1089_v52 = vadd.s32 1, %v1085_v62  ;;  %v1194_v48 = vsel %vm1180_vm5, %v1191_v45, %v1193_v35  ;;  %v1221_v53 = vshrl.u32 %v1190_v38, 16 }
 0x9e1   :  { %vm1088_vm6 = vc.u32 %v4850_v40, %v4867_v39  ;;  %v1032_v54 = vsel %vm1026_vm12, %v1029_v14, %v1031_v20  ;;  %v3971_v11 = vadd.s32 4294967169, %v1305_v49  ;;  %v1199_v26 = vshrl.u32 %v1194_v48, 16 }
 0x9e2   :  { %v1196_v57 = vand.u32 65535, %v4869_v44  ;;  %v1090_v12 = vsel %vm1088_vm6, %v1089_v52, %v1085_v62  ;;  %v1086_v1 = vmul.u32 %v4754_v15, %v1032_v54  ;;  %v1220_v42 = vand.u32 65535, %v1190_v38 }
 0x9e3   :  { %v1311_v17 = vadd.s32 1, %v3971_v11  ;;  %v1197_v9 = vshrl.u32 %v4869_v44, 16  ;;  %v1198_v19 = vand.u32 65535, %v1194_v48  ;;  %v4885_v28 = vadd.f32 %v4673_v60, %v839_v63 }
 0x9e4   :  { %v1223_v5 = vmul.u32 %v1221_v53, %v1196_v57  ;;  %v1091_v25 = vadd.s32 %v1090_v12, %v1086_v1  ;;  %v1201_v41 = vmul.u32 %v1199_v26, %v1196_v57  ;;  %v1222_v24 = vmul.u32 %v1220_v42, %v1196_v57 }
 0x9e5   :  { %vm1312_vm7 = vcmp.gt.s32.totalorder %v1311_v17, 0  ;;  %v4880_v46 = vmul.u32 %v1220_v42, %v1197_v9  ;;  %7039 = vst [vmem:[#allocation22_spill] sm:$0xff] %v4885_v28  ;;  %v1200_v15 = vmul.u32 %v1198_v19, %v1196_v57  ;;  %v4887_v62 = vmul.u32 %v1198_v19, %v1197_v9 }
 0x9e6   :  { %v1226_v21 = vshll.u32 %v1223_v5, 16  ;;  %v1092_v22 = vadd.s32 536870912, %v1091_v25  ;;  %v1204_v0 = vshll.u32 %v1201_v41, 16  ;;  %v1313_v35 = vsel %vm1312_vm7, %v1311_v17, 0 }
 0x9e7   :  { %v1228_v14 = vshll.u32 %v4880_v46, 16  ;;  %v893_v20 = vsub.f32 0.0, %v4885_v28  ;;  %v1206_v60 = vshll.u32 %v4887_v62, 16  ;;  %v1225_v63 = vmul.u32 %v1221_v53, %v1197_v9 }
 0x9e8   :  { %vm1230_vm8 = vc.u32 %v1222_v24, %v1226_v21  ;;  %v4889_v45 = vadd.s32 %v1226_v21, %v1222_v24  ;;  %v4891_v38 = vshrl.u32 %v1092_v22, 30  ;;  %vm1208_vm9 = vc.u32 %v1200_v15, %v1204_v0 }
 0x9e9   :  { %v1210_v49 = vadd.s32 %v1204_v0, %v1200_v15  ;;  %v1231_v13 = vsel %vm1230_vm8, 1, %v6898_v56  ;;  %v1315_v52 = vand.u32 31, %v1313_v35  ;;  %v1209_v48 = vsel %vm1208_vm9, 1, %v6898_v56 }
 0x9ea   :  { %vm1234_vm10 = vc.u32 %v4889_v45, %v1228_v14  ;;  %v1094_v54 = vshll.u32 %v4891_v38, 30  ;;  %v1203_v11 = vmul.u32 %v1199_v26, %v1197_v9  ;;  %v1233_v57 = vadd.s32 %v1231_v13, %v1225_v63 }
 0x9eb   :  { %vm1212_vm11 = vc.u32 %v1210_v49, %v1206_v60  ;;  %v895_v12 = vmul.f32 1.442695, %v893_v20  ;;  %v1235_v1 = vsel %vm1234_vm10, 1, %v6898_v56  ;;  %v4903_v42 = vsub.s32 32, %v1315_v52 }
 0x9ec   :  { %v1211_v17 = vadd.s32 %v1209_v48, %v1203_v11  ;;  %v1213_v53 = vsel %vm1212_vm11, 1, %v6898_v56  ;;  %v6883_v19 = vand.u32 2147483647, %v4814_v37  ;;  %v4907_v21 = vsub.s32 %v1091_v25, %v1094_v54 }
 0x9ed   :  { %v1237_v22 = vadd.s32 %v1235_v1, %v1233_v57  ;;  %4121 = vpow2.f32 %v895_v12  ;;  %v936_v0 = vrot.slane %v4694_v43, 1  ;;  %v937_v26 = vrot.slane %v4694_v43, 2 }
 0x9ee   :  { %v938_v9 = vrot.slane %v4694_v43, 3  ;;  %v930_v24 = vrot.slane %v4703_v27, 3  ;;  %v1215_v15 = vadd.s32 %v1213_v53, %v1211_v17  ;;  %v1227_v49 = vshrl.u32 %v1223_v5, 16 }
 0x9ef   :  { %v1328_v20 = vshrl.u32 %v6894_v58, %v4903_v42  ;;  %v1163_v13 = vshrl.u32 %v6888_v50, %v4788_v51  ;;  %v1205_v25 = vshrl.u32 %v1201_v41, 16  ;;  %v1308_v60 = vand.u32 8388607, %v6883_v19 }
 0x9f0   :  { %v4919_v63 = vshrl.u32 %v1313_v35, 5  ;;  %v1097_v48 = vsub.s32 0, %v4907_v21  ;;  %v1238_v54 = vadd.s32 %v1237_v22, %v1227_v49  ;;  %v1319_v11 = vshrl.u32 %v6896_v2, %v4903_v42 }
 0x9f1   :  { %v1327_v5 = vshll.u32 %v6890_v55, %v1315_v52  ;;  %vm1096_vm12 = vcmp.lt.s32.totalorder %v4907_v21, 0  ;;  %v1322_v57 = vshrl.u32 %v6892_v10, %v4903_v42  ;;  %v1325_v51 = vshrl.u32 %v6890_v55, %v4903_v42 }
 0x9f2   :  { %v1331_v41 = vshrl.u32 %v6886_v6, %v4903_v42  ;;  %v1216_v35 = vadd.s32 %v1215_v15, %v1205_v25  ;;  %v1229_v12 = vshrl.u32 %v4880_v46, 16  ;;  %v1318_v1 = vshll.u32 %v6888_v50, %v1315_v52 }
 0x9f3   :  { %v1329_v17 = vor.u32 %v1328_v20, %v1327_v5  ;;  %v4934_v53 = vpop.eup %4121  ;;  %v1184_v22 = vsel %vm1182_vm2, %v4826_v59, 2102212464  ;;  %v1321_v49 = vshll.u32 %v6896_v2, %v1315_v52  ;;  %v1324_v19 = vshll.u32 %v6892_v10, %v1315_v52 }
 0x9f4   :  { %7040 = vst [vmem:[#allocation23_spill] sm:$0xff] %v4934_v53  ;;  %v1330_v47 = vshll.u32 %v6894_v58, %v1315_v52  ;;  %v1098_v18 = vsel %vm1096_vm12, %v1097_v48, %v4907_v21  ;;  %v1207_v15 = vshrl.u32 %v4887_v62, 16  ;;  %v1239_v25 = vadd.s32 %v1238_v54, %v1229_v12 }
 0x9f5   :  { %v4944_v6 = vor.u32 %v1319_v11, %v1318_v1  ;;  %v4946_v20 = vor.u32 %v1322_v57, %v1321_v49  ;;  %v4948_v5 = vor.u32 %v1325_v51, %v1324_v19  ;;  %vm1336_vm13 = vcmp.lt.s32.totalorder %v4919_v63, 4 }
 0x9f6   :  { %v1332_v50 = vor.u32 %v1331_v41, %v1330_v47  ;;  %v939_v59 = vrot.slane %v4694_v43, 4  ;;  %v940_v55 = vrot.slane %v4694_v43, 5  ;;  %v4953_v10 = vadd.s32 %v1216_v35, %v1207_v15 }
 0x9f7   :  { %v1342_v52 = vsel %vm1336_vm13, %v1329_v17, 920167782  ;;  %v4957_v62 = vperm.slane %v930_v24, 0  ;;  %v1183_v48 = vsel %vm1179_vm3, %v1163_v13, %v4822_v3  ;;  %v1185_v47 = vsel %vm1181_vm4, %v4824_v16, %v1184_v22 }
 0x9f8   :  { %v1309_v19 = vor.u32 8388608, %v1308_v60  ;;  %v1099_v54 = vclz %v1098_v18  ;;  %v4968_v11 = vadd.s32 %v4889_v45, %v1228_v14  ;;  %vm1333_vm14 = vcmp.lt.s32.totalorder %v4919_v63, 1 }
 0x9f9   :  { %7041 = vst [vmem:[#allocation24_spill] sm:$0xff] %v4957_v62  ;;  %vm1335_vm15 = vcmp.lt.s32.totalorder %v4919_v63, 3  ;;  %v1243_v24 = vadd.s32 1, %v1239_v25  ;;  %v1341_v3 = vsel %vm1333_vm14, %v4944_v6, %v4946_v20  ;;  %v1346_v18 = vsel %vm1336_vm13, %v1332_v50, 1326507024  ;;  %v3555_v50 = vld [vmem:[%s6881_s5 + $0x20] sm:$0xff] }
 0x9fa   :  { %v1343_v16 = vsel %vm1335_vm15, %v4948_v5, %v1342_v52  ;;  %v941_v46 = vrot.slane %v4694_v43, 6  ;;  %v942_v45 = vrot.slane %v4694_v43, 7  ;;  %v4984_v14 = vperm.slane %v4694_v43, 0  ;;  %v3589_v43 = vld [vmem:[%s6881_s5 + $0x30] sm:$0xff] }
 0x9fb   :  { %vm1242_vm1 = vc.u32 %v4953_v10, %v4968_v11  ;;  %v4988_v13 = vperm.slane %v936_v0, 0  ;;  %v4990_v60 = vperm.slane %v937_v26, 0  ;;  %v1186_v57 = vsel %vm1180_vm5, %v1183_v48, %v1185_v47 }
 0x9fc   :  { %7042 = vst [vmem:[#allocation25_spill] sm:$0xff] %v4984_v14  ;;  %vm1334_vm2 = vcmp.lt.s32.totalorder %v4919_v63, 2  ;;  %v3966_v51 = vadd.s32 4294967294, %v1099_v54  ;;  %v1345_v0 = vsel %vm1333_vm14, %v4946_v20, %v4948_v5  ;;  %v1347_v23 = vsel %vm1335_vm15, %v1329_v17, %v1346_v18 }
 0x9fd   :  { %7043 = vst [vmem:[#allocation26_spill] sm:$0xff] %v4988_v13  ;;  %v5000_v41 = vsel %vm1334_vm2, %v1341_v3, %v1343_v16  ;;  %v5010_v26 = vperm.slane %v938_v9, 0  ;;  %v5014_v35 = vmul.f32 %v4712_v31, %v4957_v62  ;;  %v1244_v12 = vsel %vm1242_vm1, %v1243_v24, %v1239_v25 }
 0x9fe   :  { %7044 = vst [vmem:[#allocation27_spill] sm:$0xff] %v4990_v60  ;;  %v5016_v1 = vshll.u32 %v1309_v19, 8  ;;  %v5018_v22 = vperm.slane %v939_v59, 0  ;;  %v5020_v49 = vperm.slane %v940_v55, 0  ;;  %v5022_v15 = vperm.slane %v941_v46, 0 }
 0x9ff   :  { %7045 = vst [vmem:[#allocation28_spill] sm:$0xff] %v5010_v26  ;;  %v1240_v52 = vmul.u32 %v4869_v44, %v1186_v57  ;;  %v5028_v9 = vperm.slane %v942_v45, 0  ;;  %v5031_v17 = vmul.f32 %v4984_v14, %v3555_v50  ;;  %v5035_v25 = vsel %vm1334_vm2, %v1345_v0, %v1347_v23 }
 0xa00   :  { %7046 = vst [vmem:[#allocation29_spill] sm:$0xff] %v5014_v35  ;;  %v6901_v55 = vshrl.u32 %v5000_v41, 16  ;;  %v931_v59 = vrot.slane %v4703_v27, 4  ;;  %v932_v48 = vrot.slane %v4703_v27, 5  ;;  %vm3967_vm3 = vcmp.lt.s32.totalorder %v3966_v51, 0 }
 0xa01   :  { %7047 = vst [vmem:[#allocation30_spill] sm:$0xff] %v5018_v22  ;;  %v5040_v44 = vadd.s32 %v1244_v12, %v1240_v52  ;;  %v933_v47 = vrot.slane %v4703_v27, 6  ;;  %v934_v19 = vrot.slane %v4703_v27, 7  ;;  %v1350_v54 = vand.u32 65535, %v5016_v1  ;;  %v943_v27 = vld [vmem:[%s6881_s5] sm:$0xff] }
 0xa02   :  { %7048 = vst [vmem:[#allocation31_spill] sm:$0xff] %v5020_v49  ;;  %v1458_v24 = vand.u32 2139095040, %v5014_v35  ;;  %v5047_v3 = vmul.f32 %v4988_v13, %v3555_v50  ;;  %v5050_v16 = vmul.f32 %v4990_v60, %v3555_v50  ;;  %v5053_v18 = vmul.f32 %v3589_v43, %v4984_v14 }
 0xa03   :  { %7049 = vst [vmem:[#allocation32_spill] sm:$0xff] %v5022_v15  ;;  %v1353_v46 = vshrl.u32 %v5035_v25, 16  ;;  %v5057_v45 = vmul.f32 %v3589_v43, %v4988_v13  ;;  %v1102_v57 = vsel %vm3967_vm3, 0, %v3966_v51  ;;  %v5064_v0 = vmul.u32 %v6901_v55, %v1350_v54 }
 0xa04   :  { %7050 = vst [vmem:[#allocation33_spill] sm:$0xff] %v5028_v9  ;;  %v1459_v23 = vshrl.u32 %v1458_v24, 23  ;;  %v5067_v50 = vmul.f32 %v3589_v43, %v4990_v60  ;;  %v5069_v12 = vperm.slane %v931_v59, 0  ;;  %v5071_v52 = vperm.slane %v932_v48, 0 }
 0xa05   :  { %7051 = vst [vmem:[#allocation34_spill] sm:$0xff] %v5031_v17  ;;  %v1246_v58 = vadd.s32 536870912, %v5040_v44  ;;  %v5074_v2 = vperm.slane %v933_v47, 0  ;;  %v5076_v56 = vperm.slane %v934_v19, 0  ;;  %v1374_v51 = vand.u32 65535, %v5000_v41 }
 0xa06   :  { %7052 = vst [vmem:[#allocation35_spill] sm:$0xff] %v5047_v3  ;;  %v3974_v30 = vadd.s32 4294967169, %v1459_v23  ;;  %v5080_v55 = vmul.f32 %v4707_v29, %v943_v27  ;;  %v5083_v24 = vmul.f32 %v4714_v32, %v943_v27  ;;  %v1103_v43 = vsub.s32 32, %v1102_v57 }
 0xa07   :  { %7053 = vst [vmem:[#allocation36_spill] sm:$0xff] %v5050_v16  ;;  %v5085_v59 = vmul.u32 %v1353_v46, %v1350_v54  ;;  %v1107_v48 = vsub.s32 4294967266, %v1102_v57  ;;  %v1351_v8 = vshrl.u32 %v5016_v1, 16  ;;  %v1380_v47 = vshll.u32 %v5064_v0, 16 }
 0xa08   :  { %7054 = vst [vmem:[#allocation37_spill] sm:$0xff] %v5053_v18  ;;  %v1465_v7 = vadd.s32 1, %v3974_v30  ;;  %v5090_v19 = vmul.f32 %v4794_v36, %v943_v27  ;;  %v5093_v23 = vmul.f32 %v4957_v62, %v943_v27  ;;  %v5095_v4 = vshrl.u32 %v1246_v58, 30 }
 0xa09   :  { %7055 = vst [vmem:[#allocation38_spill] sm:$0xff] %v5057_v45  ;;  %v1352_v28 = vand.u32 65535, %v5035_v25  ;;  %v1087_v61 = vadd.s32 %v4867_v39, %v4850_v40  ;;  %v1376_v53 = vmul.u32 %v1374_v51, %v1350_v54  ;;  %v5100_v32 = vmul.u32 %v1374_v51, %v1351_v8 }
 0xa0a   :  { %7056 = vst [vmem:[#allocation39_spill] sm:$0xff] %v5067_v50  ;;  %vm1466_vm4 = vcmp.gt.s32.totalorder %v1465_v7, 0  ;;  %v5103_v29 = vmul.f32 %v5069_v12, %v943_v27  ;;  %v5106_v30 = vmul.f32 %v5071_v52, %v943_v27  ;;  %v1358_v62 = vshll.u32 %v5085_v59, 16 }
 0xa0b   :  { %7057 = vst [vmem:[#allocation40_spill] sm:$0xff] %v5069_v12  ;;  %v1467_v36 = vsel %vm1466_vm4, %v1465_v7, 0  ;;  %v1105_v58 = vshrl.u32 %v1087_v61, %v1103_v43  ;;  %v1108_v60 = vadd.s32 127, %v1107_v48  ;;  %v5109_v13 = vadd.s32 %v1380_v47, %v1376_v53 }
 0xa0c   :  { %7058 = vst [vmem:[#allocation41_spill] sm:$0xff] %v5071_v52  ;;  %v1469_v25 = vand.u32 31, %v1467_v36  ;;  %v1248_v40 = vshll.u32 %v5095_v4, 30  ;;  %v1354_v39 = vmul.u32 %v1352_v28, %v1350_v54  ;;  %v5112_v51 = vmul.u32 %v1352_v28, %v1351_v8 }
 0xa0d   :  { %7059 = vst [vmem:[#allocation42_spill] sm:$0xff] %v5074_v2  ;;  %vm1384_vm5 = vc.u32 %v1376_v53, %v1380_v47  ;;  %v5115_v14 = vmul.f32 %v5074_v2, %v943_v27  ;;  %v1104_v50 = vshll.u32 %v4907_v21, %v1102_v57  ;;  %v6923_v45 = vshll.u32 %v5100_v32, 16 }
 0xa0e   :  { %7060 = vst [vmem:[#allocation43_spill] sm:$0xff] %v5076_v56  ;;  %v5119_v18 = vsub.s32 32, %v1469_v25  ;;  %v5122_v61 = vmul.f32 %v5076_v56, %v943_v27  ;;  %v5126_v7 = vmul.f32 %v4712_v31, %v5069_v12  ;;  %vm1362_vm6 = vc.u32 %v1354_v39, %v1358_v62 }
 0xa0f   :  { %v1364_v28 = vadd.s32 %v1358_v62, %v1354_v39  ;;  %v5128_v54 = vor.u32 %v1105_v58, %v1104_v50  ;;  %v7062_v53 = vmov 0   ;;  %vm1388_vm7 = vc.u32 %v5109_v13, %v6923_v45 }
 0xa10   :  { %7061 = vst [vmem:[#allocation44_spill] sm:$0xff] %v5126_v7  ;;  %v1385_v43 = vsel %vm1384_vm5, 1, %v7062_v53  ;;  %v1109_v57 = vshll.u32 %v1108_v60, 23  ;;  %v5136_v27 = vsub.s32 %v5040_v44, %v1248_v40  ;;  %v1360_v48 = vshll.u32 %v5112_v51, 16 }
 0xa11   :  { %v7063_v47 = vshrl.u32 %v5000_v41, 16  ;;  %v1357_v62 = vmul.u32 %v1353_v46, %v1351_v8  ;;  %v1363_v50 = vsel %vm1362_vm6, 1, %v7062_v53  ;;  %v7064_v58 = vmov 2475754826  }
 0xa12   :  { %v1473_v39 = vshrl.u32 %v7064_v58, %v5119_v18  ;;  %v7065_v16 = vmov 2131351028   ;;  %vm5146_vm8 = vc.u32 %v1364_v28, %v1360_v48  ;;  %v1389_v44 = vsel %vm1388_vm7, 1, %v7062_v53 }
 0xa13   :  { %v1379_v12 = vmul.u32 %v7063_v47, %v1351_v8  ;;  %v1476_v45 = vshrl.u32 %v7065_v16, %v5119_v18  ;;  %v7068_v40 = vmov 2102212464   ;;  %v7069_v8 = vand.u32 2147483647, %v5014_v35 }
 0xa14   :  { %v1479_v41 = vshrl.u32 %v7068_v40, %v5119_v18  ;;  %v7070_v47 = vmov 683565275   ;;  %v1475_v17 = vshll.u32 %v7064_v58, %v1469_v25  ;;  %v7071_v9 = vmov 920167782  }
 0xa15   :  { %v1387_v60 = vadd.s32 %v1385_v43, %v1379_v12  ;;  %v1462_v46 = vand.u32 8388607, %v7069_v8  ;;  %v1472_v3 = vshll.u32 %v7070_v47, %v1469_v25  ;;  %v1482_v15 = vshrl.u32 %v7071_v9, %v5119_v18 }
 0xa16   :  { %v5159_v28 = vshrl.u32 %v1467_v36, 5  ;;  %v1478_v48 = vshll.u32 %v7065_v16, %v1469_v25  ;;  %v1481_v12 = vshll.u32 %v7068_v40, %v1469_v25  ;;  %v1612_v43 = vand.u32 2139095040, %v5126_v7 }
 0xa17   :  { %v1110_v49 = vor.u32 4788187, %v1109_v57  ;;  %v5164_v22 = vor.u32 %v1473_v39, %v1472_v3  ;;  %v5166_v26 = vor.u32 %v1476_v45, %v1475_v17  ;;  %v7072_v8 = vmov 1326507024  }
 0xa18   :  { %v1485_v35 = vshrl.u32 %v7072_v8, %v5119_v18  ;;  %v1251_v37 = vsub.s32 0, %v5136_v27  ;;  %v1365_v56 = vadd.s32 %v1363_v50, %v1357_v62  ;;  %v5171_v2 = vor.u32 %v1479_v41, %v1478_v48 }
 0xa19   :  { %v1483_v36 = vor.u32 %v1482_v15, %v1481_v12  ;;  %vm1250_vm9 = vcmp.lt.s32.totalorder %v5136_v27, 0  ;;  %v1367_v34 = vsel %vm5146_vm8, 1, %v7062_v53  ;;  %v1391_v57 = vadd.s32 %v1389_v44, %v1387_v60 }
 0xa1a   :  { %v1484_v3 = vshll.u32 %v7071_v9, %v1469_v25  ;;  %v1463_v17 = vor.u32 8388608, %v1462_v46  ;;  %vm1487_vm10 = vcmp.lt.s32.totalorder %v5159_v28, 1  ;;  %vm1490_vm11 = vcmp.lt.s32.totalorder %v5159_v28, 4 }
 0xa1b   :  { %v1613_v45 = vshrl.u32 %v1612_v43, 23  ;;  %vm1489_vm12 = vcmp.lt.s32.totalorder %v5159_v28, 3  ;;  %v1495_v15 = vsel %vm1487_vm10, %v5164_v22, %v5166_v26  ;;  %v1496_v21 = vsel %vm1490_vm11, %v1483_v36, 920167782 }
 0xa1c   :  { %v1486_v39 = vor.u32 %v1485_v35, %v1484_v3  ;;  %v977_v62 = vmul.f32 1.442695, %v5080_v55  ;;  %v1252_v25 = vsel %vm1250_vm9, %v1251_v37, %v5136_v27  ;;  %v1369_v50 = vadd.s32 %v1367_v34, %v1365_v56 }
 0xa1d   :  { %v1497_v60 = vsel %vm1489_vm12, %v5171_v2, %v1496_v21  ;;  %v1111_v35 = vand.u32 2147483647, %v1110_v49  ;;  %v1359_v44 = vshrl.u32 %v5085_v59, 16  ;;  %v1381_v41 = vshrl.u32 %v5064_v0, 16 }
 0xa1e   :  { %vm1488_vm1 = vcmp.lt.s32.totalorder %v5159_v28, 2  ;;  %v1499_v34 = vsel %vm1487_vm10, %v5166_v26, %v5171_v2  ;;  %v5203_v56 = vshll.u32 %v1463_v17, 8  ;;  %v3977_v37 = vadd.s32 4294967169, %v1613_v45 }
 0xa1f   :  { %v5197_v46 = vsel %vm1488_vm1, %v1495_v15, %v1497_v60  ;;  %v1113_v49 = vcvt.s32.f32 %v5128_v54  ;;  %v1253_v55 = vclz %v1252_v25  ;;  %v1392_v59 = vadd.s32 %v1391_v57, %v1381_v41 }
 0xa20   :  { %v1500_v0 = vsel %vm1490_vm11, %v1486_v39, 1326507024  ;;  %v1317_v48 = vshrl.u32 %v7070_v47, %v4903_v42  ;;  %v1370_v12 = vadd.s32 %v1369_v50, %v1359_v44  ;;  %v1529_v3 = vshrl.u32 %v5197_v46, 16 }
 0xa21   :  { %v1501_v43 = vsel %vm1489_vm12, %v1483_v36, %v1500_v0  ;;  %v1114_v15 = vmul.f32 %v1113_v49, %v1111_v35  ;;  %v1338_v17 = vsel %vm1336_vm13, %v4948_v5, 2102212464  ;;  %v1383_v54 = vshrl.u32 %v5100_v32, 16 }
 0xa22   :  { %v1502_v57 = vsel %vm1488_vm1, %v1499_v34, %v1501_v43  ;;  %v1361_v45 = vshrl.u32 %v5112_v51, 16  ;;  %v1504_v42 = vand.u32 65535, %v5203_v56  ;;  %v1619_v21 = vadd.s32 1, %v3977_v37 }
 0xa23   :  { %v1507_v39 = vshrl.u32 %v1502_v57, 16  ;;  %v5222_v36 = vmul.f32 1.442695, %v5083_v24  ;;  %v3969_v25 = vadd.s32 4294967294, %v1253_v55  ;;  %v1337_v50 = vsel %vm1333_vm14, %v1317_v48, %v4944_v6 }
 0xa24   :  { %v1393_v5 = vadd.s32 %v1392_v59, %v1383_v54  ;;  %v1339_v60 = vsel %vm1335_vm15, %v4946_v20, %v1338_v17  ;;  %v5230_v35 = vadd.s32 %v1370_v12, %v1361_v45  ;;  %v5236_v44 = vmul.u32 %v1529_v3, %v1504_v42 }
 0xa25   :  { %v5232_v51 = vmul.u32 %v1507_v39, %v1504_v42  ;;  %v5240_v24 = vmul.f32 %v4712_v31, %v5071_v52  ;;  %v5243_v41 = vmul.f32 1.442695, %v5090_v19  ;;  %v5246_v6 = vmul.f32 1.442695, %v5093_v23 }
 0xa26   :  { %v1115_v34 = vxor.u32 2147483648, %v1114_v15  ;;  %v7073_v20 = vshll.u32 %v5100_v32, 16  ;;  %v1506_v49 = vand.u32 65535, %v1502_v57  ;;  %v1528_v55 = vand.u32 65535, %v5197_v46 }
 0xa27   :  { %vm1620_vm13 = vcmp.gt.s32.totalorder %v1619_v21, 0  ;;  %4123 = vpow2.f32 %v977_v62  ;;  %vm3970_vm14 = vcmp.lt.s32.totalorder %v3969_v25, 0  ;;  %v1340_v31 = vsel %vm1334_vm2, %v1337_v50, %v1339_v60 }
 0xa28   :  { %v5251_v37 = vadd.s32 %v5109_v13, %v7073_v20  ;;  %v1397_v19 = vadd.s32 1, %v1393_v5  ;;  %v1505_v23 = vshrl.u32 %v5203_v56, 16  ;;  %v1512_v32 = vshll.u32 %v5232_v51, 16 }
 0xa29   :  { %v1534_v13 = vshll.u32 %v5236_v44, 16  ;;  %v5262_v59 = vmul.f32 1.442695, %v5103_v29  ;;  %v5265_v0 = vmul.f32 1.442695, %v5106_v30  ;;  %vm995_vm3 = vcmp.lt.s32.totalorder %v4718_v33, 0 }
 0xa2a   :  { %vm1396_vm15 = vc.u32 %v5230_v35, %v5251_v37  ;;  %v1621_v63 = vsel %vm1620_vm13, %v1619_v21, 0  ;;  %v1116_v62 = vsel %vm995_vm3, %v1115_v34, %v1114_v15  ;;  %v1508_v48 = vmul.u32 %v1506_v49, %v1504_v42 }
 0xa2b   :  { %v1530_v12 = vmul.u32 %v1528_v55, %v1504_v42  ;;  %v5270_v43 = vmul.u32 %v1528_v55, %v1505_v23  ;;  %v5272_v17 = vsel %vm3970_vm14, 0, %v3969_v25  ;;  %v1394_v54 = vmul.u32 %v5016_v1, %v1340_v31 }
 0xa2c   :  { %v1398_v57 = vsel %vm1396_vm15, %v1397_v19, %v1393_v5  ;;  %v5275_v29 = vmul.u32 %v1506_v49, %v1505_v23  ;;  %vm1516_vm2 = vc.u32 %v1508_v48, %v1512_v32  ;;  %v1623_v45 = vand.u32 31, %v1621_v63 }
 0xa2d   :  { %vm1538_vm4 = vc.u32 %v1530_v12, %v1534_v13  ;;  %v5277_v30 = vadd.s32 %v1534_v13, %v1530_v12  ;;  %v5279_v21 = vpop.eup %4123  ;;  %v5282_v15 = vmul.f32 1.442695, %v5115_v14  ;;  %v7075_v42 = vand.u32 2147483647, %v4718_v33 }
 0xa2e   :  { %7074 = vst [vmem:[#allocation45_spill] sm:$0xff] %v5279_v21  ;;  %v1518_v1 = vadd.s32 %v1512_v32, %v1508_v48  ;;  %v6939_v50 = vand.u32 2147483647, %v5126_v7  ;;  %v5296_v60 = vadd.s32 %v1398_v57, %v1394_v54  ;;  %v6940_v34 = vshll.u32 %v5270_v43, 16 }
 0xa2f   :  { %vm5286_vm5 = vcmp.le.f32.partialorder %v7075_v42, 0.7853982  ;;  %v5299_v14 = vsub.s32 32, %v1623_v45  ;;  %v1261_v20 = vsub.s32 4294967266, %v5272_v17  ;;  %v1514_v49 = vshll.u32 %v5275_v29, 16 }
 0xa30   :  { %v5294_v5 = vsel %vm5286_vm5, %v4718_v33, %v1116_v62  ;;  %v1517_v55 = vsel %vm1516_vm2, 1, %v7062_v53  ;;  %v1539_v31 = vsel %vm1538_vm4, 1, %v7062_v53  ;;  %v1511_v19 = vmul.u32 %v1507_v39, %v1505_v23 }
 0xa31   :  { %v1533_v32 = vmul.u32 %v1529_v3, %v1505_v23  ;;  %vm1542_vm6 = vc.u32 %v5277_v30, %v6940_v34  ;;  %v1627_v13 = vshrl.u32 %v7064_v58, %v5299_v14  ;;  %vm1520_vm7 = vc.u32 %v1518_v1, %v1514_v49 }
 0xa32   :  { %v1616_v62 = vand.u32 8388607, %v6939_v50  ;;  %v1630_v48 = vshrl.u32 %v7065_v16, %v5299_v14  ;;  %v1633_v39 = vshrl.u32 %v7068_v40, %v5299_v14  ;;  %v1400_v46 = vadd.s32 536870912, %v5296_v60 }
 0xa33   :  { %v1519_v3 = vadd.s32 %v1517_v55, %v1511_v19  ;;  %v1541_v23 = vadd.s32 %v1539_v31, %v1533_v32  ;;  %v1626_v12 = vshll.u32 %v7070_v47, %v1623_v45  ;;  %v1543_v54 = vsel %vm1542_vm6, 1, %v7062_v53 }
 0xa34   :  { %v5321_v57 = vshrl.u32 %v1621_v63, 5  ;;  %v1629_v42 = vshll.u32 %v7064_v58, %v1623_v45  ;;  %v1632_v1 = vshll.u32 %v7065_v16, %v1623_v45  ;;  %v1521_v49 = vsel %vm1520_vm7, 1, %v7062_v53 }
 0xa35   :  { %v5326_v50 = vor.u32 %v1627_v13, %v1626_v12  ;;  %v1635_v34 = vshll.u32 %v7068_v40, %v1623_v45  ;;  %v1636_v55 = vshrl.u32 %v7071_v9, %v5299_v14  ;;  %v1638_v63 = vshll.u32 %v7071_v9, %v1623_v45 }
 0xa36   :  { %v5331_v31 = vor.u32 %v1630_v48, %v1629_v42  ;;  %v5333_v19 = vor.u32 %v1633_v39, %v1632_v1  ;;  %v1639_v32 = vshrl.u32 %v7072_v8, %v5299_v14  ;;  %4125 = vpow2.f32 %v5222_v36 }
 0xa37   :  { %v5341_v13 = vmul.f32 %v5294_v5, %v5294_v5  ;;  %v1617_v12 = vor.u32 8388608, %v1616_v62  ;;  %v1637_v52 = vor.u32 %v1636_v55, %v1635_v34  ;;  %v5343_v21 = vshrl.u32 %v1400_v46, 30 }
 0xa38   :  { %v1545_v7 = vadd.s32 %v1543_v54, %v1541_v23  ;;  %v1640_v48 = vor.u32 %v1639_v32, %v1638_v63  ;;  %vm1644_vm8 = vcmp.lt.s32.totalorder %v5321_v57, 4  ;;  %v1523_v39 = vadd.s32 %v1521_v49, %v1519_v3 }
 0xa39   :  { %7078 = vst [vmem:[#allocation46_spill] sm:$0xff] %v5343_v21  ;;  %vm1641_vm9 = vcmp.lt.s32.totalorder %v5321_v57, 1  ;;  %vm1643_vm13 = vcmp.lt.s32.totalorder %v5321_v57, 3  ;;  %v1650_v36 = vsel %vm1644_vm8, %v1637_v52, 920167782  ;;  %v1262_v45 = vadd.s32 127, %v1261_v20 }
 0xa3a   :  { %v1535_v42 = vshrl.u32 %v5236_v44, 16  ;;  %v1649_v34 = vsel %vm1641_vm9, %v5326_v50, %v5331_v31  ;;  %v1651_v62 = vsel %vm1643_vm13, %v5333_v19, %v1650_v36  ;;  %v5359_v46 = vmul.f32 -0.001358992, %v5341_v13 }
 0xa3b   :  { %v1241_v3 = vadd.s32 %v4968_v11, %v4953_v10  ;;  %v1513_v23 = vshrl.u32 %v5232_v51, 16  ;;  %v1653_v44 = vsel %vm1641_vm9, %v5331_v31, %v5333_v19  ;;  %v1402_v20 = vshll.u32 %v5343_v21, 30 }
 0xa3c   :  { %v1546_v54 = vadd.s32 %v1545_v7, %v1535_v42  ;;  %vm1642_vm14 = vcmp.lt.s32.totalorder %v5321_v57, 2  ;;  %v1654_v1 = vsel %vm1644_vm8, %v1640_v48, 1326507024  ;;  %v5372_v49 = vpop.eup %4125  ;;  %v5378_v51 = vshll.u32 %v1617_v12, 8 }
 0xa3d   :  { %7079 = vst [vmem:[#allocation47_spill] sm:$0xff] %v5372_v49  ;;  %v1524_v55 = vadd.s32 %v1523_v39, %v1513_v23  ;;  %v1652_v10 = vsel %vm1642_vm14, %v1649_v34, %v1651_v62  ;;  %v1655_v11 = vsel %vm1643_vm13, %v1637_v52, %v1654_v1  ;;  %v1257_v63 = vsub.s32 32, %v5272_v17 }
 0xa3e   :  { %v1263_v32 = vshll.u32 %v1262_v45, 23  ;;  %v1537_v7 = vshrl.u32 %v5270_v43, 16  ;;  %v1656_v36 = vsel %vm1642_vm14, %v1653_v44, %v1655_v11  ;;  %v1471_v48 = vshrl.u32 %v7070_v47, %v5119_v18 }
 0xa3f   :  { %v1492_v39 = vsel %vm1490_vm11, %v5171_v2, 2102212464  ;;  %v1515_v42 = vshrl.u32 %v5275_v29, 16  ;;  %v1660_v52 = vand.u32 65535, %v1656_v36  ;;  %v1661_v34 = vshrl.u32 %v1656_v36, 16 }
 0xa40   :  { %v1547_v12 = vadd.s32 %v1546_v54, %v1537_v7  ;;  %v1682_v62 = vand.u32 65535, %v1652_v10  ;;  %v1683_v23 = vshrl.u32 %v1652_v10, 16  ;;  %v5391_v45 = vsub.s32 %v5296_v60, %v1402_v20 }
 0xa41   :  { %v5393_v1 = vadd.s32 %v1524_v55, %v1515_v42  ;;  %v1658_v44 = vand.u32 65535, %v5378_v51  ;;  %v1659_v18 = vshrl.u32 %v5378_v51, 16  ;;  %v1129_v11 = vmul.f32 -0.00019511016, %v5341_v13 }
 0xa42   :  { %v1258_v2 = vshll.u32 %v5136_v27, %v5272_v17  ;;  %v1259_v29 = vshrl.u32 %v1241_v3, %v1257_v63  ;;  %v1491_v54 = vsel %vm1487_vm10, %v1471_v48, %v5164_v22  ;;  %v1493_v60 = vsel %vm1489_vm12, %v5166_v26, %v1492_v39 }
 0xa43   :  { %7080 = vst [vmem:[#allocation48_spill] sm:$0xff] %v5393_v1  ;;  %v7081_v20 = vshll.u32 %v5270_v43, 16  ;;  %v1663_v10 = vmul.u32 %v1661_v34, %v1658_v44  ;;  %v1664_v7 = vmul.u32 %v1660_v52, %v1659_v18  ;;  %v1264_v36 = vor.u32 4788187, %v1263_v32 }
 0xa44   :  { %v1551_v42 = vadd.s32 1, %v1547_v12  ;;  %v1685_v49 = vmul.u32 %v1683_v23, %v1658_v44  ;;  %v5411_v27 = vmul.u32 %v1682_v62, %v1659_v18  ;;  %vm1404_vm11 = vcmp.lt.s32.totalorder %v5391_v45, 0 }
 0xa45   :  { %v5409_v55 = vadd.s32 %v5277_v30, %v7081_v20  ;;  %v1662_v22 = vmul.u32 %v1660_v52, %v1658_v44  ;;  %v1666_v17 = vshll.u32 %v1663_v10, 16  ;;  %v1405_v26 = vsub.s32 0, %v5391_v45 }
 0xa46   :  { %v1494_v43 = vsel %vm1488_vm1, %v1491_v54, %v1493_v60  ;;  %v1665_v30 = vmul.u32 %v1661_v34, %v1659_v18  ;;  %v1688_v3 = vshll.u32 %v1685_v49, 16  ;;  %v1668_v63 = vshll.u32 %v1664_v7, 16 }
 0xa47   :  { %7082 = vst [vmem:[#allocation49_spill] sm:$0xff] %v5409_v55  ;;  %vm1550_vm10 = vc.u32 %v5393_v1, %v5409_v55  ;;  %vm1670_vm12 = vc.u32 %v1662_v22, %v1666_v17  ;;  %v1672_v32 = vadd.s32 %v1666_v17, %v1662_v22  ;;  %v1684_v48 = vmul.u32 %v1682_v62, %v1658_v44 }
 0xa48   :  { %v1552_v39 = vsel %vm1550_vm10, %v1551_v42, %v1547_v12  ;;  %v1671_v20 = vsel %vm1670_vm12, 1, %v7062_v53  ;;  %v1687_v21 = vmul.u32 %v1683_v23, %v1659_v18  ;;  %v1690_v8 = vshll.u32 %v5411_v27, 16 }
 0xa49   :  { %v1673_v55 = vadd.s32 %v1671_v20, %v1665_v30  ;;  %vm1674_vm15 = vc.u32 %v1672_v32, %v1668_v63  ;;  %vm1692_vm2 = vc.u32 %v1684_v48, %v1688_v3  ;;  %v1694_v52 = vadd.s32 %v1688_v3, %v1684_v48 }
 0xa4a   :  { %v1130_v1 = vadd.f32 0.008332121, %v1129_v11  ;;  %v1548_v28 = vmul.u32 %v5203_v56, %v1494_v43  ;;  %v1675_v34 = vsel %vm1674_vm15, 1, %v7062_v53  ;;  %v1693_v54 = vsel %vm1692_vm2, 1, %v7062_v53 }
 0xa4b   :  { %v1260_v60 = vor.u32 %v1259_v29, %v1258_v2  ;;  %v1677_v22 = vadd.s32 %v1675_v34, %v1673_v55  ;;  %v1695_v62 = vadd.s32 %v1693_v54, %v1687_v21  ;;  %vm1696_vm1 = vc.u32 %v1694_v52, %v1690_v8 }
 0xa4c   :  { %v1406_v12 = vsel %vm1404_vm11, %v1405_v26, %v5391_v45  ;;  %v5427_v23 = vadd.s32 %v1552_v39, %v1548_v28  ;;  %v1667_v44 = vshrl.u32 %v1663_v10, 16  ;;  %v1697_v18 = vsel %vm1696_vm1, 1, %v7062_v53 }
 0xa4d   :  { %v5431_v11 = vmul.f32 1.442695, %v5122_v61  ;;  %v1265_v56 = vand.u32 2147483647, %v1264_v36  ;;  %v1689_v42 = vshrl.u32 %v1685_v49, 16  ;;  %v1699_v17 = vadd.s32 %v1697_v18, %v1695_v62 }
 0xa4e   :  { %v1123_v2 = vadd.f32 0.041655596, %v5359_v46  ;;  %v1131_v21 = vmul.f32 %v1130_v1, %v5341_v13  ;;  %v1678_v29 = vadd.s32 %v1677_v22, %v1667_v44  ;;  %v1766_v55 = vand.u32 2139095040, %v5240_v24 }
 0xa4f   :  { %v1267_v43 = vcvt.s32.f32 %v1260_v60  ;;  %v1407_v26 = vclz %v1406_v12  ;;  %v1691_v30 = vshrl.u32 %v5411_v27, 16  ;;  %v1700_v10 = vadd.s32 %v1699_v17, %v1689_v42  ;;  %v7083_v60 = vld [vmem:[#allocation19_spill] sm:$0xff] }
 0xa50   :  { %4127 = vpow2.f32 %v5243_v41  ;;  %v1554_v61 = vadd.s32 536870912, %v5427_v23  ;;  %v1669_v3 = vshrl.u32 %v1664_v7, 16  ;;  %v1767_v36 = vshrl.u32 %v1766_v55, 23 }
 0xa51   :  { %v1268_v49 = vmul.f32 %v1267_v43, %v1265_v56  ;;  %v1625_v46 = vshrl.u32 %v7070_v47, %v5299_v14  ;;  %v1646_v1 = vsel %vm1644_vm8, %v5333_v19, 2102212464  ;;  %v1701_v63 = vadd.s32 %v1700_v10, %v1691_v30  ;;  %v7090_v30 = vld [vmem:[#allocation42_spill] sm:$0xff] }
 0xa52   :  { %v1117_v32 = vsub.s32 4, %v4891_v38  ;;  %v1124_v27 = vmul.f32 %v1123_v2, %v5341_v13  ;;  %v5446_v48 = vadd.s32 %v1678_v29, %v1669_v3  ;;  %v3980_v41 = vadd.s32 4294967169, %v1767_v36 }
 0xa53   :  { %v1132_v39 = vadd.f32 -0.16666654, %v1131_v21  ;;  %v1271_v7 = vsub.s32 4, %v5095_v4  ;;  %v3972_v20 = vadd.s32 4294967294, %v1407_v26  ;;  %v1645_v14 = vsel %vm1641_vm9, %v1625_v46, %v5326_v50  ;;  %v4146_v26 = vld [vmem:[%s6881_s5 + $0x8] sm:$0xff] }
 0xa54   :  { %v5452_v28 = vshrl.u32 %v1554_v61, 30  ;;  %v1647_v19 = vsel %vm1643_vm13, %v5331_v31, %v1646_v1  ;;  %v5457_v34 = vadd.s32 %v1694_v52, %v1690_v8  ;;  %v1773_v54 = vadd.s32 1, %v3980_v41  ;;  %v7091_v61 = vld [vmem:[#allocation43_spill] sm:$0xff] }
 0xa55   :  { %4129 = vpow2.f32 %v5246_v6  ;;  %vm1149_vm4 = vcmp.lt.s32.totalorder %v7083_v60, 0  ;;  %v1269_v22 = vxor.u32 2147483648, %v1268_v49  ;;  %v1705_v62 = vadd.s32 1, %v1701_v63 }
 0xa56   :  { %v5461_v12 = vpop.eup %4127  ;;  %4131 = vpow2.f32 %v5262_v59  ;;  %v1125_v50 = vadd.f32 -0.4999988, %v1124_v27  ;;  %vm1704_vm6 = vc.u32 %v5446_v48, %v5457_v34  ;;  %vm1774_vm7 = vcmp.gt.s32.totalorder %v1773_v54, 0 }
 0xa57   :  { %7084 = vst [vmem:[#allocation50_spill] sm:$0xff] %v5461_v12  ;;  %v1118_v8 = vsel %vm995_vm3, %v1117_v32, %v4891_v38  ;;  %v1133_v31 = vmul.f32 %v1132_v39, %v5341_v13  ;;  %v1648_v6 = vsel %vm1642_vm14, %v1645_v14, %v1647_v19  ;;  %v1775_v52 = vsel %vm1774_vm7, %v1773_v54, 0 }
 0xa58   :  { %v1272_v44 = vsel %vm1149_vm4, %v1271_v7, %v5095_v4  ;;  %vm3973_vm8 = vcmp.lt.s32.totalorder %v3972_v20, 0  ;;  %v1556_v59 = vshll.u32 %v5452_v28, 30  ;;  %v1777_v18 = vand.u32 31, %v1775_v52 }
 0xa59   :  { %4133 = vpow2.f32 %v5265_v0  ;;  %v7085_v56 = vand.u32 2147483647, %v7083_v60  ;;  %v1270_v38 = vsel %vm1149_vm4, %v1269_v22, %v1268_v49  ;;  %v1706_v42 = vsel %vm1704_vm6, %v1705_v62, %v1701_v63 }
 0xa5a   :  { %4135 = vpow2.f32 %v5282_v15  ;;  %v5484_v57 = vsel %vm5286_vm5, 0, %v1118_v8  ;;  %v1126_v4 = vmul.f32 %v1125_v50, %v5341_v13  ;;  %v1702_v17 = vmul.u32 %v5378_v51, %v1648_v6 }
 0xa5b   :  { %vm1148_vm9 = vcmp.le.f32.partialorder %v7085_v56, 0.7853982  ;;  %7086 = vst [vmem:[#allocation51_spill] sm:$0xff] %v5484_v57  ;;  %v5488_v2 = vpop.eup %4129  ;;  %v1134_v0 = vadd.f32 1.0, %v1133_v31  ;;  %v5492_v29 = vsel %vm3973_vm8, 0, %v3972_v20  ;;  %v5494_v55 = vsub.s32 32, %v1777_v18 }
 0xa5c   :  { %7087 = vst [vmem:[#allocation52_spill] sm:$0xff] %v5488_v2  ;;  %v5490_v21 = vsel %vm1148_vm9, 0, %v1272_v44  ;;  %v5496_v43 = vpop.eup %4131  ;;  %v5499_v15 = vsel %vm1148_vm9, %v7083_v60, %v1270_v38  ;;  %v5502_v25 = vsub.s32 %v5427_v23, %v1556_v59  ;;  %v5504_v13 = vadd.s32 %v1706_v42, %v1702_v17 }
 0xa5d   :  { %7088 = vst [vmem:[#allocation53_spill] sm:$0xff] %v5490_v21  ;;  %v6952_v51 = vand.u32 2147483647, %v5240_v24  ;;  %v5511_v10 = vmul.f32 %v4146_v26, %v7090_v30  ;;  %v5514_v3 = vmul.f32 %v4146_v26, %v7091_v61  ;;  %4137 = vpow2.f32 %v5431_v11 }
 0xa5e   :  { %7089 = vst [vmem:[#allocation54_spill] sm:$0xff] %v5496_v43  ;;  %v5518_v36 = vand.u32 3, %v5484_v57  ;;  %v5520_v23 = vadd.f32 1.0, %v1126_v4  ;;  %v5523_v49 = vand.u32 3, %v5490_v21  ;;  %v1395_v46 = vadd.s32 %v5251_v37, %v5230_v35 }
 0xa5f   :  { %7092 = vst [vmem:[#allocation55_spill] sm:$0xff] %v5514_v3  ;;  %v1415_v1 = vsub.s32 4294967266, %v5492_v29  ;;  %v5528_v63 = vpop.eup %4133  ;;  %v5531_v32 = vmul.f32 %v1134_v0, %v5294_v5  ;;  %v5535_v11 = vmul.f32 %v5499_v15, %v5499_v15  ;;  %v1781_v27 = vshrl.u32 %v7064_v58, %v5494_v55 }
 0xa60   :  { %7093 = vst [vmem:[#allocation56_spill] sm:$0xff] %v5520_v23  ;;  %v1784_v41 = vshrl.u32 %v7065_v16, %v5494_v55  ;;  %v5541_v39 = vpop.eup %4135  ;;  %vm1558_vm3 = vcmp.lt.s32.totalorder %v5502_v25, 0  ;;  %v1559_v35 = vsub.s32 0, %v5502_v25  ;;  %v1708_v37 = vadd.s32 536870912, %v5504_v13 }
 0xa61   :  { %7094 = vst [vmem:[#allocation57_spill] sm:$0xff] %v5528_v63  ;;  %v1770_v5 = vand.u32 8388607, %v6952_v51  ;;  %v1780_v7 = vshll.u32 %v7070_v47, %v1777_v18  ;;  %v1783_v20 = vshll.u32 %v7064_v58, %v1777_v18  ;;  %v1787_v14 = vshrl.u32 %v7068_v40, %v5494_v55 }
 0xa62   :  { %7095 = vst [vmem:[#allocation58_spill] sm:$0xff] %v5531_v32  ;;  %v1790_v19 = vshrl.u32 %v7071_v9, %v5494_v55  ;;  %v1416_v54 = vadd.s32 127, %v1415_v1  ;;  %v5554_v22 = vshrl.u32 %v1775_v52, 5  ;;  %v1789_v62 = vshll.u32 %v7068_v40, %v1777_v18 }
 0xa63   :  { %7096 = vst [vmem:[#allocation59_spill] sm:$0xff] %v5541_v39  ;;  %v7097_v50 = vmov 1326507024   ;;  %v5559_v31 = vpop.eup %4137  ;;  %v5561_v6 = vor.u32 %v1781_v27, %v1780_v7  ;;  %v5563_v44 = vor.u32 %v1784_v41, %v1783_v20  ;;  %v1786_v59 = vshll.u32 %v7065_v16, %v1777_v18 }
 0xa64   :  { %v1793_v8 = vshrl.u32 %v7097_v50, %v5494_v55  ;;  %7098 = vst [vmem:[#allocation60_spill] sm:$0xff] %v5559_v31  ;;  %v1920_v56 = vand.u32 2139095040, %v5511_v10  ;;  %v1560_v52 = vsel %vm1558_vm3, %v1559_v35, %v5502_v25  ;;  %v1771_v38 = vor.u32 8388608, %v1770_v5 }
 0xa65   :  { %v1791_v42 = vor.u32 %v1790_v19, %v1789_v62  ;;  %v1792_v4 = vshll.u32 %v7071_v9, %v1777_v18  ;;  %v1411_v0 = vsub.s32 32, %v5492_v29  ;;  %v5573_v26 = vshrl.u32 %v1708_v37, 30 }
 0xa66   :  { %v1788_v1 = vor.u32 %v1787_v14, %v1786_v59  ;;  %v1417_v27 = vshll.u32 %v1416_v54, 23  ;;  %vm1795_vm5 = vcmp.lt.s32.totalorder %v5554_v22, 1  ;;  %vm1798_vm13 = vcmp.lt.s32.totalorder %v5554_v22, 4 }
 0xa67   :  { %7099 = vst [vmem:[#allocation61_spill] sm:$0xff] %v5573_v26  ;;  %v1794_v41 = vor.u32 %v1793_v8, %v1792_v4  ;;  %v1561_v7 = vclz %v1560_v52  ;;  %v1803_v35 = vsel %vm1795_vm5, %v5561_v6, %v5563_v44  ;;  %v1804_v18 = vsel %vm1798_vm13, %v1791_v42, 920167782 }
 0xa68   :  { %v1921_v5 = vshrl.u32 %v1920_v56, 23  ;;  %v5585_v20 = vmul.f32 -0.001358992, %v5535_v11  ;;  %vm1797_vm14 = vcmp.lt.s32.totalorder %v5554_v22, 3  ;;  %v5588_v14 = vshll.u32 %v1771_v38, 8 }
 0xa69   :  { %v1413_v19 = vshrl.u32 %v1395_v46, %v1411_v0  ;;  %v1710_v54 = vshll.u32 %v5573_v26, 30  ;;  %vm1796_vm11 = vcmp.lt.s32.totalorder %v5554_v22, 2  ;;  %v1805_v62 = vsel %vm1797_vm14, %v1788_v1, %v1804_v18 }
 0xa6a   :  { %v5594_v8 = vor.u32 4788187, %v1417_v27  ;;  %v1806_v59 = vsel %vm1796_vm11, %v1803_v35, %v1805_v62  ;;  %v1807_v56 = vsel %vm1795_vm5, %v5563_v44, %v1788_v1  ;;  %v1808_v52 = vsel %vm1798_vm13, %v1794_v41, 1326507024 }
 0xa6b   :  { %v1412_v46 = vshll.u32 %v5391_v45, %v5492_v29  ;;  %v3975_v38 = vadd.s32 4294967294, %v1561_v7  ;;  %v1809_v4 = vsel %vm1797_vm14, %v1791_v42, %v1808_v52  ;;  %v3983_v0 = vadd.s32 4294967169, %v1921_v5 }
 0xa6c   :  { %v1810_v27 = vsel %vm1796_vm11, %v1807_v56, %v1809_v4  ;;  %v1812_v35 = vand.u32 65535, %v5588_v14  ;;  %v1836_v18 = vand.u32 65535, %v1806_v59  ;;  %v1837_v62 = vshrl.u32 %v1806_v59, 16 }
 0xa6d   :  { %v5611_v51 = vmul.f32 -0.00019511016, %v5535_v11  ;;  %v5614_v41 = vsub.s32 %v5504_v13, %v1710_v54  ;;  %v1814_v37 = vand.u32 65535, %v1810_v27  ;;  %v1815_v45 = vshrl.u32 %v1810_v27, 16 }
 0xa6e   :  { %v1414_v29 = vor.u32 %v1413_v19, %v1412_v46  ;;  %v1419_v7 = vand.u32 2147483647, %v5594_v8  ;;  %v1813_v42 = vshrl.u32 %v5588_v14, 16  ;;  %v1839_v5 = vmul.u32 %v1837_v62, %v1812_v35 }
 0xa6f   :  { %vm3976_vm10 = vcmp.lt.s32.totalorder %v3975_v38, 0  ;;  %v1817_v56 = vmul.u32 %v1815_v45, %v1812_v35  ;;  %v1927_v4 = vadd.s32 1, %v3983_v0  ;;  %v1838_v17 = vmul.u32 %v1836_v18, %v1812_v35 }
 0xa70   :  { %v1818_v59 = vmul.u32 %v1814_v37, %v1813_v42  ;;  %v1840_v61 = vmul.u32 %v1836_v18, %v1813_v42  ;;  %v1842_v31 = vshll.u32 %v1839_v5, 16  ;;  %vm1712_vm12 = vcmp.lt.s32.totalorder %v5614_v41, 0 }
 0xa71   :  { %v1779_v13 = vshrl.u32 %v7070_v47, %v5494_v55  ;;  %v1816_v19 = vmul.u32 %v1814_v37, %v1812_v35  ;;  %v1820_v54 = vshll.u32 %v1817_v56, 16  ;;  %v1713_v8 = vsub.s32 0, %v5614_v41 }
 0xa72   :  { %v1819_v46 = vmul.u32 %v1815_v45, %v1813_v42  ;;  %v1841_v27 = vmul.u32 %v1837_v62, %v1813_v42  ;;  %vm1846_vm15 = vc.u32 %v1838_v17, %v1842_v31  ;;  %v1822_v30 = vshll.u32 %v1818_v59, 16 }
 0xa73   :  { %vm1824_vm2 = vc.u32 %v1816_v19, %v1820_v54  ;;  %v1826_v52 = vadd.s32 %v1820_v54, %v1816_v19  ;;  %v1847_v0 = vsel %vm1846_vm15, 1, %v7062_v53  ;;  %v1844_v39 = vshll.u32 %v1840_v61, 16 }
 0xa74   :  { %v1825_v18 = vsel %vm1824_vm2, 1, %v7062_v53  ;;  %v1848_v63 = vadd.s32 %v1842_v31, %v1838_v17  ;;  %v1849_v43 = vadd.s32 %v1847_v0, %v1841_v27  ;;  %v1800_v55 = vsel %vm1798_vm13, %v1788_v1, 2102212464 }
 0xa75   :  { %v1827_v37 = vadd.s32 %v1825_v18, %v1819_v46  ;;  %vm1828_vm1 = vc.u32 %v1826_v52, %v1822_v30  ;;  %vm1928_vm4 = vcmp.gt.s32.totalorder %v1927_v4, 0  ;;  %v1714_v35 = vsel %vm1712_vm12, %v1713_v8, %v5614_v41 }
 0xa76   :  { %v1829_v62 = vsel %vm1828_vm1, 1, %v7062_v53  ;;  %vm1850_vm6 = vc.u32 %v1848_v63, %v1844_v39  ;;  %v1929_v45 = vsel %vm1928_vm4, %v1927_v4, 0  ;;  %v1799_v42 = vsel %vm1795_vm5, %v1779_v13, %v5561_v6 }
 0xa77   :  { %v1821_v31 = vshrl.u32 %v1817_v56, 16  ;;  %v1831_v17 = vadd.s32 %v1829_v62, %v1827_v37  ;;  %v1851_v19 = vsel %vm1850_vm6, 1, %v7062_v53  ;;  %v1801_v30 = vsel %vm1797_vm14, %v5563_v44, %v1800_v55  ;;  %v7101_v37 = vld [vmem:[#allocation21_spill] sm:$0xff] }
 0xa78   :  { %v1843_v1 = vshrl.u32 %v1839_v5, 16  ;;  %v1853_v52 = vadd.s32 %v1851_v19, %v1849_v43  ;;  %v1931_v54 = vand.u32 31, %v1929_v45  ;;  %v5639_v8 = vsel %vm3976_vm10, 0, %v3975_v38 }
 0xa79   :  { %v1715_v46 = vclz %v1714_v35  ;;  %v1823_v4 = vshrl.u32 %v1818_v59, 16  ;;  %v1832_v27 = vadd.s32 %v1831_v17, %v1821_v31  ;;  %v1421_v0 = vcvt.s32.f32 %v1414_v29 }
 0xa7a   :  { %v1845_v18 = vshrl.u32 %v1840_v61, 16  ;;  %v1854_v6 = vadd.s32 %v1853_v52, %v1843_v1  ;;  %v5641_v56 = vsub.s32 32, %v1931_v54  ;;  %v5644_v13 = vadd.f32 0.041655596, %v5585_v20 }
 0xa7b   :  { %v1802_v44 = vsel %vm1796_vm11, %v1799_v42, %v1801_v30  ;;  %v5648_v5 = vadd.s32 %v1832_v27, %v1823_v4  ;;  %v5650_v43 = vadd.s32 %v1848_v63, %v1844_v39  ;;  %v1422_v38 = vmul.f32 %v1421_v0, %v1419_v7 }
 0xa7c   :  { %v1569_v55 = vsub.s32 4294967266, %v5639_v8  ;;  %v1855_v59 = vadd.s32 %v1854_v6, %v1845_v18  ;;  %v7100_v29 = vand.u32 2147483647, %v5511_v10  ;;  %vm1303_vm7 = vcmp.lt.s32.totalorder %v7101_v37, 0 }
 0xa7d   :  { %v3978_v35 = vadd.s32 4294967294, %v1715_v46  ;;  %vm1858_vm8 = vc.u32 %v5648_v5, %v5650_v43  ;;  %v1935_v22 = vshrl.u32 %v7064_v58, %v5641_v56  ;;  %v1938_v63 = vshrl.u32 %v7065_v16, %v5641_v56 }
 0xa7e   :  { %v1924_v61 = vand.u32 8388607, %v7100_v29  ;;  %v1856_v39 = vmul.u32 %v5588_v14, %v1802_v44  ;;  %v1859_v20 = vadd.s32 1, %v1855_v59  ;;  %v5663_v7 = vshrl.u32 %v1929_v45, 5  ;;  %v7106_v29 = vld [vmem:[#allocation49_spill] sm:$0xff] }
 0xa7f   :  { %v1941_v62 = vshrl.u32 %v7068_v40, %v5641_v56  ;;  %v1934_v42 = vshll.u32 %v7070_v47, %v1931_v54  ;;  %v1937_v31 = vshll.u32 %v7064_v58, %v1931_v54  ;;  %v1943_v17 = vshll.u32 %v7068_v40, %v1931_v54 }
 0xa80   :  { %v1944_v19 = vshrl.u32 %v7071_v9, %v5641_v56  ;;  %vm1142_vm9 = vcmp.eq.s32.totalorder %v5518_v36, 2  ;;  %v1860_v30 = vsel %vm1858_vm8, %v1859_v20, %v1855_v59  ;;  %v1940_v14 = vshll.u32 %v7065_v16, %v1931_v54  ;;  %v7105_v59 = vld [vmem:[#allocation48_spill] sm:$0xff] }
 0xa81   :  { %v1946_v45 = vshll.u32 %v7071_v9, %v1931_v54  ;;  %v1947_v1 = vshrl.u32 %v7097_v50, %v5641_v56  ;;  %v7102_v52 = vand.u32 2147483647, %v7101_v37  ;;  %v1861_v4 = vadd.s32 %v1860_v30, %v1856_v39 }
 0xa82   :  { %v5683_v27 = vor.u32 %v1935_v22, %v1934_v42  ;;  %v5685_v0 = vor.u32 %v1938_v63, %v1937_v31  ;;  %v1945_v18 = vor.u32 %v1944_v19, %v1943_v17  ;;  %v1423_v6 = vxor.u32 2147483648, %v1422_v38 }
 0xa83   :  { %vm5679_vm3 = vcmp.le.f32.partialorder %v7102_v52, 0.7853982  ;;  %vm3979_vm5 = vcmp.lt.s32.totalorder %v3978_v35, 0  ;;  %v5687_v44 = vor.u32 %v1941_v62, %v1940_v14  ;;  %v1948_v54 = vor.u32 %v1947_v1, %v1946_v45 }
 0xa84   :  { %v1549_v20 = vadd.s32 %v7106_v29, %v7105_v59  ;;  %v1565_v2 = vsub.s32 32, %v5639_v8  ;;  %v1862_v52 = vadd.s32 536870912, %v1861_v4  ;;  %vm1952_vm13 = vcmp.lt.s32.totalorder %v5663_v7, 4 }
 0xa85   :  { %v1570_v12 = vadd.s32 127, %v1569_v55  ;;  %v1925_v39 = vor.u32 8388608, %v1924_v61  ;;  %vm1949_vm14 = vcmp.lt.s32.totalorder %v5663_v7, 1  ;;  %v1958_v22 = vsel %vm1952_vm13, %v1945_v18, 920167782 }
 0xa86   :  { %v5696_v63 = vsel %vm3979_vm5, 0, %v3978_v35  ;;  %v5698_v62 = vshrl.u32 %v1862_v52, 30  ;;  %vm1951_vm11 = vcmp.lt.s32.totalorder %v5663_v7, 3  ;;  %v1957_v42 = vsel %vm1949_vm14, %v5683_v27, %v5685_v0 }
 0xa87   :  { %v1284_v31 = vadd.f32 0.008332121, %v5611_v51  ;;  %v1424_v55 = vsel %vm1303_vm7, %v1423_v6, %v1422_v38  ;;  %v1959_v61 = vsel %vm1951_vm11, %v5687_v44, %v1958_v22  ;;  %v1962_v35 = vsel %vm1952_vm13, %v1948_v54, 1326507024 }
 0xa88   :  { %7107 = vst [vmem:[#allocation21_spill] sm:$0xff] %v5698_v62  ;;  %v1567_v17 = vshrl.u32 %v1549_v20, %v1565_v2  ;;  %v1864_v19 = vshll.u32 %v5698_v62, 30  ;;  %vm1950_vm10 = vcmp.lt.s32.totalorder %v5663_v7, 2  ;;  %v1961_v51 = vsel %vm1949_vm14, %v5685_v0, %v5687_v44 }
 0xa89   :  { %v1723_v30 = vsub.s32 4294967266, %v5696_v63  ;;  %v1960_v38 = vsel %vm1950_vm10, %v1957_v42, %v1959_v61  ;;  %v1963_v14 = vsel %vm1951_vm11, %v1945_v18, %v1962_v35  ;;  %v5724_v45 = vshll.u32 %v1925_v39, 8 }
 0xa8a   :  { %v7108_v2 = vxor.u32 2147483648, %v5520_v23  ;;  %v1566_v6 = vshll.u32 %v5502_v25, %v5639_v8  ;;  %v1571_v54 = vshll.u32 %v1570_v12, 23  ;;  %v5735_v59 = vsub.s32 %v1861_v4, %v1864_v19 }
 0xa8b   :  { %v5739_v29 = vmul.f32 %v5644_v13, %v5535_v11  ;;  %v5742_v18 = vmul.f32 %v1284_v31, %v5535_v11  ;;  %v5747_v20 = vsel %vm5679_vm3, %v7101_v37, %v1424_v55  ;;  %v1964_v52 = vsel %vm1950_vm10, %v1961_v51, %v1963_v14 }
 0xa8c   :  { %v5731_v1 = vsel %vm1142_vm9, %v7108_v2, %v5531_v32  ;;  %7109 = vst [vmem:[#allocation48_spill] sm:$0xff] %v5747_v20  ;;  %v5751_v39 = vor.u32 %v1567_v17, %v1566_v6  ;;  %vm1866_vm12 = vcmp.lt.s32.totalorder %v5735_v59, 0  ;;  %v1867_v12 = vsub.s32 0, %v5735_v59 }
 0xa8d   :  { %v1991_v25 = vshrl.u32 %v1960_v38, 16  ;;  %v1724_v8 = vadd.s32 127, %v1723_v30  ;;  %v1966_v13 = vand.u32 65535, %v5724_v45  ;;  %v1968_v4 = vand.u32 65535, %v1964_v52 }
 0xa8e   :  { %v1969_v22 = vshrl.u32 %v1964_v52, 16  ;;  %v5756_v42 = vor.u32 4788187, %v1571_v54  ;;  %v1868_v31 = vsel %vm1866_vm12, %v1867_v12, %v5735_v59  ;;  %v1967_v55 = vshrl.u32 %v5724_v45, 16 }
 0xa8f   :  { %v1990_v61 = vand.u32 65535, %v1960_v38  ;;  %v5762_v35 = vmul.f32 %v5747_v20, %v5747_v20  ;;  %v1719_v17 = vsub.s32 32, %v5696_v63  ;;  %v1869_v19 = vclz %v1868_v31 }
 0xa90   :  { %v1971_v51 = vmul.u32 %v1969_v22, %v1966_v13  ;;  %v1575_v30 = vcvt.s32.f32 %v5751_v39  ;;  %v1703_v14 = vadd.s32 %v5457_v34, %v5446_v48  ;;  %v1972_v2 = vmul.u32 %v1968_v4, %v1967_v55 }
 0xa91   :  { %v1993_v6 = vmul.u32 %v1991_v25, %v1966_v13  ;;  %v1725_v54 = vshll.u32 %v1724_v8, 23  ;;  %v3981_v52 = vadd.s32 4294967294, %v1869_v19  ;;  %v1970_v12 = vmul.u32 %v1968_v4, %v1966_v13 }
 0xa92   :  { %v1974_v21 = vshll.u32 %v1971_v51, 16  ;;  %v1573_v38 = vand.u32 2147483647, %v5756_v42  ;;  %v1992_v57 = vmul.u32 %v1990_v61, %v1966_v13  ;;  %v1994_v60 = vmul.u32 %v1990_v61, %v1967_v55 }
 0xa93   :  { %v1996_v33 = vshll.u32 %v1993_v6, 16  ;;  %v1721_v62 = vshrl.u32 %v1703_v14, %v1719_v17  ;;  %v1973_v20 = vmul.u32 %v1969_v22, %v1967_v55  ;;  %v1720_v39 = vshll.u32 %v5614_v41, %v5696_v63 }
 0xa94   :  { %vm1978_vm15 = vc.u32 %v1970_v12, %v1974_v21  ;;  %v1980_v31 = vadd.s32 %v1974_v21, %v1970_v12  ;;  %v1976_v26 = vshll.u32 %v1972_v2, 16  ;;  %v1726_v34 = vor.u32 4788187, %v1725_v54 }
 0xa95   :  { %v1979_v48 = vsel %vm1978_vm15, 1, %v7062_v53  ;;  %vm2000_vm2 = vc.u32 %v1992_v57, %v1996_v33  ;;  %vm3982_vm1 = vcmp.lt.s32.totalorder %v3981_v52, 0  ;;  %v1995_v4 = vmul.u32 %v1991_v25, %v1967_v55 }
 0xa96   :  { %v1981_v8 = vadd.s32 %v1979_v48, %v1973_v20  ;;  %vm1139_vm4 = vcmp.eq.s32.totalorder %v5518_v36, 0  ;;  %vm1982_vm6 = vc.u32 %v1980_v31, %v1976_v26  ;;  %v1998_v13 = vshll.u32 %v1994_v60, 16 }
 0xa97   :  { %v2001_v42 = vsel %vm2000_vm2, 1, %v7062_v53  ;;  %v2002_v22 = vadd.s32 %v1996_v33, %v1992_v57  ;;  %v1722_v61 = vor.u32 %v1721_v62, %v1720_v39  ;;  %v1954_v21 = vsel %vm1952_vm13, %v5687_v44, 2102212464  ;;  %v7110_v39 = vld [vmem:[#allocation46_spill] sm:$0xff] }
 0xa98   :  { %v1983_v41 = vsel %vm1982_vm6, 1, %v7062_v53  ;;  %v2003_v63 = vadd.s32 %v2001_v42, %v1995_v4  ;;  %v5778_v17 = vsel %vm3982_vm1, 0, %v3981_v52  ;;  %v1975_v19 = vshrl.u32 %v1971_v51, 16  ;;  %v7112_v42 = vld [vmem:[#allocation44_spill] sm:$0xff] }
 0xa99   :  { %v1985_v20 = vadd.s32 %v1983_v41, %v1981_v8  ;;  %vm2004_vm8 = vc.u32 %v2002_v22, %v1998_v13  ;;  %v1727_v25 = vand.u32 2147483647, %v1726_v34  ;;  %v1933_v26 = vshrl.u32 %v7070_v47, %v5641_v56  ;;  %v7111_v8 = vld [vmem:[#allocation29_spill] sm:$0xff] }
 0xa9a   :  { %v1977_v55 = vshrl.u32 %v1972_v2, 16  ;;  %v2005_v33 = vsel %vm2004_vm8, 1, %v7062_v53  ;;  %v1997_v62 = vshrl.u32 %v1993_v6, 16  ;;  %v2074_v44 = vand.u32 2139095040, %v5514_v3 }
 0xa9b   :  { %v1986_v57 = vadd.s32 %v1985_v20, %v1975_v19  ;;  %v2007_v14 = vadd.s32 %v2005_v33, %v2003_v63  ;;  %v1729_v54 = vcvt.s32.f32 %v1722_v61  ;;  %v1877_v12 = vsub.s32 4294967266, %v5778_v17 }
 0xa9c   :  { %v1953_v51 = vsel %vm1949_vm14, %v1933_v26, %v5683_v27  ;;  %v1955_v52 = vsel %vm1951_vm11, %v5685_v0, %v1954_v21  ;;  %vm1138_vm9 = vcmp.lt.s32.totalorder %v5518_v36, 2  ;;  %v1999_v2 = vshrl.u32 %v1994_v60, 16 }
 0xa9d   :  { %v5792_v56 = vadd.s32 %v1986_v57, %v1977_v55  ;;  %v2008_v6 = vadd.s32 %v2007_v14, %v1997_v62  ;;  %v2075_v31 = vshrl.u32 %v2074_v44, 23  ;;  %v1425_v48 = vsub.s32 4, %v7110_v39 }
 0xa9e   :  { %v1437_v34 = vmul.f32 -0.00019511016, %v5762_v35  ;;  %vm1457_vm5 = vcmp.lt.s32.totalorder %v7111_v8, 0  ;;  %v1576_v4 = vmul.f32 %v1575_v30, %v1573_v38  ;;  %vm1611_vm13 = vcmp.lt.s32.totalorder %v7112_v42, 0 }
 0xa9f   :  { %v5798_v27 = vadd.s32 %v2002_v22, %v1998_v13  ;;  %v1730_v61 = vmul.f32 %v1729_v54, %v1727_v25  ;;  %v1956_v0 = vsel %vm1950_vm10, %v1953_v51, %v1955_v52  ;;  %v2009_v21 = vadd.s32 %v2008_v6, %v1999_v2 }
 0xaa0   :  { %v3986_v41 = vadd.s32 4294967169, %v2075_v31  ;;  %v7113_v60 = vxor.u32 2147483648, %v5531_v32  ;;  %v1279_v19 = vadd.f32 -0.4999988, %v5739_v29  ;;  %v1878_v20 = vadd.s32 127, %v1877_v12 }
 0xaa1   :  { %vm2012_vm14 = vc.u32 %v5792_v56, %v5798_v27  ;;  %v1286_v30 = vadd.f32 -0.16666654, %v5742_v18  ;;  %v1430_v38 = vmul.f32 -0.001358992, %v5762_v35  ;;  %v7114_v7 = vand.u32 2147483647, %v7111_v8 }
 0xaa2   :  { %v1141_v63 = vsel %vm1139_vm4, %v5520_v23, %v7113_v60  ;;  %v7117_v22 = vand.u32 2147483647, %v7112_v42  ;;  %v2013_v29 = vadd.s32 1, %v2009_v21  ;;  %v2081_v26 = vadd.s32 1, %v3986_v41 }
 0xaa3   :  { %vm5814_vm11 = vcmp.le.f32.partialorder %v7114_v7, 0.7853982  ;;  %v1426_v18 = vsel %vm1303_vm7, %v1425_v48, %v7110_v39  ;;  %v1438_v55 = vadd.f32 0.008332121, %v1437_v34  ;;  %v1577_v33 = vxor.u32 2147483648, %v1576_v4 }
 0xaa4   :  { %vm5820_vm10 = vcmp.le.f32.partialorder %v7117_v22, 0.7853982  ;;  %v2010_v57 = vmul.u32 %v5724_v45, %v1956_v0  ;;  %v1731_v62 = vxor.u32 2147483648, %v1730_v61  ;;  %v1873_v14 = vsub.s32 32, %v5778_v17 }
 0xaa5   :  { %v2014_v44 = vsel %vm2012_vm14, %v2013_v29, %v2009_v21  ;;  %vm2082_vm12 = vcmp.gt.s32.totalorder %v2081_v26, 0  ;;  %v1879_v54 = vshll.u32 %v1878_v20, 23  ;;  %v6969_v51 = vand.u32 2147483647, %v5514_v3 }
 0xaa6   :  { %v2015_v12 = vadd.s32 %v2014_v44, %v2010_v57  ;;  %v2083_v52 = vsel %vm2082_vm12, %v2081_v26, 0  ;;  %v1287_v2 = vmul.f32 %v1286_v30, %v5535_v11  ;;  %v1431_v6 = vadd.f32 0.041655596, %v1430_v38 }
 0xaa7   :  { %v1857_v31 = vadd.s32 %v5650_v43, %v5648_v5  ;;  %v2085_v39 = vand.u32 31, %v2083_v52  ;;  %v5836_v45 = vsel %vm1138_vm9, %v1141_v63, %v5731_v1  ;;  %v5840_v48 = vsel %vm5679_vm3, 0, %v1426_v18 }
 0xaa8   :  { %v1439_v34 = vmul.f32 %v1438_v55, %v5762_v35  ;;  %v2016_v0 = vadd.s32 536870912, %v2015_v12  ;;  %v1578_v21 = vsel %vm1457_vm5, %v1577_v33, %v1576_v4  ;;  %v1732_v41 = vsel %vm1611_vm13, %v1731_v62, %v1730_v61 }
 0xaa9   :  { %v1875_v5 = vshrl.u32 %v1857_v31, %v1873_v14  ;;  %v5847_v43 = vsub.s32 32, %v2085_v39  ;;  %v5850_v36 = vmul.f32 %v1279_v19, %v5535_v11  ;;  %v1880_v1 = vor.u32 4788187, %v1879_v54 }
 0xaaa   :  { %v5852_v60 = vshrl.u32 %v2016_v0, 30  ;;  %v2078_v46 = vand.u32 8388607, %v6969_v51  ;;  %v5856_v63 = vadd.f32 1.0, %v1287_v2  ;;  %v5859_v20 = vmul.f32 %v1431_v6, %v5762_v35 }
 0xaab   :  { %v5862_v4 = vand.u32 3, %v5840_v48  ;;  %v1874_v61 = vshll.u32 %v5735_v59, %v5778_v17  ;;  %v5866_v30 = vadd.f32 -0.16666654, %v1439_v34  ;;  %v5871_v11 = vsel %vm5814_vm11, %v7111_v8, %v1578_v21 }
 0xaac   :  { %v5876_v19 = vsel %vm5820_vm10, %v7112_v42, %v1732_v41  ;;  %v2018_v38 = vshll.u32 %v5852_v60, 30  ;;  %v2089_v22 = vshrl.u32 %v7064_v58, %v5847_v43  ;;  %v2092_v59 = vshrl.u32 %v7065_v16, %v5847_v43 }
 0xaad   :  { %v1876_v7 = vor.u32 %v1875_v5, %v1874_v61  ;;  %v2098_v17 = vshrl.u32 %v7071_v9, %v5847_v43  ;;  %v1881_v29 = vand.u32 2147483647, %v1880_v1  ;;  %v2079_v18 = vor.u32 8388608, %v2078_v46 }
 0xaae   :  { %v5885_v26 = vsub.s32 %v2015_v12, %v2018_v38  ;;  %v2095_v55 = vshrl.u32 %v7068_v40, %v5847_v43  ;;  %v5889_v33 = vshrl.u32 %v2083_v52, 5  ;;  %v2088_v57 = vshll.u32 %v7070_v47, %v2085_v39 }
 0xaaf   :  { %v2091_v62 = vshll.u32 %v7064_v58, %v2085_v39  ;;  %v2097_v14 = vshll.u32 %v7068_v40, %v2085_v39  ;;  %v2094_v54 = vshll.u32 %v7065_v16, %v2085_v39  ;;  %v2101_v12 = vshrl.u32 %v7097_v50, %v5847_v43 }
 0xab0   :  { %vm2020_vm7 = vcmp.lt.s32.totalorder %v5885_v26, 0  ;;  %v2021_v44 = vsub.s32 0, %v5885_v26  ;;  %v1883_v2 = vcvt.s32.f32 %v1876_v7  ;;  %v5899_v6 = vor.u32 %v2089_v22, %v2088_v57 }
 0xab1   :  { %v5901_v52 = vor.u32 %v2092_v59, %v2091_v62  ;;  %v2099_v31 = vor.u32 %v2098_v17, %v2097_v14  ;;  %v5905_v58 = vmul.f32 %v5871_v11, %v5871_v11  ;;  %v2096_v34 = vor.u32 %v2095_v55, %v2094_v54 }
 0xab2   :  { %v2022_v40 = vsel %vm2020_vm7, %v2021_v44, %v5885_v26  ;;  %v2100_v0 = vshll.u32 %v7071_v9, %v2085_v39  ;;  %v5911_v16 = vmul.f32 %v5876_v19, %v5876_v19  ;;  %vm1765_vm3 = vcmp.lt.s32.totalorder %v5240_v24, 0 }
 0xab3   :  { %v1884_v50 = vmul.f32 %v1883_v2, %v1881_v29  ;;  %v2023_v21 = vclz %v2022_v40  ;;  %vm2103_vm15 = vcmp.lt.s32.totalorder %v5889_v33, 1  ;;  %vm2106_vm2 = vcmp.lt.s32.totalorder %v5889_v33, 4 }
 0xab4   :  { %v2102_v41 = vor.u32 %v2101_v12, %v2100_v0  ;;  %v5916_v5 = vshll.u32 %v2079_v18, 8  ;;  %vm2105_vm1 = vcmp.lt.s32.totalorder %v5889_v33, 3  ;;  %v2111_v9 = vsel %vm2103_vm15, %v5899_v6, %v5901_v52 }
 0xab5   :  { %v3984_v1 = vadd.s32 4294967294, %v2023_v21  ;;  %v2112_v39 = vsel %vm2106_vm2, %v2099_v31, 920167782  ;;  %v1591_v46 = vmul.f32 -0.00019511016, %v5905_v58  ;;  %vm2104_vm6 = vcmp.lt.s32.totalorder %v5889_v33, 2 }
 0xab6   :  { %v7120_v61 = vand.u32 2147483647, %v5240_v24  ;;  %v2113_v7 = vsel %vm2105_vm1, %v2096_v34, %v2112_v39  ;;  %v1885_v22 = vxor.u32 2147483648, %v1884_v50  ;;  %v2115_v17 = vsel %vm2103_vm15, %v5901_v52, %v2096_v34 }
 0xab7   :  { %vm3985_vm8 = vcmp.lt.s32.totalorder %v3984_v1, 0  ;;  %v2114_v59 = vsel %vm2104_vm6, %v2111_v9, %v2113_v7  ;;  %v1745_v29 = vmul.f32 -0.00019511016, %v5911_v16  ;;  %v2011_v18 = vadd.s32 %v5798_v27, %v5792_v56 }
 0xab8   :  { %vm5928_vm4 = vcmp.le.f32.partialorder %v7120_v61, 0.7853982  ;;  %v2026_v55 = vsel %vm3985_vm8, 0, %v3984_v1  ;;  %v2116_v57 = vsel %vm2106_vm2, %v2102_v41, 1326507024  ;;  %v2120_v54 = vand.u32 65535, %v5916_v5 }
 0xab9   :  { %v2027_v62 = vsub.s32 32, %v2026_v55  ;;  %v2031_v14 = vsub.s32 4294967266, %v2026_v55  ;;  %v2117_v44 = vsel %vm2105_vm1, %v2099_v31, %v2116_v57  ;;  %v2121_v2 = vshrl.u32 %v5916_v5, 16 }
 0xaba   :  { %v2118_v12 = vsel %vm2104_vm6, %v2115_v17, %v2117_v44  ;;  %v2144_v40 = vand.u32 65535, %v2114_v59  ;;  %v2145_v0 = vshrl.u32 %v2114_v59, 16  ;;  %v1886_v56 = vsel %vm1765_vm3, %v1885_v22, %v1884_v50 }
 0xabb   :  { %v2029_v27 = vshrl.u32 %v2011_v18, %v2027_v62  ;;  %v2032_v21 = vadd.s32 127, %v2031_v14  ;;  %v2122_v41 = vand.u32 65535, %v2118_v12  ;;  %v1584_v1 = vmul.f32 -0.001358992, %v5905_v58 }
 0xabc   :  { %v1592_v9 = vadd.f32 0.008332121, %v1591_v46  ;;  %v2123_v39 = vshrl.u32 %v2118_v12, 16  ;;  %v2147_v31 = vmul.u32 %v2145_v0, %v2120_v54  ;;  %v1746_v61 = vadd.f32 0.008332121, %v1745_v29 }
 0xabd   :  { %v2028_v7 = vshll.u32 %v5885_v26, %v2026_v55  ;;  %v2033_v57 = vshll.u32 %v2032_v21, 23  ;;  %v2126_v17 = vmul.u32 %v2122_v41, %v2121_v2  ;;  %v5958_v59 = vsel %vm5928_vm4, %v5240_v24, %v1886_v56 }
 0xabe   :  { %v2087_v50 = vshrl.u32 %v7070_v47, %v5847_v43  ;;  %v2125_v22 = vmul.u32 %v2123_v39, %v2120_v54  ;;  %v2148_v18 = vmul.u32 %v2144_v40, %v2121_v2  ;;  %v2108_v46 = vsel %vm2106_vm2, %v2096_v34, 2102212464 }
 0xabf   :  { %v2030_v62 = vor.u32 %v2029_v27, %v2028_v7  ;;  %v2034_v14 = vor.u32 4788187, %v2033_v57  ;;  %v2146_v29 = vmul.u32 %v2144_v40, %v2120_v54  ;;  %v2124_v44 = vmul.u32 %v2122_v41, %v2120_v54 }
 0xac0   :  { %v2127_v26 = vmul.u32 %v2123_v39, %v2121_v2  ;;  %v2128_v55 = vshll.u32 %v2125_v22, 16  ;;  %v2150_v12 = vshll.u32 %v2147_v31, 16  ;;  %v2130_v51 = vshll.u32 %v2126_v17, 16 }
 0xac1   :  { %v2035_v21 = vand.u32 2147483647, %v2034_v14  ;;  %v2149_v23 = vmul.u32 %v2145_v0, %v2121_v2  ;;  %v2152_v56 = vshll.u32 %v2148_v18, 16  ;;  %v2037_v43 = vcvt.s32.f32 %v2030_v62 }
 0xac2   :  { %vm2132_vm9 = vc.u32 %v2124_v44, %v2128_v55  ;;  %v2134_v32 = vadd.s32 %v2128_v55, %v2124_v44  ;;  %vm2154_vm14 = vc.u32 %v2146_v29, %v2150_v12  ;;  %v2156_v47 = vadd.s32 %v2150_v12, %v2146_v29 }
 0xac3   :  { %v2107_v27 = vsel %vm2103_vm15, %v2087_v50, %v5899_v6  ;;  %v2133_v34 = vsel %vm2132_vm9, 1, %v7062_v53  ;;  %v2155_v54 = vsel %vm2154_vm14, 1, %v7062_v53  ;;  %v2109_v2 = vsel %vm2105_vm1, %v5901_v52, %v2108_v46 }
 0xac4   :  { %v2135_v40 = vadd.s32 %v2133_v34, %v2127_v26  ;;  %vm2136_vm12 = vc.u32 %v2134_v32, %v2130_v51  ;;  %v2157_v41 = vadd.s32 %v2155_v54, %v2149_v23  ;;  %vm2158_vm7 = vc.u32 %v2156_v47, %v2152_v56 }
 0xac5   :  { %v2129_v0 = vshrl.u32 %v2125_v22, 16  ;;  %v2137_v39 = vsel %vm2136_vm12, 1, %v7062_v53  ;;  %v2159_v7 = vsel %vm2158_vm7, 1, %v7062_v53  ;;  %v2038_v57 = vmul.f32 %v2037_v43, %v2035_v21 }
 0xac6   :  { %v2139_v62 = vadd.s32 %v2137_v39, %v2135_v40  ;;  %v2151_v6 = vshrl.u32 %v2147_v31, 16  ;;  %v2161_v50 = vadd.s32 %v2159_v7, %v2157_v41  ;;  %v1433_v14 = vadd.f32 -0.4999988, %v5859_v20 }
 0xac7   :  { %v1441_v32 = vmul.f32 %v5866_v30, %v5762_v35  ;;  %v1593_v23 = vmul.f32 %v1592_v9, %v5905_v58  ;;  %v1738_v51 = vmul.f32 -0.001358992, %v5911_v16  ;;  %v2131_v29 = vshrl.u32 %v2126_v17, 16 }
 0xac8   :  { %v2140_v52 = vadd.s32 %v2139_v62, %v2129_v0  ;;  %v2153_v22 = vshrl.u32 %v2148_v18, 16  ;;  %v2162_v46 = vadd.s32 %v2161_v50, %v2151_v6  ;;  %v1585_v44 = vadd.f32 0.041655596, %v1584_v1 }
 0xac9   :  { %v1747_v53 = vmul.f32 %v1746_v61, %v5911_v16  ;;  %v5982_v31 = vmul.f32 %v5958_v59, %v5958_v59  ;;  %v2110_v20 = vsel %vm2104_vm6, %v2107_v27, %v2109_v2  ;;  %v2039_v26 = vxor.u32 2147483648, %v2038_v57  ;;  %v7123_v27 = vld [vmem:[#allocation61_spill] sm:$0xff]  ;;  %v7124_v2 = vld [vmem:[#allocation48_spill] sm:$0xff] }
 0xaca   :  { %v5986_v30 = vadd.s32 %v2140_v52, %v2131_v29  ;;  %v5988_v9 = vadd.s32 %v2156_v47, %v2152_v56  ;;  %v2163_v55 = vadd.s32 %v2162_v46, %v2153_v22  ;;  %v5991_v17 = vadd.f32 1.0, %v5850_v36 }
 0xacb   :  { %v5995_v1 = vmul.f32 %v5856_v63, %v5499_v15  ;;  %v1434_v61 = vmul.f32 %v1433_v14, %v5762_v35  ;;  %v1739_v18 = vadd.f32 0.041655596, %v1738_v51  ;;  %v1442_v12 = vadd.f32 1.0, %v1441_v32 }
 0xacc   :  { %v1594_v21 = vadd.f32 -0.16666654, %v1593_v23  ;;  %vm2166_vm15 = vc.u32 %v5986_v30, %v5988_v9  ;;  %v2167_v33 = vadd.s32 1, %v2163_v55  ;;  %vm1293_vm2 = vcmp.eq.s32.totalorder %v5523_v49, 0 }
 0xacd   :  { %vm1296_vm1 = vcmp.eq.s32.totalorder %v5523_v49, 2  ;;  %v1748_v56 = vadd.f32 -0.16666654, %v1747_v53  ;;  %v1899_v36 = vmul.f32 -0.00019511016, %v5982_v31  ;;  %vm1919_vm6 = vcmp.lt.s32.totalorder %v5511_v10, 0 }
 0xace   :  { %v2164_v15 = vmul.u32 %v5916_v5, %v2110_v20  ;;  %v1579_v35 = vsub.s32 4, %v5452_v28  ;;  %v1586_v63 = vmul.f32 %v1585_v44, %v5905_v58  ;;  %v2040_v47 = vsel %vm1919_vm6, %v2039_v26, %v2038_v57 }
 0xacf   :  { %v2168_v43 = vsel %vm2166_vm15, %v2167_v33, %v2163_v55  ;;  %vm1447_vm8 = vcmp.eq.s32.totalorder %v5862_v4, 0  ;;  %v1733_v34 = vsub.s32 4, %v7123_v27  ;;  %v1740_v54 = vmul.f32 %v1739_v18, %v5911_v16 }
 0xad0   :  { %v2169_v40 = vadd.s32 %v2168_v43, %v2164_v15  ;;  %v6980_v41 = vxor.u32 2147483648, %v5991_v17  ;;  %v6014_v0 = vmul.f32 %v1442_v12, %v7124_v2  ;;  %v1595_v5 = vmul.f32 %v1594_v21, %v5905_v58 }
 0xad1   :  { %v7125_v39 = vand.u32 2147483647, %v5511_v10  ;;  %vm1292_vm14 = vcmp.lt.s32.totalorder %v5523_v49, 2  ;;  %v1749_v57 = vmul.f32 %v1748_v56, %v5911_v16  ;;  %v1900_v62 = vadd.f32 0.008332121, %v1899_v36  ;;  %v7129_v49 = vld [vmem:[#allocation18_spill] sm:$0xff] }
 0xad2   :  { %v2170_v50 = vadd.s32 536870912, %v2169_v40  ;;  %v6983_v14 = vxor.u32 2147483648, %v5995_v1  ;;  %v6031_v32 = vadd.f32 1.0, %v1434_v61  ;;  %v1580_v23 = vsel %vm1457_vm5, %v1579_v35, %v5452_v28 }
 0xad3   :  { %vm6019_vm9 = vcmp.le.f32.partialorder %v7125_v39, 0.7853982  ;;  %v1587_v51 = vadd.f32 -0.4999988, %v1586_v63  ;;  %vm1446_vm12 = vcmp.lt.s32.totalorder %v5862_v4, 2  ;;  %v1734_v29 = vsel %vm1611_vm13, %v1733_v34, %v7123_v27 }
 0xad4   :  { %v6028_v6 = vsel %vm6019_vm9, %v5511_v10, %v2040_v47  ;;  %v1741_v52 = vadd.f32 -0.4999988, %v1740_v54  ;;  %v1892_v22 = vmul.f32 -0.001358992, %v5982_v31  ;;  %v6041_v46 = vshrl.u32 %v2170_v50, 30  ;;  %v7128_v54 = vld [vmem:[#allocation21_spill] sm:$0xff] }
 0xad5   :  { %v6979_v44 = vxor.u32 2147483648, %v6014_v0  ;;  %vm1450_vm7 = vcmp.eq.s32.totalorder %v5862_v4, 2  ;;  %v1596_v53 = vadd.f32 1.0, %v1595_v5  ;;  %v6047_v28 = vmul.f32 %v6028_v6, %v6028_v6 }
 0xad6   :  { %v6051_v20 = vsel %vm5814_vm11, 0, %v1580_v23  ;;  %v1750_v26 = vadd.f32 1.0, %v1749_v57  ;;  %v1901_v55 = vmul.f32 %v1900_v62, %v5982_v31  ;;  %v2172_v61 = vshll.u32 %v6041_v46, 30 }
 0xad7   :  { %v1295_v18 = vsel %vm1293_vm2, %v5991_v17, %v6983_v14  ;;  %v1298_v12 = vsel %vm1296_vm1, %v6980_v41, %v5995_v1  ;;  %v6977_v13 = vxor.u32 2147483648, %v6031_v32  ;;  %v6068_v21 = vsel %vm5820_vm10, 0, %v1734_v29 }
 0xad8   :  { %v1588_v33 = vmul.f32 %v1587_v51, %v5905_v58  ;;  %v1742_v56 = vmul.f32 %v1741_v52, %v5911_v16  ;;  %v1893_v36 = vadd.f32 0.041655596, %v1892_v22  ;;  %v6072_v15 = vsub.s32 %v2169_v40, %v2172_v61  ;;  %v7130_v52 = vld [vmem:[#allocation19_spill] sm:$0xff] }
 0xad9   :  { %v1449_v35 = vsel %vm1447_vm8, %v6031_v32, %v6979_v44  ;;  %v6080_v63 = vmul.f32 %v1596_v53, %v5871_v11  ;;  %v1599_v25 = vand.u32 3, %v6051_v20  ;;  %v2053_v47 = vmul.f32 -0.00019511016, %v6047_v28 }
 0xada   :  { %v6085_v58 = vmul.f32 %v1750_v26, %v5876_v19  ;;  %v1902_v16 = vadd.f32 -0.16666654, %v1901_v55  ;;  %vm2174_vm5 = vcmp.lt.s32.totalorder %v6072_v15, 0  ;;  %v2175_v43 = vsub.s32 0, %v6072_v15 }
 0xadb   :  { %v1299_v27 = vsel %vm1292_vm14, %v1295_v18, %v1298_v12  ;;  %v1452_v11 = vsel %vm1450_vm7, %v6977_v13, %v6014_v0  ;;  %v1753_v34 = vand.u32 3, %v6068_v21  ;;  %v1887_v40 = vsub.s32 4, %v7128_v54  ;;  %v7143_v13 = vld [vmem:[#allocation36_spill] sm:$0xff] }
 0xadc   :  { %v6098_v19 = vadd.f32 1.0, %v1588_v33  ;;  %v6100_v2 = vadd.f32 1.0, %v1742_v56  ;;  %v1894_v5 = vmul.f32 %v1893_v36, %v5982_v31  ;;  %v2176_v39 = vsel %vm2174_vm5, %v2175_v43, %v6072_v15 }
 0xadd   :  { %vm1136_vm13 = vweird.f32 %v7129_v49  ;;  %v1453_v57 = vsel %vm1446_vm12, %v1449_v35, %v1452_v11  ;;  %v6978_v62 = vxor.u32 2147483648, %v6080_v63  ;;  %v2054_v50 = vadd.f32 0.008332121, %v2053_v47 }
 0xade   :  { %v2177_v23 = vclz %v2176_v39  ;;  %vm1600_vm11 = vcmp.lt.s32.totalorder %v1599_v25, 2  ;;  %vm1601_vm10 = vcmp.eq.s32.totalorder %v1599_v25, 0  ;;  %v6976_v51 = vxor.u32 2147483648, %v6085_v58 }
 0xadf   :  { %v1903_v29 = vmul.f32 %v1902_v16, %v5982_v31  ;;  %vm7010_vm15 = vweird.f32 %v7130_v52  ;;  %vm7009_vm2 = vweird.f32 %v7101_v37  ;;  %vm1604_vm1 = vcmp.eq.s32.totalorder %v1599_v25, 2 }
 0xae0   :  { %v1888_v4 = vsel %vm1765_vm3, %v1887_v40, %v7128_v54  ;;  %v2046_v22 = vmul.f32 -0.001358992, %v6047_v28  ;;  %v3987_v53 = vadd.s32 4294967294, %v2177_v23  ;;  %vm7008_vm8 = vweird.f32 %v7111_v8 }
 0xae1   :  { %v6975_v26 = vxor.u32 2147483648, %v6098_v19  ;;  %vm1755_vm14 = vcmp.eq.s32.totalorder %v1753_v34, 0  ;;  %v6974_v55 = vxor.u32 2147483648, %v6100_v2  ;;  %v1895_v61 = vadd.f32 -0.4999988, %v1894_v5 }
 0xae2   :  { %v1603_v18 = vsel %vm1601_vm10, %v6098_v19, %v6978_v62  ;;  %vm1758_vm12 = vcmp.eq.s32.totalorder %v1753_v34, 2  ;;  %v2055_v12 = vmul.f32 %v2054_v50, %v6047_v28  ;;  %vm3988_vm7 = vcmp.lt.s32.totalorder %v3987_v53, 0 }
 0xae3   :  { %v1757_v33 = vsel %vm1755_vm14, %v6100_v2, %v6976_v51  ;;  %v6128_v56 = vsel %vm5928_vm4, 0, %v1888_v4  ;;  %v1904_v36 = vadd.f32 1.0, %v1903_v29  ;;  %v2180_v35 = vsel %vm3988_vm7, 0, %v3987_v53 }
 0xae4   :  { %v2047_v47 = vadd.f32 0.041655596, %v2046_v22  ;;  %v2165_v16 = vadd.s32 %v5988_v9, %v5986_v30  ;;  %v2181_v43 = vsub.s32 32, %v2180_v35  ;;  %v2185_v11 = vsub.s32 4294967266, %v2180_v35 }
 0xae5   :  { %v1606_v54 = vsel %vm1604_vm1, %v6975_v26, %v6080_v63  ;;  %vm1754_vm3 = vcmp.lt.s32.totalorder %v1753_v34, 2  ;;  %v1760_v38 = vsel %vm1758_vm12, %v6974_v55, %v6085_v58  ;;  %v1896_v40 = vmul.f32 %v1895_v61, %v5982_v31  ;;  %v7141_v26 = vld [vmem:[#allocation35_spill] sm:$0xff] }
 0xae6   :  { %v2056_v5 = vadd.f32 -0.16666654, %v2055_v12  ;;  %v2182_v39 = vshll.u32 %v6072_v15, %v2180_v35  ;;  %v2183_v50 = vshrl.u32 %v2165_v16, %v2181_v43  ;;  %v2186_v23 = vadd.s32 127, %v2185_v11  ;;  %v4147_v43 = vld [vmem:[%s6881_s5 + $0x20] sm:$0xff]  ;;  %v7131_v11 = vld [vmem:[#allocation28_spill] sm:$0xff] }
 0xae7   :  { %v6144_v30 = vsel %vm1136_vm13, nan, %v5836_v45  ;;  %v1607_v9 = vsel %vm1600_vm11, %v1603_v18, %v1606_v54  ;;  %v1761_v29 = vsel %vm1754_vm3, %v1757_v33, %v1760_v38  ;;  %v1907_v34 = vand.u32 3, %v6128_v56  ;;  %v7132_v38 = vld [vmem:[#allocation30_spill] sm:$0xff] }
 0xae8   :  { %v6149_v4 = vmul.f32 %v1904_v36, %v5958_v59  ;;  %v2048_v31 = vmul.f32 %v2047_v47, %v6047_v28  ;;  %v2184_v22 = vor.u32 %v2183_v50, %v2182_v39  ;;  %v2187_v53 = vshll.u32 %v2186_v23, 23  ;;  %v3580_v47 = vld [vmem:[%s6881_s5 + $0x28] sm:$0xff] }
 0xae9   :  { %v6154_v15 = vsel %vm7010_vm15, nan, %v1299_v27  ;;  %v6158_v45 = vsel %vm7009_vm2, nan, %v1453_v57  ;;  %vm7001_vm4 = vweird.f32 %v7112_v42  ;;  %v2041_v25 = vsub.s32 4, %v5852_v60 }
 0xaea   :  { %v6164_v59 = vsel %vm7008_vm8, nan, %v1607_v9  ;;  %v6166_v61 = vadd.f32 1.0, %v1896_v40  ;;  %v2057_v18 = vmul.f32 %v2056_v5, %v6047_v28  ;;  %v2188_v12 = vor.u32 4788187, %v2187_v53  ;;  %v7133_v5 = vld [vmem:[#allocation31_spill] sm:$0xff]  ;;  %v7138_v53 = vld [vmem:[#allocation33_spill] sm:$0xff] }
 0xaeb   :  { %v6171_v27 = vsel %vm7001_vm4, nan, %v1761_v29  ;;  %vm1908_vm5 = vcmp.lt.s32.totalorder %v1907_v34, 2  ;;  %vm1909_vm11 = vcmp.eq.s32.totalorder %v1907_v34, 0  ;;  %vm1912_vm10 = vcmp.eq.s32.totalorder %v1907_v34, 2  ;;  %v7134_v29 = vld [vmem:[#allocation32_spill] sm:$0xff] }
 0xaec   :  { %v6981_v57 = vxor.u32 2147483648, %v6149_v4  ;;  %v2049_v33 = vadd.f32 -0.4999988, %v2048_v31  ;;  %vm2073_vm1 = vcmp.lt.s32.totalorder %v5514_v3, 0  ;;  %v2189_v36 = vand.u32 2147483647, %v2188_v12 }
 0xaed   :  { %v2191_v35 = vcvt.s32.f32 %v2184_v22  ;;  %v2042_v16 = vsel %vm1919_vm6, %v2041_v25, %v5852_v60  ;;  %v3575_v54 = vmul.f32 %v4147_v43, %v7131_v11  ;;  %v3576_v40 = vmul.f32 %v4147_v43, %v7132_v38  ;;  %v7139_v12 = vld [vmem:[#allocation34_spill] sm:$0xff]  ;;  %v3607_v22 = vld [vmem:[%s6881_s5 + $0x40] sm:$0xff] }
 0xaee   :  { %v3577_v39 = vmul.f32 %v4147_v43, %v7133_v5  ;;  %vm7000_vm14 = vweird.f32 %v5240_v24  ;;  %v6982_v50 = vxor.u32 2147483648, %v6166_v61  ;;  %v2058_v23 = vadd.f32 1.0, %v2057_v18 }
 0xaef   :  { %v2192_v9 = vmul.f32 %v2191_v35, %v2189_v36  ;;  %v3578_v31 = vmul.f32 %v4147_v43, %v7134_v29  ;;  %v7135_v60 = vand.u32 2147483647, %v5514_v3  ;;  %v3579_v25 = vmul.f32 %v4147_v43, %v7138_v53  ;;  %v7145_v43 = vld [vmem:[#allocation51_spill] sm:$0xff] }
 0xaf0   :  { %v6198_v55 = vadd.f32 %v3580_v47, %v7139_v12  ;;  %v6201_v51 = vadd.f32 %v3580_v47, %v7141_v26  ;;  %v6204_v62 = vadd.f32 %v3580_v47, %v7143_v13  ;;  %v1911_v18 = vsel %vm1909_vm11, %v6166_v61, %v6981_v57 }
 0xaf1   :  { %vm6192_vm6 = vcmp.le.f32.partialorder %v7135_v60, 0.7853982  ;;  %v2044_v36 = vsel %vm6019_vm9, 0, %v2042_v16  ;;  %v2050_v35 = vmul.f32 %v2049_v33, %v6047_v28  ;;  %v2377_v60 = vadd.s32 3, %v7145_v43 }
 0xaf2   :  { %7140 = vst [vmem:[#allocation49_spill] sm:$0xff] %v6198_v55  ;;  %v2193_v12 = vxor.u32 2147483648, %v2192_v9  ;;  %v6214_v44 = vadd.f32 %v3580_v47, %v3575_v54  ;;  %v6216_v26 = vadd.f32 %v3580_v47, %v3576_v40  ;;  %v6218_v41 = vadd.f32 %v3580_v47, %v3577_v39  ;;  %v4148_v40 = vld [vmem:[%s6881_s5 + $0x30] sm:$0xff] }
 0xaf3   :  { %7142 = vst [vmem:[#allocation46_spill] sm:$0xff] %v6201_v51  ;;  %v1914_v13 = vsel %vm1912_vm10, %v6982_v50, %v6149_v4  ;;  %v6225_v57 = vmul.f32 %v2058_v23, %v6028_v6  ;;  %v2195_v7 = vsub.s32 4, %v6041_v46  ;;  %v6228_v28 = vadd.f32 %v3580_v47, %v3578_v31  ;;  %v7151_v6 = vld [vmem:[#allocation53_spill] sm:$0xff] }
 0xaf4   :  { %7144 = vst [vmem:[#allocation29_spill] sm:$0xff] %v6204_v62  ;;  %v1915_v33 = vsel %vm1908_vm5, %v1911_v18, %v1914_v13  ;;  %v2061_v16 = vand.u32 3, %v2044_v36  ;;  %v6231_v54 = vadd.f32 %v3580_v47, %v3579_v25  ;;  %v3593_v39 = vmul.f32 %v4148_v40, %v7131_v11  ;;  %v7160_v62 = vld [vmem:[#allocation25_spill] sm:$0xff] }
 0xaf5   :  { %7146 = vst [vmem:[#allocation44_spill] sm:$0xff] %v6214_v44  ;;  %v6237_v43 = vadd.f32 1.0, %v2050_v35  ;;  %v6239_v50 = vand.u32 3, %v2377_v60  ;;  %v2532_v23 = vadd.s32 3, %v7151_v6  ;;  %v2687_v31 = vadd.s32 3, %v5840_v48 }
 0xaf6   :  { %7147 = vst [vmem:[#allocation61_spill] sm:$0xff] %v6216_v26  ;;  %v2194_v34 = vsel %vm2073_vm1, %v2193_v12, %v2192_v9  ;;  %v2842_v47 = vadd.s32 3, %v6051_v20  ;;  %v2997_v25 = vadd.s32 3, %v6068_v21  ;;  %v3594_v18 = vmul.f32 %v4148_v40, %v7132_v38  ;;  %v3598_v9 = vld [vmem:[%s6881_s5 + $0x38] sm:$0xff] }
 0xaf7   :  { %7148 = vst [vmem:[#allocation48_spill] sm:$0xff] %v6218_v41  ;;  %v6984_v13 = vxor.u32 2147483648, %v6225_v57  ;;  %v2196_v35 = vsel %vm2073_vm1, %v2195_v7, %v6041_v46  ;;  %v3152_v60 = vadd.s32 3, %v6128_v56  ;;  %v3307_v6 = vadd.s32 3, %v2044_v36  ;;  %v7157_v41 = vld [vmem:[#allocation39_spill] sm:$0xff] }
 0xaf8   :  { %7149 = vst [vmem:[#allocation21_spill] sm:$0xff] %v6228_v28  ;;  %v6255_v48 = vsel %vm7000_vm14, nan, %v1915_v33  ;;  %vm7007_vm9 = vweird.f32 %v5511_v10  ;;  %vm2062_vm12 = vcmp.lt.s32.totalorder %v2061_v16, 2  ;;  %vm2063_vm7 = vcmp.eq.s32.totalorder %v2061_v16, 0 }
 0xaf9   :  { %7150 = vst [vmem:[#allocation18_spill] sm:$0xff] %v6231_v54  ;;  %vm2066_vm3 = vcmp.eq.s32.totalorder %v2061_v16, 2  ;;  %v6993_v20 = vxor.u32 2147483648, %v6237_v43  ;;  %v6262_v21 = vsel %vm6192_vm6, %v5514_v3, %v2194_v34  ;;  %vm2380_vm5 = vcmp.eq.s32.totalorder %v6239_v50, 0  ;;  %v3616_v16 = vld [vmem:[%s6881_s5 + $0x48] sm:$0xff] }
 0xafa   :  { %7152 = vst [vmem:[#allocation19_spill] sm:$0xff] %v6262_v21  ;;  %v6265_v46 = vand.u32 3, %v2532_v23  ;;  %v6267_v56 = vand.u32 3, %v2687_v31  ;;  %v2198_v36 = vsel %vm6192_vm6, 0, %v2196_v35  ;;  %v6274_v12 = vand.u32 3, %v2842_v47  ;;  %v7153_v35 = vld [vmem:[#allocation37_spill] sm:$0xff] }
 0xafb   :  { %v6276_v7 = vand.u32 3, %v2997_v25  ;;  %v3595_v33 = vmul.f32 %v4148_v40, %v7133_v5  ;;  %v2065_v23 = vsel %vm2063_vm7, %v6237_v43, %v6984_v13  ;;  %vm2383_vm11 = vcmp.eq.s32.totalorder %v6239_v50, 2 }
 0xafc   :  { %v6283_v31 = vand.u32 3, %v3152_v60  ;;  %v6285_v34 = vand.u32 3, %v3307_v6  ;;  %v3596_v14 = vmul.f32 %v4148_v40, %v7134_v29  ;;  %v6293_v47 = vmul.f32 %v6262_v21, %v6262_v21  ;;  %v7155_v60 = vld [vmem:[#allocation38_spill] sm:$0xff]  ;;  %v7169_v21 = vld [vmem:[#allocation56_spill] sm:$0xff] }
 0xafd   :  { %vm2379_vm10 = vcmp.lt.s32.totalorder %v6239_v50, 2  ;;  %v3597_v25 = vmul.f32 %v4148_v40, %v7138_v53  ;;  %v6298_v13 = vadd.f32 %v3598_v9, %v7153_v35  ;;  %v6301_v6 = vadd.f32 %v3598_v9, %v7155_v60 }
 0xafe   :  { %v2068_v54 = vsel %vm2066_vm3, %v6993_v20, %v6225_v57  ;;  %v6307_v28 = vand.u32 3, %v2198_v36  ;;  %vm2535_vm1 = vcmp.eq.s32.totalorder %v6265_v46, 0  ;;  %v6311_v26 = vadd.f32 %v3598_v9, %v7157_v41  ;;  %v7162_v20 = vld [vmem:[#allocation27_spill] sm:$0xff] }
 0xaff   :  { %7154 = vst [vmem:[#allocation28_spill] sm:$0xff] %v6298_v13  ;;  %v6313_v44 = vadd.f32 %v3598_v9, %v3593_v39  ;;  %v2069_v40 = vsel %vm2062_vm12, %v2065_v23, %v2068_v54  ;;  %v3462_v35 = vadd.s32 3, %v2198_v36  ;;  %v3608_v60 = vmul.f32 %v3607_v22, %v7160_v62 }
 0xb00   :  { %7156 = vst [vmem:[#allocation34_spill] sm:$0xff] %v6301_v6  ;;  %v7161_v6 = vld [vmem:[#allocation26_spill] sm:$0xff]  ;;  %vm2538_vm6 = vcmp.eq.s32.totalorder %v6265_v46, 2  ;;  %vm2690_vm7 = vcmp.eq.s32.totalorder %v6267_v56, 0  ;;  %v3610_v3 = vmul.f32 %v3607_v22, %v7162_v20  ;;  %v3611_v13 = vmul.f32 %v3607_v22, %v7131_v11 }
 0xb01   :  { %7158 = vst [vmem:[#allocation35_spill] sm:$0xff] %v6311_v26  ;;  %v3609_v51 = vmul.f32 %v3607_v22, %v7161_v6  ;;  %v3612_v41 = vmul.f32 %v3607_v22, %v7132_v38  ;;  %v3613_v39 = vmul.f32 %v3607_v22, %v7133_v5  ;;  %v2207_v54 = vmul.f32 -0.00019511016, %v6293_v47 }
 0xb02   :  { %7159 = vst [vmem:[#allocation36_spill] sm:$0xff] %v6313_v44  ;;  %vm2534_vm12 = vcmp.lt.s32.totalorder %v6265_v46, 2  ;;  %vm2845_vm3 = vcmp.eq.s32.totalorder %v6274_v12, 0  ;;  %v6330_v36 = vadd.f32 %v3598_v9, %v3594_v18  ;;  %v3614_v23 = vmul.f32 %v3607_v22, %v7134_v29 }
 0xb03   :  { %v3615_v44 = vmul.f32 %v3607_v22, %v7138_v53  ;;  %v6336_v26 = vsel %vm7007_vm9, nan, %v2069_v40  ;;  %vm2693_vm0 = vcmp.eq.s32.totalorder %v6267_v56, 2  ;;  %vm3000_vm14 = vcmp.eq.s32.totalorder %v6276_v7, 0 }
 0xb04   :  { %7163 = vst [vmem:[#allocation51_spill] sm:$0xff] %v6330_v36  ;;  %vm3155_vm4 = vcmp.eq.s32.totalorder %v6283_v31, 0  ;;  %v6341_v5 = vadd.f32 %v3598_v9, %v3595_v33  ;;  %v6343_v55 = vadd.f32 %v3598_v9, %v3596_v14  ;;  %v6345_v18 = vadd.f32 %v3598_v9, %v3597_v25  ;;  %v7167_v36 = vld [vmem:[#allocation58_spill] sm:$0xff]  ;;  %v6364_v9 = vld [vmem:[%s6881_s5 + $0x50] sm:$0xff] }
 0xb05   :  { %v7168_v29 = vxor.u32 2147483648, %v7167_v36  ;;  %vm2848_vm8 = vcmp.eq.s32.totalorder %v6274_v12, 2  ;;  %v6355_v40 = vand.u32 3, %v3462_v35  ;;  %v6357_v33 = vadd.f32 %v3616_v16, %v3608_v60 }
 0xb06   :  { %7164 = vst [vmem:[#allocation53_spill] sm:$0xff] %v6341_v5  ;;  %v6359_v14 = vadd.f32 %v3616_v16, %v3609_v51  ;;  %v6371_v25 = vadd.f32 %v3616_v16, %v3611_v13  ;;  %v6373_v35 = vadd.f32 %v3616_v16, %v3612_v41  ;;  %v6375_v60 = vadd.f32 %v3616_v16, %v3613_v39  ;;  %v7179_v41 = vld [vmem:[#allocation45_spill] sm:$0xff] }
 0xb07   :  { %7165 = vst [vmem:[#allocation37_spill] sm:$0xff] %v6343_v55  ;;  %v2382_v22 = vsel %vm2380_vm5, %v7169_v21, %v7168_v29  ;;  %v6369_v29 = vadd.f32 %v3616_v16, %v3610_v3  ;;  %v2208_v51 = vadd.f32 0.008332121, %v2207_v54  ;;  %v7176_v53 = vxor.u32 2147483648, %v7169_v21 }
 0xb08   :  { %7166 = vst [vmem:[#allocation38_spill] sm:$0xff] %v6345_v18  ;;  %vm2999_vm15 = vcmp.lt.s32.totalorder %v6276_v7, 2  ;;  %vm3154_vm5 = vcmp.lt.s32.totalorder %v6283_v31, 2  ;;  %vm3313_vm9 = vcmp.eq.s32.totalorder %v6285_v34, 2  ;;  %v6385_v3 = vadd.f32 %v3616_v16, %v3614_v23  ;;  %v7181_v23 = vld [vmem:[#allocation47_spill] sm:$0xff] }
 0xb09   :  { %7170 = vst [vmem:[#allocation39_spill] sm:$0xff] %v6357_v33  ;;  %v2385_v18 = vsel %vm2383_vm11, %v7176_v53, %v7167_v36  ;;  %v6387_v13 = vadd.f32 %v3616_v16, %v3615_v44  ;;  %v6391_v39 = vmul.f32 %v7179_v41, %v6144_v30  ;;  %vm3309_vm2 = vcmp.lt.s32.totalorder %v6285_v34, 2  ;;  %v7187_v33 = vld [vmem:[#allocation54_spill] sm:$0xff] }
 0xb0a   :  { %7171 = vst [vmem:[#allocation25_spill] sm:$0xff] %v6359_v14  ;;  %v2386_v21 = vsel %vm2379_vm10, %v2382_v22, %v2385_v18  ;;  %v6398_v53 = vmul.f32 %v6364_v9, %v7160_v62  ;;  %v6402_v54 = vmul.f32 %v6364_v9, %v7161_v6  ;;  %v2200_v44 = vmul.f32 -0.001358992, %v6293_v47  ;;  %v7182_v22 = vld [vmem:[#allocation50_spill] sm:$0xff] }
 0xb0b   :  { %7172 = vst [vmem:[#allocation26_spill] sm:$0xff] %v6369_v29  ;;  %v7180_v16 = vxor.u32 2147483648, %v5995_v1  ;;  %v6412_v50 = vmul.f32 %v6364_v9, %v7162_v20  ;;  %v6416_v36 = vmul.f32 %v6364_v9, %v7131_v11  ;;  %v6420_v18 = vmul.f32 %v7181_v23, %v6154_v15 }
 0xb0c   :  { %7173 = vst [vmem:[#allocation27_spill] sm:$0xff] %v6371_v25  ;;  %v2387_v25 = vsel %vm1136_vm13, nan, %v2386_v21  ;;  %v7185_v15 = vxor.u32 2147483648, %v5991_v17  ;;  %v7186_v29 = vxor.u32 2147483648, %v6014_v0  ;;  %v2201_v21 = vadd.f32 0.041655596, %v2200_v44 }
 0xb0d   :  { %7174 = vst [vmem:[#allocation58_spill] sm:$0xff] %v6373_v35  ;;  %v2537_v30 = vsel %vm2535_vm1, %v5991_v17, %v7180_v16  ;;  %v6432_v16 = vmul.f32 %v6364_v9, %v7132_v38  ;;  %v2209_v35 = vmul.f32 %v2208_v51, %v6293_v47  ;;  %v6449_v38 = vmul.f32 %v7187_v33, %v6171_v27 }
 0xb0e   :  { %7175 = vst [vmem:[#allocation56_spill] sm:$0xff] %v6375_v60  ;;  %v7189_v51 = vxor.u32 2147483648, %v6080_v63  ;;  %v7191_v27 = vxor.u32 2147483648, %v6085_v58  ;;  %vm7193_vm13 = vcmp.lt.s32.totalorder %v6267_v56, 2  ;;  %vm7206_vm11 = vweird.f32 %v7130_v52 }
 0xb0f   :  { %7177 = vst [vmem:[#allocation62_spill] sm:$0xff] %v6385_v3  ;;  %v7183_v3 = vld [vmem:[#allocation52_spill] sm:$0xff]  ;;  %v2210_v14 = vadd.f32 -0.16666654, %v2209_v35  ;;  %vm7211_vm10 = vweird.f32 %v7112_v42  ;;  %vm7213_vm1 = vweird.f32 %v5511_v10 }
 0xb10   :  { %7178 = vst [vmem:[#allocation63_spill] sm:$0xff] %v6387_v13  ;;  %v6424_v13 = vmul.f32 %v7182_v22, %v6158_v45  ;;  %v6428_v60 = vmul.f32 %v7183_v3, %v6164_v59  ;;  %v2540_v45 = vsel %vm2538_vm6, %v7185_v15, %v5995_v1  ;;  %v2692_v59 = vsel %vm2690_vm7, %v6031_v32, %v7186_v29 }
 0xb11   :  { %7184 = vst [vmem:[#allocation45_spill] sm:$0xff] %v6432_v16  ;;  %v2541_v49 = vsel %vm2534_vm12, %v2537_v30, %v2540_v45  ;;  %v2847_v17 = vsel %vm2845_vm3, %v6098_v19, %v7189_v51  ;;  %v4013_v1 = vadd.f32 -1.0, %v6391_v39  ;;  %v7190_v15 = vxor.u32 2147483648, %v6031_v32 }
 0xb12   :  { %7188 = vst [vmem:[#allocation47_spill] sm:$0xff] %v6449_v38  ;;  %v3002_v46 = vsel %vm3000_vm14, %v6100_v2, %v7191_v27  ;;  %v7192_v30 = vxor.u32 2147483648, %v6149_v4  ;;  %v7194_v32 = vxor.u32 2147483648, %v6098_v19  ;;  %v7195_v51 = vxor.u32 2147483648, %v6225_v57 }
 0xb13   :  { %v2695_v29 = vsel %vm2693_vm0, %v7190_v15, %v6014_v0  ;;  %vm7196_vm0 = vcmp.eq.s32.totalorder %v6285_v34, 0  ;;  %v6487_v27 = vmul.f32 %v7179_v41, %v2387_v25  ;;  %vm7199_vm14 = vcmp.eq.s32.totalorder %v6276_v7, 2  ;;  %v7203_v41 = vld [vmem:[#allocation16_spill] sm:$0xff] }
 0xb14   :  { %v3157_v45 = vsel %vm3155_vm4, %v6166_v61, %v7192_v30  ;;  %v2696_v44 = vsel %vm7193_vm13, %v2692_v59, %v2695_v29  ;;  %v2850_v0 = vsel %vm2848_vm8, %v7194_v32, %v6080_v63  ;;  %v3312_v15 = vsel %vm7196_vm0, %v6237_v43, %v7195_v51 }
 0xb15   :  { %vm7197_vm4 = vcmp.lt.s32.totalorder %v6274_v12, 2  ;;  %v7198_v59 = vxor.u32 2147483648, %v6100_v2  ;;  %v7200_v63 = vxor.u32 2147483648, %v6166_v61  ;;  %vm7201_vm8 = vcmp.eq.s32.totalorder %v6283_v31, 2  ;;  %v7204_v61 = vld [vmem:[#allocation57_spill] sm:$0xff]  ;;  %v7207_v31 = vld [vmem:[#allocation59_spill] sm:$0xff] }
 0xb16   :  { %v2851_v56 = vsel %vm7197_vm4, %v2847_v17, %v2850_v0  ;;  %v7202_v12 = vxor.u32 2147483648, %v6237_v43  ;;  %v2202_v17 = vmul.f32 %v2201_v21, %v6293_v47  ;;  %v6514_v30 = vmul.f32 %v7204_v61, %v6255_v48 }
 0xb17   :  { %v3005_v19 = vsel %vm7199_vm14, %v7198_v59, %v6085_v58  ;;  %v3160_v29 = vsel %vm7201_vm8, %v7200_v63, %v6149_v4  ;;  %v3489_v58 = vmul.f32 %v4013_v1, %v7203_v41  ;;  %v2542_v4 = vsel %vm7206_vm11, nan, %v2541_v49 }
 0xb18   :  { %v3006_v25 = vsel %vm2999_vm15, %v3002_v46, %v3005_v19  ;;  %v3161_v35 = vsel %vm3154_vm5, %v3157_v45, %v3160_v29  ;;  %v3315_v2 = vsel %vm3313_vm9, %v7202_v12, %v6225_v57  ;;  %7205 = vst [vmem:[#allocation50_spill] sm:$0xff] %v6514_v30  ;;  %v6522_v43 = vmul.f32 %v7207_v31, %v6336_v26  ;;  %v7214_v19 = vld [vmem:[#allocation17_spill] sm:$0xff] }
 0xb19   :  { %v3316_v7 = vsel %vm3309_vm2, %v3312_v15, %v3315_v2  ;;  %vm7209_vm15 = vweird.f32 %v7101_v37  ;;  %vm7210_vm9 = vweird.f32 %v7111_v8  ;;  %v3497_v48 = vmul.f32 %v6487_v27, %v7203_v41  ;;  %v6539_v37 = vld [vmem:[%s6881_s5 + $0x10] sm:$0xff]  ;;  %v6544_v8 = vld [vmem:[%s6881_s5 + $0x18] sm:$0xff] }
 0xb1a   :  { %7208 = vst [vmem:[#allocation52_spill] sm:$0xff] %v6522_v43  ;;  %v2697_v57 = vsel %vm7209_vm15, nan, %v2696_v44  ;;  %v2852_v1 = vsel %vm7210_vm9, nan, %v2851_v56  ;;  %v2211_v21 = vmul.f32 %v2210_v14, %v6293_v47  ;;  %v3007_v52 = vsel %vm7211_vm10, nan, %v3006_v25 }
 0xb1b   :  { %vm7212_vm2 = vweird.f32 %v5240_v24  ;;  %v4014_v26 = vadd.f32 -1.0, %v6420_v18  ;;  %v3317_v14 = vsel %vm7213_vm1, nan, %v3316_v7  ;;  %v6549_v42 = vmul.f32 %v7181_v23, %v2542_v4  ;;  %v7220_v4 = vld [vmem:[#allocation40_spill] sm:$0xff]  ;;  %v7221_v7 = vld [vmem:[#allocation41_spill] sm:$0xff] }
 0xb1c   :  { %v3162_v34 = vsel %vm7212_vm2, nan, %v3161_v35  ;;  %v3507_v24 = vmul.f32 %v6539_v37, %v3489_v58  ;;  %v3531_v49 = vmul.f32 %v6544_v8, %v3489_v58  ;;  %v2203_v46 = vadd.f32 -0.4999988, %v2202_v17  ;;  %v7219_v17 = vld [vmem:[#allocation24_spill] sm:$0xff] }
 0xb1d   :  { %v4015_v45 = vadd.f32 -1.0, %v6424_v13  ;;  %v4016_v44 = vadd.f32 -1.0, %v6428_v60  ;;  %v4017_v32 = vadd.f32 -1.0, %v6449_v38  ;;  %v4018_v0 = vadd.f32 -1.0, %v6514_v30 }
 0xb1e   :  { %v4019_v51 = vadd.f32 -1.0, %v6522_v43  ;;  %v3515_v10 = vmul.f32 %v6544_v8, %v3497_v48  ;;  %v3539_v23 = vmul.f32 %v6539_v37, %v3497_v48  ;;  %v2212_v15 = vadd.f32 1.0, %v2211_v21  ;;  %v7228_v43 = vld [vmem:[#allocation34_spill] sm:$0xff] }
 0xb1f   :  { %v6561_v56 = vmul.f32 %v7182_v22, %v2697_v57  ;;  %v6564_v59 = vmul.f32 %v7183_v3, %v2852_v1  ;;  %v3490_v63 = vmul.f32 %v4014_v26, %v7214_v19  ;;  %v6568_v29 = vmul.f32 %v7187_v33, %v3007_v52  ;;  %v7218_v22 = vld [vmem:[#allocation20_spill] sm:$0xff] }
 0xb20   :  { %v6571_v25 = vmul.f32 %v7204_v61, %v3162_v34  ;;  %v3523_v35 = vsub.f32 %v3507_v24, %v3515_v10  ;;  %v3547_v12 = vadd.f32 %v3539_v23, %v3531_v49  ;;  %v2204_v2 = vmul.f32 %v2203_v46, %v6293_v47  ;;  %v7222_v47 = vld [vmem:[#allocation42_spill] sm:$0xff]  ;;  %v7225_v49 = vld [vmem:[#allocation28_spill] sm:$0xff] }
 0xb21   :  { %7215 = vst [vmem:[#allocation54_spill] sm:$0xff] %v6568_v29  ;;  %v6575_v41 = vmul.f32 %v7207_v31, %v3317_v14  ;;  %v3491_v58 = vmul.f32 %v4015_v45, %v7218_v22  ;;  %v3498_v3 = vmul.f32 %v6549_v42, %v7214_v19  ;;  %vm2217_vm6 = vcmp.eq.s32.totalorder %v6307_v28, 0  ;;  %v7223_v31 = vld [vmem:[#allocation19_spill] sm:$0xff]  ;;  %v7224_v14 = vld [vmem:[#allocation49_spill] sm:$0xff] }
 0xb22   :  { %7216 = vst [vmem:[#allocation16_spill] sm:$0xff] %v6571_v25  ;;  %v6582_v33 = vmul.f32 %v4016_v44, %v7219_v17  ;;  %v6585_v61 = vmul.f32 %v4017_v32, %v7220_v4  ;;  %v6588_v57 = vmul.f32 %v4018_v0, %v7221_v7  ;;  %v6591_v1 = vmul.f32 %v4019_v51, %v7222_v47 }
 0xb23   :  { %7217 = vst [vmem:[#allocation57_spill] sm:$0xff] %v6575_v41  ;;  %v2213_v48 = vmul.f32 %v2212_v15, %v7223_v31  ;;  %v3499_v21 = vmul.f32 %v6561_v56, %v7218_v22  ;;  %v6598_v52 = vmul.f32 %v6564_v59, %v7219_v17  ;;  %v3508_v34 = vmul.f32 %v6539_v37, %v3490_v63  ;;  %v7226_v22 = vld [vmem:[#allocation55_spill] sm:$0xff] }
 0xb24   :  { %vm2220_vm7 = vcmp.eq.s32.totalorder %v6307_v28, 2  ;;  %vm3465_vm12 = vcmp.eq.s32.totalorder %v6355_v40, 0  ;;  %v3532_v26 = vmul.f32 %v6544_v8, %v3490_v63  ;;  %v3643_v24 = vmul.f32 %v7224_v14, %v3523_v35 }
 0xb25   :  { %v3651_v46 = vmul.f32 %v7225_v49, %v3547_v12  ;;  %v3675_v45 = vmul.f32 %v7225_v49, %v3523_v35  ;;  %v2205_v44 = vadd.f32 1.0, %v2204_v2  ;;  %vm2216_vm3 = vcmp.lt.s32.totalorder %v6307_v28, 2 }
 0xb26   :  { %v6610_v32 = vmul.f32 %v6568_v29, %v7220_v4  ;;  %v3516_v0 = vmul.f32 %v6544_v8, %v3498_v3  ;;  %v3683_v51 = vmul.f32 %v7224_v14, %v3547_v12  ;;  %v6616_v10 = vmul.f32 %v6571_v25, %v7221_v7 }
 0xb27   :  { %v6620_v23 = vmul.f32 %v6575_v41, %v7222_v47  ;;  %v3509_v15 = vmul.f32 %v6539_v37, %v3491_v58  ;;  %v3540_v19 = vmul.f32 %v6539_v37, %v3498_v3  ;;  %v2218_v63 = vxor.u32 2147483648, %v2213_v48 }
 0xb28   :  { %vm3468_vm5 = vcmp.eq.s32.totalorder %v6355_v40, 2  ;;  %v3510_v35 = vmul.f32 %v6539_v37, %v6582_v33  ;;  %v3511_v12 = vmul.f32 %v6539_v37, %v6585_v61  ;;  %v3524_v2 = vsub.f32 %v3508_v34, %v3516_v0 }
 0xb29   :  { %vm2214_vm13 = vweird.f32 %v7226_v22  ;;  %vm3464_vm0 = vcmp.lt.s32.totalorder %v6355_v40, 2  ;;  %v3517_v17 = vmul.f32 %v6544_v8, %v3499_v21  ;;  %v3548_v4 = vadd.f32 %v3540_v19, %v3532_v26 }
 0xb2a   :  { %v3659_v7 = vsub.f32 %v3643_v24, %v3651_v46  ;;  %v3691_v47 = vadd.f32 %v3683_v51, %v3675_v45  ;;  %v2221_v3 = vxor.u32 2147483648, %v2205_v44  ;;  %v3512_v31 = vmul.f32 %v6539_v37, %v6588_v57  ;;  %v7227_v51 = vld [vmem:[#allocation46_spill] sm:$0xff] }
 0xb2b   :  { %v6636_v14 = vmul.f32 %v6539_v37, %v6591_v1  ;;  %v3518_v34 = vmul.f32 %v6544_v8, %v6598_v52  ;;  %v3519_v49 = vmul.f32 %v6544_v8, %v6610_v32  ;;  %v3520_v0 = vmul.f32 %v6544_v8, %v6616_v10 }
 0xb2c   :  { %v3525_v26 = vsub.f32 %v3509_v15, %v3517_v17  ;;  %v3533_v24 = vmul.f32 %v6544_v8, %v3491_v58  ;;  %v2219_v46 = vsel %vm2217_vm6, %v2205_v44, %v2218_v63  ;;  %v3541_v45 = vmul.f32 %v6539_v37, %v3499_v21 }
 0xb2d   :  { %v3644_v19 = vmul.f32 %v7227_v51, %v3524_v2  ;;  %v3707_v41 = vmul.f32 0.0, %v6391_v39  ;;  %v3652_v25 = vmul.f32 %v7228_v43, %v3548_v4  ;;  %v3667_v30 = vmul.f32 %v3659_v7, %v7160_v62 }
 0xb2e   :  { %v3699_v29 = vmul.f32 %v3691_v47, %v7160_v62  ;;  %v3708_v38 = vmul.f32 0.0, %v6487_v27  ;;  %v2222_v58 = vsel %vm2220_vm7, %v2221_v3, %v2213_v48  ;;  %v3467_v15 = vsel %vm3465_vm12, %v2205_v44, %v2218_v63 }
 0xb2f   :  { %v3676_v21 = vmul.f32 %v7228_v43, %v3524_v2  ;;  %v3684_v17 = vmul.f32 %v7227_v51, %v3548_v4  ;;  %v2223_v39 = vsel %vm2216_vm3, %v2219_v46, %v2222_v58  ;;  %v3549_v55 = vadd.f32 %v3541_v45, %v3533_v24 }
 0xb30   :  { %v3709_v16 = vsub.f32 %v3707_v41, %v3708_v38  ;;  %v3711_v7 = vadd.f32 %v3708_v38, %v3707_v41  ;;  %v3521_v62 = vmul.f32 %v6544_v8, %v6620_v23  ;;  %v3526_v27 = vsub.f32 %v3510_v35, %v3518_v34 }
 0xb31   :  { %v6664_v47 = vsub.f32 %v3511_v12, %v3519_v49  ;;  %v6666_v5 = vsub.f32 %v3512_v31, %v3520_v0  ;;  %v3470_v44 = vsel %vm3468_vm5, %v2221_v3, %v2213_v48  ;;  %v3660_v43 = vsub.f32 %v3644_v19, %v3652_v25  ;;  %v7229_v12 = vld [vmem:[#allocation29_spill] sm:$0xff]  ;;  %v7230_v31 = vld [vmem:[#allocation35_spill] sm:$0xff]  ;;  %v7231_v48 = vld [vmem:[#allocation60_spill] sm:$0xff] }
 0xb32   :  { %v6670_v63 = vadd.f32 %v3709_v16, %v3667_v30  ;;  %v6672_v2 = vadd.f32 %v3711_v7, %v3699_v29  ;;  %v2224_v28 = vsel %vm2214_vm13, nan, %v2223_v39  ;;  %v3471_v38 = vsel %vm3464_vm0, %v3467_v15, %v3470_v44  ;;  %v7232_v7 = vld [vmem:[#allocation44_spill] sm:$0xff] }
 0xb33   :  { %v3534_v41 = vmul.f32 %v6544_v8, %v6582_v33  ;;  %v3692_v35 = vadd.f32 %v3684_v17, %v3676_v21  ;;  %v3645_v4 = vmul.f32 %v7229_v12, %v3525_v26  ;;  %v3653_v34 = vmul.f32 %v7230_v31, %v3549_v55  ;;  %v7233_v44 = vld [vmem:[#allocation36_spill] sm:$0xff] }
 0xb34   :  { %v3724_v16 = vmul.f32 %v6670_v63, %v6420_v18  ;;  %v3725_v30 = vmul.f32 %v6672_v2, %v6549_v42  ;;  %v3677_v29 = vmul.f32 %v7230_v31, %v3525_v26  ;;  %v3685_v25 = vmul.f32 %v7229_v12, %v3549_v55 }
 0xb35   :  { %v3728_v40 = vmul.f32 %v6672_v2, %v6420_v18  ;;  %v3729_v33 = vmul.f32 %v6670_v63, %v6549_v42  ;;  %v6693_v3 = vmul.f32 %v7231_v48, %v2224_v28  ;;  %v3542_v49 = vmul.f32 %v6539_v37, %v6598_v52 }
 0xb36   :  { %v3668_v0 = vmul.f32 %v3660_v43, %v7161_v6  ;;  %v3726_v24 = vsub.f32 %v3724_v16, %v3725_v30  ;;  %v3535_v26 = vmul.f32 %v6544_v8, %v6585_v61  ;;  %v3536_v55 = vmul.f32 %v6544_v8, %v6588_v57  ;;  %v6742_v16 = vld [vmem:[%s6881_s5 + $0x58] sm:$0xff]  ;;  %v7235_v30 = vld [vmem:[#allocation31_spill] sm:$0xff] }
 0xb37   :  { %v3700_v18 = vmul.f32 %v3692_v35, %v7161_v6  ;;  %v3730_v46 = vadd.f32 %v3729_v33, %v3728_v40  ;;  %v3472_v42 = vsel %vm2214_vm13, nan, %v3471_v38  ;;  %v3537_v45 = vmul.f32 %v6544_v8, %v6591_v1 }
 0xb38   :  { %v3550_v51 = vadd.f32 %v3542_v49, %v3534_v41  ;;  %v6707_v52 = vadd.f32 %v3726_v24, %v3668_v0  ;;  %v3543_v19 = vmul.f32 %v6539_v37, %v6610_v32  ;;  %v3661_v58 = vsub.f32 %v3645_v4, %v3653_v34  ;;  %v7234_v4 = vld [vmem:[#allocation43_spill] sm:$0xff] }
 0xb39   :  { %v3693_v61 = vadd.f32 %v3685_v25, %v3677_v29  ;;  %v6711_v15 = vadd.f32 %v3730_v46, %v3700_v18  ;;  %v4020_v57 = vadd.f32 -1.0, %v6693_v3  ;;  %v3544_v6 = vmul.f32 %v6539_v37, %v6616_v10 }
 0xb3a   :  { %v3742_v22 = vmul.f32 %v6707_v52, %v6424_v13  ;;  %v3747_v1 = vmul.f32 %v6707_v52, %v6561_v56  ;;  %v6721_v21 = vmul.f32 %v7231_v48, %v3472_v42  ;;  %v3545_v32 = vmul.f32 %v6539_v37, %v6620_v23 }
 0xb3b   :  { %v3743_v17 = vmul.f32 %v6711_v15, %v6561_v56  ;;  %v3746_v39 = vmul.f32 %v6711_v15, %v6424_v13  ;;  %v3646_v10 = vmul.f32 %v7232_v7, %v3526_v27  ;;  %v3654_v43 = vmul.f32 %v7233_v44, %v3550_v51 }
 0xb3c   :  { %v3678_v28 = vmul.f32 %v7233_v44, %v3526_v27  ;;  %v3686_v38 = vmul.f32 %v7232_v7, %v3550_v51  ;;  %v3669_v41 = vmul.f32 %v3661_v58, %v7162_v20  ;;  %v3701_v35 = vmul.f32 %v3693_v61, %v7162_v20  ;;  %v7241_v44 = vld [vmem:[#allocation45_spill] sm:$0xff] }
 0xb3d   :  { %v3744_v12 = vsub.f32 %v3742_v22, %v3743_v17  ;;  %v3748_v23 = vadd.f32 %v3747_v1, %v3746_v39  ;;  %v3496_v31 = vmul.f32 %v4020_v57, %v7234_v4  ;;  %v6737_v56 = vsub.f32 %v6636_v14, %v3521_v62  ;;  %v7236_v14 = vld [vmem:[#allocation32_spill] sm:$0xff]  ;;  %v7240_v17 = vld [vmem:[#allocation53_spill] sm:$0xff] }
 0xb3e   :  { %v3551_v13 = vadd.f32 %v3543_v19, %v3535_v26  ;;  %v3552_v34 = vadd.f32 %v3544_v6, %v3536_v55  ;;  %v6744_v27 = vadd.f32 %v3545_v32, %v3537_v45  ;;  %v6748_v29 = vmul.f32 %v6364_v9, %v7235_v30  ;;  %v7237_v45 = vld [vmem:[#allocation61_spill] sm:$0xff]  ;;  %v7239_v32 = vld [vmem:[#allocation48_spill] sm:$0xff] }
 0xb3f   :  { %v3745_v20 = vadd.f32 %v3744_v12, %v3669_v41  ;;  %v3749_v25 = vadd.f32 %v3748_v23, %v3701_v35  ;;  %v3504_v40 = vmul.f32 %v6721_v21, %v7234_v4  ;;  %v6754_v62 = vmul.f32 %v6364_v9, %v7236_v14  ;;  %v7244_v23 = vld [vmem:[#allocation47_spill] sm:$0xff] }
 0xb40   :  { %v3662_v33 = vsub.f32 %v3646_v10, %v3654_v43  ;;  %v3694_v48 = vadd.f32 %v3686_v38, %v3678_v28  ;;  %v3635_v49 = vadd.f32 %v6742_v16, %v6398_v53  ;;  %v3636_v0 = vadd.f32 %v6742_v16, %v6402_v54  ;;  %v7238_v53 = vld [vmem:[#allocation51_spill] sm:$0xff]  ;;  %v7242_v43 = vld [vmem:[#allocation21_spill] sm:$0xff] }
 0xb41   :  { %v3637_v24 = vadd.f32 %v6742_v16, %v6412_v50  ;;  %v3760_v26 = vmul.f32 %v3745_v20, %v6428_v60  ;;  %v3514_v55 = vmul.f32 %v6539_v37, %v3496_v31  ;;  %v3761_v18 = vmul.f32 %v3749_v25, %v6564_v59 }
 0xb42   :  { %v3764_v46 = vmul.f32 %v3749_v25, %v6428_v60  ;;  %v3765_v42 = vmul.f32 %v3745_v20, %v6564_v59  ;;  %v3647_v51 = vmul.f32 %v7237_v45, %v6664_v47  ;;  %v3655_v19 = vmul.f32 %v7238_v53, %v3551_v13 }
 0xb43   :  { %v3679_v54 = vmul.f32 %v7238_v53, %v6664_v47  ;;  %v3687_v50 = vmul.f32 %v7237_v45, %v3551_v13  ;;  %v3670_v58 = vmul.f32 %v3662_v33, %v7131_v11  ;;  %v3702_v61 = vmul.f32 %v3694_v48, %v7131_v11 }
 0xb44   :  { %v3762_v57 = vsub.f32 %v3760_v26, %v3761_v18  ;;  %v3766_v6 = vadd.f32 %v3765_v42, %v3764_v46  ;;  %v3522_v60 = vmul.f32 %v6544_v8, %v3504_v40  ;;  %v3538_v59 = vmul.f32 %v6544_v8, %v3496_v31  ;;  %v7245_v31 = vld [vmem:[#allocation54_spill] sm:$0xff]  ;;  %v7246_v18 = vld [vmem:[#allocation25_spill] sm:$0xff] }
 0xb45   :  { %v3546_v22 = vmul.f32 %v6539_v37, %v3504_v40  ;;  %v3638_v1 = vadd.f32 %v6742_v16, %v6416_v36  ;;  %v3648_v47 = vmul.f32 %v7239_v32, %v6666_v5  ;;  %v3656_v39 = vmul.f32 %v7240_v17, %v3552_v34  ;;  %v7243_v37 = vld [vmem:[#allocation37_spill] sm:$0xff]  ;;  %v7247_v42 = vld [vmem:[#allocation30_spill] sm:$0xff] }
 0xb46   :  { %v3763_v7 = vadd.f32 %v3762_v57, %v3670_v58  ;;  %v3767_v10 = vadd.f32 %v3766_v6, %v3702_v61  ;;  %v3639_v11 = vadd.f32 %v6742_v16, %v7241_v44  ;;  %v3649_v28 = vmul.f32 %v7242_v43, %v6737_v56  ;;  %v7249_v61 = vld [vmem:[#allocation26_spill] sm:$0xff] }
 0xb47   :  { %v3663_v38 = vsub.f32 %v3647_v51, %v3655_v19  ;;  %v3695_v8 = vadd.f32 %v3687_v50, %v3679_v54  ;;  %v3530_v41 = vsub.f32 %v3514_v55, %v3522_v60  ;;  %v3657_v35 = vmul.f32 %v7243_v37, %v6744_v27  ;;  %v7248_v54 = vld [vmem:[#allocation39_spill] sm:$0xff] }
 0xb48   :  { %v3680_v36 = vmul.f32 %v7240_v17, %v6666_v5  ;;  %v3688_v12 = vmul.f32 %v7239_v32, %v3552_v34  ;;  %v3778_v4 = vmul.f32 %v3763_v7, %v7244_v23  ;;  %v3779_v13 = vmul.f32 %v3767_v10, %v7245_v31  ;;  %v7251_v17 = vld [vmem:[#allocation58_spill] sm:$0xff] }
 0xb49   :  { %v3782_v40 = vmul.f32 %v3767_v10, %v7244_v23  ;;  %v3783_v33 = vmul.f32 %v3763_v7, %v7245_v31  ;;  %v3554_v48 = vadd.f32 %v3546_v22, %v3538_v59  ;;  %v3664_v26 = vsub.f32 %v3648_v47, %v3656_v39  ;;  %v7250_v59 = vld [vmem:[#allocation27_spill] sm:$0xff] }
 0xb4a   :  { %v3732_v55 = vmul.f32 %v6707_v52, %v7246_v18  ;;  %v3733_v46 = vmul.f32 %v6711_v15, %v3636_v0  ;;  %v3671_v45 = vmul.f32 %v3663_v38, %v7247_v42  ;;  %v3703_v5 = vmul.f32 %v3695_v8, %v7247_v42  ;;  %v7257_v42 = vld [vmem:[#allocation52_spill] sm:$0xff] }
 0xb4b   :  { %v3780_v34 = vsub.f32 %v3778_v4, %v3779_v13  ;;  %v3784_v51 = vadd.f32 %v3783_v33, %v3782_v40  ;;  %v3665_v53 = vsub.f32 %v3649_v28, %v3657_v35  ;;  %v3696_v19 = vadd.f32 %v3688_v12, %v3680_v36  ;;  %v7255_v35 = vld [vmem:[#allocation38_spill] sm:$0xff] }
 0xb4c   :  { %v3713_v50 = vmul.f32 %v6670_v63, %v7248_v54  ;;  %v3714_v58 = vmul.f32 %v6672_v2, %v3635_v49  ;;  %v3750_v57 = vmul.f32 %v3745_v20, %v7249_v61  ;;  %v3751_v6 = vmul.f32 %v3749_v25, %v3637_v24  ;;  %v7252_v63 = vld [vmem:[#allocation50_spill] sm:$0xff]  ;;  %v7253_v20 = vld [vmem:[#allocation16_spill] sm:$0xff] }
 0xb4d   :  { %v3781_v60 = vadd.f32 %v3780_v34, %v3671_v45  ;;  %v3785_v52 = vadd.f32 %v3784_v51, %v3703_v5  ;;  %v3672_v15 = vmul.f32 %v3664_v26, %v7235_v30  ;;  %v3734_v0 = vsub.f32 %v3732_v55, %v3733_v46  ;;  %v7258_v34 = vld [vmem:[#allocation57_spill] sm:$0xff]  ;;  %v3876_v61 = vld [vmem:[%s6877_s1 + $0x68] sm:$0xff] }
 0xb4e   :  { %v3768_v22 = vmul.f32 %v3763_v7, %v7250_v59  ;;  %v3769_v32 = vmul.f32 %v3767_v10, %v3638_v1  ;;  %v3681_v47 = vmul.f32 %v7243_v37, %v6737_v56  ;;  %v3689_v2 = vmul.f32 %v7242_v43, %v6744_v27  ;;  %v7254_v27 = vld [vmem:[#allocation18_spill] sm:$0xff]  ;;  %3900 = vmatpush.msrb.mxu0 %v3876_v61 }
 0xb4f   :  { %v3786_v39 = vmul.f32 %v3781_v60, %v7251_v17  ;;  %v3787_v44 = vmul.f32 %v3785_v52, %v3639_v11  ;;  %v3796_v28 = vmul.f32 %v3781_v60, %v7252_v63  ;;  %v3797_v25 = vmul.f32 %v3785_v52, %v7253_v20 }
 0xb50   :  { %v3800_v49 = vmul.f32 %v3785_v52, %v7252_v63  ;;  %v3801_v24 = vmul.f32 %v3781_v60, %v7253_v20  ;;  %v3704_v7 = vmul.f32 %v3696_v19, %v7235_v30  ;;  %v3715_v1 = vsub.f32 %v3713_v50, %v3714_v58 }
 0xb51   :  { %vm3716_vm4 = vcmask 523264   ;;  %v3752_v10 = vsub.f32 %v3750_v57, %v3751_v6  ;;  %v3770_v38 = vsub.f32 %v3768_v22, %v3769_v32  ;;  %v3798_v11 = vsub.f32 %v3796_v28, %v3797_v25  ;;  %v3875_v57 = vld [vmem:[%s6877_s1 + $0x30] sm:$0xff]  ;;  %v7260_v25 = vld [vmem:[#allocation62_spill] sm:$0xff]  ;;  %s4248_s1 = smov [#allocation7]  }
 0xb52   :  { %v3735_v56 = vsel %vm3716_vm4, %v3734_v0, 0.0  ;;  %v3802_v8 = vadd.f32 %v3801_v24, %v3800_v49  ;;  %v3640_v37 = vadd.f32 %v6742_v16, %v6748_v29  ;;  %v3650_v43 = vmul.f32 %v7254_v27, %v3530_v41  ;;  %v7256_v29 = vld [vmem:[#allocation56_spill] sm:$0xff]  ;;  %3901 = vmatpush.msrb.mxu0 %v3875_v57 }
 0xb53   :  { %v3658_v36 = vmul.f32 %v7255_v35, %v3554_v48  ;;  %v3788_v12 = vsub.f32 %v3786_v39, %v3787_v44  ;;  %v3673_v23 = vmul.f32 %v3665_v53, %v7236_v14  ;;  %v3682_v30 = vmul.f32 %v7255_v35, %v3530_v41  ;;  %v7259_v44 = vld [vmem:[#allocation33_spill] sm:$0xff] }
 0xb54   :  { %v3799_v4 = vadd.f32 %v3798_v11, %v3672_v15  ;;  %v3803_v31 = vadd.f32 %v3802_v8, %v3704_v7  ;;  %v3697_v13 = vadd.f32 %v3689_v2, %v3681_v47  ;;  %v3717_v40 = vsel %vm3716_vm4, %v3715_v1, 0.0 }
 0xb55   :  { %v3736_v33 = vrot.slane %v3735_v56, 4  ;;  %v3753_v26 = vsel %vm3716_vm4, %v3752_v10, 0.0  ;;  %v3771_v18 = vsel %vm3716_vm4, %v3770_v38, 0.0  ;;  %v3789_v5 = vsel %vm3716_vm4, %v3788_v12, 0.0 }
 0xb56   :  { %v3804_v55 = vmul.f32 %v3799_v4, %v7256_v29  ;;  %v3805_v46 = vmul.f32 %v3803_v31, %v3640_v37  ;;  %v3814_v45 = vmul.f32 %v3799_v4, %v7257_v42  ;;  %v3815_v51 = vmul.f32 %v3803_v31, %v7258_v34 }
 0xb57   :  { %v3818_v41 = vmul.f32 %v3803_v31, %v7257_v42  ;;  %v3819_v53 = vmul.f32 %v3799_v4, %v7258_v34  ;;  %v3690_v19 = vmul.f32 %v7254_v27, %v3554_v48  ;;  %v3718_v54 = vrot.slane %v3717_v40, 4 }
 0xb58   :  { %v3754_v50 = vrot.slane %v3753_v26, 4  ;;  %v3806_v58 = vsub.f32 %v3804_v55, %v3805_v46  ;;  %v3705_v6 = vmul.f32 %v3697_v13, %v7236_v14  ;;  %v3772_v60 = vrot.slane %v3771_v18, 4 }
 0xb59   :  { %v3816_v52 = vsub.f32 %v3814_v45, %v3815_v51  ;;  %v3820_v15 = vadd.f32 %v3819_v53, %v3818_v41  ;;  %v3641_v48 = vadd.f32 %v6742_v16, %v6754_v62  ;;  %v3666_v0 = vsub.f32 %v3650_v43, %v3658_v36  ;;  %v7262_v41 = vld [vmem:[#allocation23_spill] sm:$0xff] }
 0xb5a   :  { %v3790_v59 = vrot.slane %v3789_v5, 4  ;;  %v3807_v22 = vsel %vm3716_vm4, %v3806_v58, 0.0  ;;  %v3737_v32 = vadd.f32 %v3736_v33, %v3735_v56  ;;  %v3633_v63 = vmul.f32 %v6364_v9, %v7259_v44 }
 0xb5b   :  { %v3808_v47 = vrot.slane %v3807_v22, 4  ;;  %v3817_v17 = vadd.f32 %v3816_v52, %v3673_v23  ;;  %v3821_v39 = vadd.f32 %v3820_v15, %v3705_v6  ;;  %v3698_v14 = vadd.f32 %v3690_v19, %v3682_v30 }
 0xb5c   :  { %v3719_v28 = vadd.f32 %v3718_v54, %v3717_v40  ;;  %v3755_v2 = vadd.f32 %v3754_v50, %v3753_v26  ;;  %v3773_v20 = vadd.f32 %v3772_v60, %v3771_v18  ;;  %v3791_v7 = vadd.f32 %v3790_v59, %v3789_v5  ;;  %v7261_v18 = vld [vmem:[#allocation63_spill] sm:$0xff] }
 0xb5d   :  { %v3822_v49 = vmul.f32 %v3817_v17, %v7260_v25  ;;  %v3823_v24 = vmul.f32 %v3821_v39, %v3641_v48  ;;  %v3832_v62 = vmul.f32 %v3817_v17, %v6693_v3  ;;  %v3833_v1 = vmul.f32 %v3821_v39, %v6721_v21 }
 0xb5e   :  { %v3836_v10 = vmul.f32 %v3821_v39, %v6693_v3  ;;  %v3837_v56 = vmul.f32 %v3817_v17, %v6721_v21  ;;  %v3674_v38 = vmul.f32 %v3666_v0, %v7259_v44  ;;  %v3738_v11 = vrot.slane %v3737_v32, 2 }
 0xb5f   :  { %v3809_v9 = vadd.f32 %v3808_v47, %v3807_v22  ;;  %v3824_v8 = vsub.f32 %v3822_v49, %v3823_v24  ;;  %v3706_v37 = vmul.f32 %v3698_v14, %v7259_v44  ;;  %v3756_v27 = vrot.slane %v3755_v2, 2 }
 0xb60   :  { %v3834_v43 = vsub.f32 %v3832_v62, %v3833_v1  ;;  %v3838_v35 = vadd.f32 %v3837_v56, %v3836_v10  ;;  %v3642_v36 = vadd.f32 %v6742_v16, %v3633_v63  ;;  %v3720_v12 = vrot.slane %v3719_v28, 2  ;;  %v4149_v63 = vld [vmem:[#allocation2 + $0x10] sm:$0xff]  ;;  %v7263_v1 = vld [vmem:[#allocation14_spill] sm:$0xff] }
 0xb61   :  { %v3774_v23 = vrot.slane %v3773_v20, 2  ;;  %v3825_v30 = vsel %vm3716_vm4, %v3824_v8, 0.0  ;;  %v3792_v4 = vrot.slane %v3791_v7, 2  ;;  %v3739_v13 = vadd.f32 %v3738_v11, %v3737_v32  ;;  %v7264_v11 = vld [vmem:[#allocation22_spill] sm:$0xff] }
 0xb62   :  { %v3826_v3 = vrot.slane %v3825_v30, 4  ;;  %v3835_v31 = vadd.f32 %v3834_v43, %v3674_v38  ;;  %v3839_v21 = vadd.f32 %v3838_v35, %v3706_v37  ;;  %v3810_v40 = vrot.slane %v3809_v9, 2 }
 0xb63   :  { %v3757_v33 = vadd.f32 %v3756_v27, %v3755_v2  ;;  %v3721_v46 = vadd.f32 %v3720_v12, %v3719_v28  ;;  %v3775_v42 = vadd.f32 %v3774_v23, %v3773_v20  ;;  %v3793_v45 = vadd.f32 %v3792_v4, %v3791_v7  ;;  %v7266_v27 = vld [vmem:[#allocation13_spill] sm:$0xff] }
 0xb64   :  { %v3827_v26 = vadd.f32 %v3826_v3, %v3825_v30  ;;  %v3840_v29 = vmul.f32 %v3835_v31, %v7261_v18  ;;  %v3841_v55 = vmul.f32 %v3839_v21, %v3642_v36  ;;  %v3740_v34 = vrot.slane %v3739_v13, 1  ;;  %v7267_v30 = vld [vmem:[#allocation15_spill] sm:$0xff] }
 0xb65   :  { %v3811_v51 = vadd.f32 %v3810_v40, %v3809_v9  ;;  %v899_v53 = vadd.f32 1.0, %v7262_v41  ;;  %v3758_v19 = vrot.slane %v3757_v33, 1  ;;  %v3722_v58 = vrot.slane %v3721_v46, 1  ;;  %v7269_v18 = vld [vmem:[#allocation11_spill] sm:$0xff] }
 0xb66   :  { %v3828_v5 = vrot.slane %v3827_v26, 2  ;;  %v3842_v16 = vsub.f32 %v3840_v29, %v3841_v55  ;;  %v3776_v61 = vrot.slane %v3775_v42, 1  ;;  %v3794_v6 = vrot.slane %v3793_v45, 1 }
 0xb67   :  { %v3741_v60 = vadd.f32 %v3740_v34, %v3739_v13  ;;  %v3812_v52 = vrot.slane %v3811_v51, 1  ;;  %4139 = vrcp.f32 %v899_v53  ;;  %v3759_v48 = vadd.f32 %v3758_v19, %v3757_v33 }
 0xb68   :  { %v3829_v54 = vadd.f32 %v3828_v5, %v3827_v26  ;;  %v3843_v50 = vsel %vm3716_vm4, %v3842_v16, 0.0  ;;  %vm3850_vm14 = vcmask 1040384   ;;  %v3723_v59 = vadd.f32 %v3722_v58, %v3721_v46 }
 0xb69   :  { %v3844_v57 = vrot.slane %v3843_v50, 4  ;;  %v3777_v22 = vadd.f32 %v3776_v61, %v3775_v42  ;;  %vm3852_vm8 = vcmask 1041408   ;;  %v3795_v47 = vadd.f32 %v3794_v6, %v3793_v45  ;;  %v7271_v42 = vld [vmem:[#allocation12_spill] sm:$0xff] }
 0xb6a   :  { %v3830_v0 = vrot.slane %v3829_v54, 1  ;;  %vm3854_vm11 = vcmask 1042432   ;;  %v3813_v17 = vadd.f32 %v3812_v52, %v3811_v51  ;;  %v3851_v44 = vsel %vm3850_vm14, %v3723_v59, %v3741_v60 }
 0xb6b   :  { %v3845_v15 = vadd.f32 %v3844_v57, %v3843_v50  ;;  %vm3856_vm15 = vcmask 1043456   ;;  %v3868_v14 = vperm.slane %v4149_v63, 4  ;;  %v3853_v2 = vsel %vm3852_vm8, %v3851_v44, %v3759_v48 }
 0xb6c   :  { %v3831_v28 = vadd.f32 %v3830_v0, %v3829_v54  ;;  %vm3858_vm9 = vcmask 1044480   ;;  %v3855_v25 = vsel %vm3854_vm11, %v3853_v2, %v3777_v22  ;;  %vm3860_vm10 = vcmask 1045504  }
 0xb6d   :  { %v3846_v32 = vrot.slane %v3845_v15, 2  ;;  %v4140_v49 = vpop.eup %4139  ;;  %v3857_v24 = vsel %vm3856_vm15, %v3855_v25, %v3795_v47  ;;  %vm3862_vm2 = vcmask 1046528   ;;  %v3869_v10 = vmul.f32 %v3868_v14, %v7263_v1 }
 0xb6e   :  { %v3859_v7 = vsel %vm3858_vm9, %v3857_v24, %v3813_v17  ;;  %v903_v9 = vmul.f32 %v4140_v49, %v7264_v11  ;;  %vm7265_vm1 = vcmask 261120   ;;  %v894_v43 = vsub.f32 0.0, %v7266_v27 }
 0xb6f   :  { %v3847_v39 = vadd.f32 %v3846_v32, %v3845_v15  ;;  %v3861_v56 = vsel %vm3860_vm10, %v3859_v7, %v3831_v28  ;;  %v3870_v4 = vmul.f32 %v3868_v14, %v7267_v30  ;;  %vm7268_vm6 = vmmov %vm7265_vm1  ;;  %v3879_v40 = vperm.slane %v4149_v63, 3 }
 0xb70   :  { %v897_v35 = vmul.f32 1.442695, %v894_v43  ;;  %vm7270_vm7 = vmmov %vm7265_vm1 }
 0xb71   :  { %v3848_v20 = vrot.slane %v3847_v39, 1  ;;  %vm7272_vm12 = vmmov %vm7265_vm1 }
 0xb72   :  { %4141 = vpow2.f32 %v897_v35 }
 0xb73   :  { %v3849_v62 = vadd.f32 %v3848_v20, %v3847_v39 }
 0xb75   :  { %v3863_v38 = vsel %vm3862_vm2, %v3861_v56, %v3849_v62 }
 0xb76   :  { %3865 = vrot.lane.b32.xlu2 %v3863_v38, %s4235_s20  ;;  %v3871_v8 = vadd.f32 %v3869_v10, %v3863_v38  ;;  %s3917_s20 = sshll.u32 %s4248_s1, 4  ;;  %s3918_s20 = int_to_ptr.vmem [resolvable:$true] %s3917_s20 }
 0xb78   :  { %v3873_v37 = vmul.f32 %v3871_v8, %v903_v9  ;;  %v4142_v36 = vpop.eup %4141 }
 0xb79   :  { %v900_v12 = vadd.f32 1.0, %v4142_v36 }
 0xb7a   :  { %4021 = vmatmul.msk.f32.vlgmr.msrb.gmra.mxu0 %vm7265_vm1, %v3873_v37 }
 0xb7b   :  { %4143 = vrcp.f32 %v900_v12 }
 0xb81   :  { %v4144_v23 = vpop.eup %4143 }
 0xb82   :  { %v904_v31 = vmul.f32 %v4144_v23, %v7266_v27 }
 0xbd0   :  { %v3866_v3 = vpop.permute.xlu2 %3865 }
 0xbd1   :  { %v3872_v21 = vadd.f32 %v3870_v4, %v3866_v3 }
 0xbd3   :  { %v3874_v13 = vmul.f32 %v3872_v21, %v904_v31 }
 0xbd5   :  { %4022 = vmatmul.msk.f32.gmra.mxu0 %vm7268_vm6, %v3874_v13 }
 0xbf7   :  { %v3903_v33 = vpop.f32.mrf.mxu0 }
 0xbf8   :  { %v3904_v26 = vadd.f32 %v3903_v33, %v3879_v40 }
 0xbfa   :  { %v3909_v29 = vadd.f32 %v3904_v26, %v7269_v18 }
 0xbfc   :  { %3911 = vst.msk [vmem:[#allocation7] sm:$0xff] %vm7270_vm7, %v3909_v29 }
 0xc52   :  { %v3906_v55 = vpop.f32.mrf.mxu0 }
 0xc53   :  { %v3907_v46 = vadd.f32 %v3906_v55, %v3879_v40 }
 0xc55   :  { %v3910_v45 = vadd.f32 %v3907_v46, %v7271_v42 }
 0xc57   :  { %3912 = vst.msk [vmem:[#allocation7 + $0x8] sm:$0xff] %vm7272_vm12, %v3910_v45 }
 0xc58   :  { %3925 = dma.vmem_to_hbm [thread:$0]  %s3918_s20, 256, %s3920_s4, [#allocation4], %s4232_s9, %s4232_s9, %s4233_s10  }
 0xc59   :  { %4226 = dma.done.wait [#allocation4], 256  }
 0xc5a   :  { %4227 = vsyncadd [#allocation4], 4294967040 }
 0xc5b   :  { %3930 = vsyncpa [#allocation3], 1 }
 0xc5c   :  { %3931 = vsyncpa [#allocation6], 1 }
 0xc5d   :  { %3932 = vsyncpa [#allocation4], 1 }

</bundles_post_ra>
